<compile_context>
chip_gen: v6e
topology: v6e:2x2x1
jax: 0.10.0
libtpu: 0.0.40
codegen_flags: <defaults>
</compile_context>

<pallas_src>
import numpy as np
import jax
import jax.numpy as jnp
from jax import lax
from jax.experimental import pallas as pl
from jax.experimental.pallas import tpu as pltpu

NEG_SLOPE = 0.01      # default LeakyReLU slope
GCN_WEIGHT = 10.0     # nn.Parameter(1, 1) init'd to 10
BN_EPS = 1e-5


def _leaky(x):
    return jnp.where(x >= 0, x, NEG_SLOPE * x)


# --------------------------------------------------------------------------
# Fused Het_Model kernel (whole model, both branches, merged recurrence)
# --------------------------------------------------------------------------
def _het_kernel(x_ref, at_ref, win_ref, bin_ref, whh_ref, bhh_ref,
                mstep_ref, b1_ref, w2_ref, b2_ref, out_ref):
    bb, L4, N = x_ref.shape          # x_ref: stream-aligned inputs (bb, 4*Smax, N)
    Hd = N
    S = L4 // 4                      # shared recurrence length = max(Fq, T)
    G = 4 * Hd                       # merged hidden width (4 streams)
    nh = b1_ref.shape[-1]

    # ---- shared normalized graph --------------------------------------------
    eye = jnp.eye(N, dtype=jnp.float32)
    hmat_t = at_ref[...] * (1.0 - eye) + eye            # (bb, N, N) == (A*(1-I)+I)^T
    # row degrees of H == column sums of H^T; plain f32 reduce (no MXU, no bf16)
    deg = jnp.sum(hmat_t, axis=1, keepdims=True)        # (bb, 1, N)
    dinv = lax.rsqrt(deg)            # assumes A >= 0 (deg >= 1), same as reference

    # ---- GCN conv for all 4 stream-aligned sequences in one einsum -----------
    #   seq = leaky(10 * ((X^T * dinv) @ H^T) * dinv)
    xs = x_ref[...] * dinv
    seq = jnp.einsum("bln,bnm->blm", xs, hmat_t,
                     preferred_element_type=jnp.float32)
    seq = _leaky(GCN_WEIGHT * seq * dinv)                # (bb, 4*S, N)

    # ---- GRU input projections for all streams (gate-major merged layout) ----
    gi2 = None
    for k in range(4):               # pre-loop, off the recurrence critical path
        sk = seq[:, k * S:(k + 1) * S, :].reshape(bb * S, N)
        part = jnp.dot(sk, win_ref[k], preferred_element_type=jnp.float32)
        gi2 = part if gi2 is None else gi2 + part
    gi = (gi2 + bin_ref[...]).reshape(bb, S, 3 * G)      # (bb, S, 12Hd)

    whh = whh_ref[...]               # (4Hd, 12Hd) block-diag, gate-major columns
    bhh = bhh_ref[...]

    # ---- shared merged recurrence: 1 matmul + 1 sigmoid + 1 tanh per step ----
    h = jnp.zeros((bb, G), jnp.float32)
    acc = jnp.zeros((bb, nh), jnp.float32)
    for s in range(S):               # static & small -> fully unrolled, in vregs
        g = gi[:, s, :]
        gh = jnp.dot(h, whh, preferred_element_type=jnp.float32) + bhh
        rz = jax.nn.sigmoid(g[:, :2 * G] + gh[:, :2 * G])
        r = rz[:, :G]
        z = rz[:, G:]
        n = jnp.tanh(g[:, 2 * G:] + r * gh[:, 2 * G:])
        h = (1.0 - z) * n + z * h
        # per-step folded BN + linF/linT + lin1 epilogue (hides under next step)
        acc = acc + jnp.dot(h, mstep_ref[s], preferred_element_type=jnp.float32)

    # ---- MLP head -------------------------------------------------------------
    h1 = _leaky(acc + b1_ref[...])
    out = jnp.dot(h1, w2_ref[...], preferred_element_type=jnp.float32) + b2_ref[...]
    out_ref[...] = out[None]


# --------------------------------------------------------------------------
# Wrapper: trace-time algebraic folds + single pallas_call
# --------------------------------------------------------------------------
def _prep_branch(p, w1_block):
    """Fold eval-mode BN + linF/linT + the matching lin1 block for one branch."""
    fdim, thalf = p["lin_wT"].shape
    two_hd = w1_block.shape[0] // thalf
    nh = w1_block.shape[1]
    hi = lax.Precision.HIGHEST       # tiny weight-only precompute
    w_eff = p["bn_scale"] * p["lin_wT"]                           # (Fdim, Thalf)
    w1r = w1_block.reshape(two_hd, thalf, nh)                     # (2Hd, Thalf, nh)
    m_flat = jnp.einsum("fk,hkj->fhj", w_eff, w1r,
                        precision=hi).reshape(fdim * two_hd, nh)
    zconst = (jnp.einsum("f,fk->k", p["bn_shift"][:, 0], p["lin_wT"],
                         precision=hi) + p["lin_b"][0])           # (Thalf,)
    const = jnp.einsum("k,hkj->j", zconst, w1r, precision=hi)     # (nh,)
    return m_flat, const


def _gate_major(w, k, n_streams, hd):
    """Scatter one stream's (rows, 3*hd) gate block into gate-major merged cols."""
    rows = w.shape[0]
    out = jnp.zeros((rows, 3 * n_streams * hd), jnp.float32)
    for g in range(3):
        out = out.at[:, (g * n_streams + k) * hd:(g * n_streams + k + 1) * hd].set(
            w[:, g * hd:(g + 1) * hd])
    return out


def _dir_step_blocks(m_flat, hd, s_max):
    """Per-step fwd/bwd (Hd, nh) epilogue blocks for one branch, zero-padded."""
    nh = m_flat.shape[1]
    length = m_flat.shape[0] // (2 * hd)
    m = m_flat.reshape(length, 2, hd, nh)
    fwd = m[:, 0]                    # loop step s -> output time s
    bwd = m[::-1, 1]                 # loop step s -> output time length-1-s
    if length < s_max:
        pad = ((0, s_max - length), (0, 0), (0, 0))
        fwd = jnp.pad(fwd, pad)
        bwd = jnp.pad(bwd, pad)
    return fwd, bwd


def _pad_seq(x, s_max):
    if x.shape[1] < s_max:
        x = jnp.pad(x, ((0, 0), (0, s_max - x.shape[1]), (0, 0)))
    return x


_NUM_TC_CACHE = None


def _num_tensorcores():
    """Best-effort TensorCore count per device; defaults to 1 (safe)."""
    global _NUM_TC_CACHE
    if _NUM_TC_CACHE is None:
        n = 1
        try:
            d = jax.devices()[0]
            if getattr(d, "platform", "") == "tpu":
                for attr in ("num_cores", "core_count"):
                    v = getattr(d, attr, None)
                    if isinstance(v, int) and v > 0:
                        n = v
                        break
        except Exception:
            n = 1
        _NUM_TC_CACHE = n
    return _NUM_TC_CACHE


def het_model_forward(x_T, x_F, A, params):
    """x_T: (B,N,T), x_F: (B,N,Fq), A: (B,N,N) -> (B, n_classes)."""
    B, N, T = x_T.shape
    Fq = x_F.shape[-1]
    Hd = N
    s_max = max(Fq, T)
    nh = params["lin1_wT"].shape[1]
    n_classes = params["lin2_wT"].shape[1]
    all_f = 2 * N * (T // 2)         # flattened size of each STDCN branch

    pf, pt = params["stdcn_F"], params["stdcn_T"]

    # TODO(synk): Dropout(p=0.2) is stochastic train-mode only; identity here (inference).
    # --- fold BN + linF/linT + lin1 blocks (trace time) -----------------------
    m_F, c_F = _prep_branch(pf, params["lin1_wT"][:all_f])
    m_T, c_T = _prep_branch(pt, params["lin1_wT"][all_f:])
    b1_eff = params["lin1_b"] + c_F[None, :] + c_T[None, :]          # (1, nh)

    # --- merged-stream GRU weights; stream order: F-fwd, F-bwd, T-fwd, T-bwd --
    w_ih = [pf["wih_fT"], pf["wih_bT"], pt["wih_fT"], pt["wih_bT"]]
    b_ih = [pf["bih_f"], pf["bih_b"], pt["bih_f"], pt["bih_b"]]
    w_hh = [pf["whh_fT"], pf["whh_bT"], pt["whh_fT"], pt["whh_bT"]]
    b_hh = [pf["bhh_f"], pf["bhh_b"], pt["bhh_f"], pt["bhh_b"]]
    win = jnp.stack([_gate_major(w_ih[k], k, 4, Hd) for k in range(4)], axis=0)
    b_in = sum(_gate_major(b_ih[k], k, 4, Hd) for k in range(4))     # (1, 12Hd)
    whh = jnp.concatenate([_gate_major(w_hh[k], k, 4, Hd) for k in range(4)],
                          axis=0)                                     # (4Hd, 12Hd)
    bhh = sum(_gate_major(b_hh[k], k, 4, Hd) for k in range(4))      # (1, 12Hd)

    # --- per-step folded epilogue matrix (Smax, 4Hd, nh) ----------------------
    f_fwd, f_bwd = _dir_step_blocks(m_F, Hd, s_max)
    t_fwd, t_bwd = _dir_step_blocks(m_T, Hd, s_max)
    mstep = jnp.concatenate([f_fwd, f_bwd, t_fwd, t_bwd], axis=1)

    # --- stream-aligned GCN input: [F-fwd | F-bwd | T-fwd | T-bwd] row blocks --
    xf_t = jnp.swapaxes(x_F, 1, 2)                                    # (B, Fq, N)
    xt_t = jnp.swapaxes(x_T, 1, 2)                                    # (B, T, N)
    x_al = jnp.concatenate([_pad_seq(xf_t, s_max),
                            _pad_seq(xf_t[:, ::-1, :], s_max),
                            _pad_seq(xt_t, s_max),
                            _pad_seq(xt_t[:, ::-1, :], s_max)],
                           axis=1)                                    # (B, 4*Smax, N)
    a_t = jnp.swapaxes(A, 1, 2)                                       # (B, N, N)

    # --- batch grid across TensorCores when the chip has more than one --------
    grid_b = 2 if (_num_tensorcores() >= 2 and B >= 2 and B % 2 == 0) else 1
    bb = B // grid_b

    flops = int(2 * B * 4 * s_max * N * N + 2 * 4 * B * s_max * N * 12 * Hd
                + 2 * s_max * B * 4 * Hd * 12 * Hd + 2 * s_max * B * 4 * Hd * nh
                + 2 * B * nh * n_classes)
    transc = int(B * s_max * 12 * Hd)
    bytes_acc = int(4 * (x_al.size + a_t.size + win.size + b_in.size + whh.size
                         + bhh.size + mstep.size + b1_eff.size
                         + params["lin2_wT"].size + params["lin2_b"].size
                         + B * n_classes))

    out = pl.pallas_call(
        _het_kernel,
        out_shape=jax.ShapeDtypeStruct((grid_b, bb, n_classes), jnp.float32),
        grid=(grid_b,),
        in_specs=[
            pl.BlockSpec((bb, 4 * s_max, N), lambda i: (i, 0, 0)),    # x aligned
            pl.BlockSpec((bb, N, N), lambda i: (i, 0, 0)),            # A^T
            pl.BlockSpec((4, N, 12 * Hd), lambda i: (0, 0, 0)),       # W_ih merged
            pl.BlockSpec((1, 12 * Hd), lambda i: (0, 0)),             # b_ih merged
            pl.BlockSpec((4 * Hd, 12 * Hd), lambda i: (0, 0)),        # W_hh merged
            pl.BlockSpec((1, 12 * Hd), lambda i: (0, 0)),             # b_hh merged
            pl.BlockSpec((s_max, 4 * Hd, nh), lambda i: (0, 0, 0)),   # per-step epi
            pl.BlockSpec((1, nh), lambda i: (0, 0)),                  # folded lin1 b
            pl.BlockSpec((nh, n_classes), lambda i: (0, 0)),          # lin2 W^T
            pl.BlockSpec((1, n_classes), lambda i: (0, 0)),           # lin2 b
        ],
        out_specs=pl.BlockSpec((1, bb, n_classes), lambda i: (i, 0, 0)),
        compiler_params=pltpu.CompilerParams(
            dimension_semantics=("parallel",)),
        cost_estimate=pl.CostEstimate(flops=flops, transcendentals=transc,
                                      bytes_accessed=bytes_acc),
    )(x_al, a_t, win, b_in, whh, bhh, mstep, b1_eff,
      params["lin2_wT"], params["lin2_b"])
    return out.reshape(B, n_classes)


# --------------------------------------------------------------------------
# Deterministic parameter init (PyTorch-style uniform fan-in init)
# --------------------------------------------------------------------------
def _uniform(key, shape, bound):
    return jax.random.uniform(key, shape, jnp.float32, -bound, bound)


def _init_gru_dir(key, input_size, hidden):
    k = jax.random.split(key, 4)
    s = 1.0 / np.sqrt(hidden)
    return (_uniform(k[0], (input_size, 3 * hidden), s),    # W_ih^T (r|z|n)
            _uniform(k[1], (hidden, 3 * hidden), s),        # W_hh^T
            _uniform(k[2], (1, 3 * hidden), s),             # b_ih
            _uniform(k[3], (1, 3 * hidden), s))             # b_hh


def _init_stdcn(key, num_f, n_nodes, lin_out):
    kf, kb, kw, kbias = jax.random.split(key, 4)
    wih_fT, whh_fT, bih_f, bhh_f = _init_gru_dir(kf, n_nodes, n_nodes)
    wih_bT, whh_bT, bih_b, bhh_b = _init_gru_dir(kb, n_nodes, n_nodes)
    s = 1.0 / np.sqrt(num_f)
    return dict(
        wih_fT=wih_fT, whh_fT=whh_fT, bih_f=bih_f, bhh_f=bhh_f,
        wih_bT=wih_bT, whh_bT=whh_bT, bih_b=bih_b, bhh_b=bhh_b,
        bn_scale=jnp.full((num_f, 1), 1.0 / np.sqrt(1.0 + BN_EPS), jnp.float32),
        bn_shift=jnp.zeros((num_f, 1), jnp.float32),
        lin_wT=_uniform(kw, (num_f, lin_out), s),
        lin_b=_uniform(kbias, (1, lin_out), s),
    )


def init_params(key, n_nodes, n_time, n_freq, n_hidden, n_classes):
    kF, kT, k1w, k1b, k2w, k2b = jax.random.split(key, 6)
    all_dim = n_time * n_nodes * 2
    s1 = 1.0 / np.sqrt(all_dim)
    s2 = 1.0 / np.sqrt(n_hidden)
    return dict(
        stdcn_F=_init_stdcn(kF, n_freq, n_nodes, n_time // 2),
        stdcn_T=_init_stdcn(kT, n_time, n_nodes, n_time // 2),
        lin1_wT=_uniform(k1w, (all_dim, n_hidden), s1),
        lin1_b=_uniform(k1b, (1, n_hidden), s1),
        lin2_wT=_uniform(k2w, (n_hidden, n_classes), s2),
        lin2_b=_uniform(k2b, (1, n_classes), s2),
    )


# --------------------------------------------------------------------------
# Pure-JAX reference (original unfused BN/permute/linF/flatten/lin1/lin2 path)
# --------------------------------------------------------------------------
def _ref_stdcn(x, a, p):
    B, N, Fdim = x.shape
    Hd = N
    eye = jnp.eye(N, dtype=jnp.float32)
    Hmat = a * (1.0 - eye) + eye
    deg = jnp.sum(Hmat, axis=-1, keepdims=True)             # (B, N, 1)
    dinv = lax.rsqrt(deg)
    gc = GCN_WEIGHT * dinv * jnp.einsum("bij,bjf->bif", Hmat, dinv * x)
    gc = jnp.where(gc >= 0, gc, NEG_SLOPE * gc)
    seq = jnp.transpose(gc, (0, 2, 1))                       # (B, Fdim, N)

    def gru_dir(wihT, whhT, bih, bhh, reverse):
        gi = jnp.einsum("bfn,nk->bfk", seq, wihT) + bih
        gi_t = jnp.transpose(gi, (1, 0, 2))
        if reverse:
            gi_t = gi_t[::-1]

        def step(h, g):
            gh = h @ whhT + bhh
            r = jax.nn.sigmoid(g[:, :Hd] + gh[:, :Hd])
            z = jax.nn.sigmoid(g[:, Hd:2 * Hd] + gh[:, Hd:2 * Hd])
            n = jnp.tanh(g[:, 2 * Hd:] + r * gh[:, 2 * Hd:])
            h_new = (1.0 - z) * n + z * h
            return h_new, h_new

        _, outs = lax.scan(step, jnp.zeros((B, Hd), jnp.float32), gi_t)
        if reverse:
            outs = outs[::-1]
        return jnp.transpose(outs, (1, 0, 2))

    of = gru_dir(p["wih_fT"], p["whh_fT"], p["bih_f"], p["bhh_f"], False)
    ob = gru_dir(p["wih_bT"], p["whh_bT"], p["bih_b"], p["bhh_b"], True)
    g = jnp.concatenate([of, ob], axis=-1)                   # (B, Fdim, 2Hd)
    g = g * p["bn_scale"][None] + p["bn_shift"][None]        # BatchNorm1d (eval)
    per2 = jnp.transpose(g, (0, 2, 1))                       # (B, 2Hd, Fdim)
    return jnp.einsum("bnf,fk->bnk", per2, p["lin_wT"]) + p["lin_b"]


def ref_forward(x_T, x_F, A, params):
    B = x_T.shape[0]
    out_F = _ref_stdcn(x_F, A, params["stdcn_F"]).reshape(B, -1)
    out_T = _ref_stdcn(x_T, A, params["stdcn_T"]).reshape(B, -1)
    out = jnp.concatenate([out_F, out_T], axis=-1)
    h = out @ params["lin1_wT"] + params["lin1_b"]
    h = jnp.where(h >= 0, h, NEG_SLOPE * h)
    return h @ params["lin2_wT"] + params["lin2_b"]


# --------------------------------------------------------------------------
if __name__ == "__main__":
    B, N, T, Fq = 2, 8, 16, 8           # batch, num_nodes, num_time, num_freq
    num_classes, num_hiddens = 3, 32

    key = jax.random.PRNGKey(0)
    k1, k2, k3, kp = jax.random.split(key, 4)
    x_T = jax.random.normal(k1, (B, N, T), jnp.float32)
    x_F = jax.random.normal(k2, (B, N, Fq), jnp.float32)
    A = jax.random.uniform(k3, (B, N, N), jnp.float32)

    params = init_params(kp, N, T, Fq, num_hiddens, num_classes)

    fwd = jax.jit(het_model_forward)
    out = jax.block_until_ready(fwd(x_T, x_F, A, params))

    ref = jax.block_until_ready(ref_forward(x_T, x_F, A, params))
    np.testing.assert_allclose(np.asarray(out), np.asarray(ref),
                               rtol=2e-2, atol=2e-2)
    assert out.shape == (B, num_classes)
    print("KERNEL_OK")
</pallas_src>

<mosaic_0001>
module attributes {stable_mosaic.version = 11 : i64} {
  func.func @_het_kernel(%arg0: i32, %arg1: memref<2x64x8xf32, #tpu.memory_space<vmem>>, %arg2: memref<2x8x8xf32, #tpu.memory_space<vmem>>, %arg3: memref<4x8x96xf32, #tpu.memory_space<vmem>>, %arg4: memref<1x96xf32, #tpu.memory_space<vmem>>, %arg5: memref<32x96xf32, #tpu.memory_space<vmem>>, %arg6: memref<1x96xf32, #tpu.memory_space<vmem>>, %arg7: memref<16x32x32xf32, #tpu.memory_space<vmem>>, %arg8: memref<1x32xf32, #tpu.memory_space<vmem>>, %arg9: memref<32x3xf32, #tpu.memory_space<vmem>>, %arg10: memref<1x3xf32, #tpu.memory_space<vmem>>, %arg11: memref<1x2x3xf32, #tpu.memory_space<vmem>>) attributes {dimension_semantics = [#tpu.dimension_semantics<parallel>], iteration_bounds = array<i64: 1>, scalar_prefetch = 0 : i64, scratch_operands = 0 : i64, tpu.core_type = #tpu.core_type<tc>, window_params = [{transform_indices = @transform_0, window_bounds = array<i64: 2, 64, 8>}, {transform_indices = @transform_1, window_bounds = array<i64: 2, 8, 8>}, {pipeline_mode = #tpu.pipeline_mode<synchronous>, transform_indices = @transform_2, window_bounds = array<i64: 4, 8, 96>}, {pipeline_mode = #tpu.pipeline_mode<synchronous>, transform_indices = @transform_3, window_bounds = array<i64: 1, 96>}, {pipeline_mode = #tpu.pipeline_mode<synchronous>, transform_indices = @transform_4, window_bounds = array<i64: 32, 96>}, {pipeline_mode = #tpu.pipeline_mode<synchronous>, transform_indices = @transform_5, window_bounds = array<i64: 1, 96>}, {pipeline_mode = #tpu.pipeline_mode<synchronous>, transform_indices = @transform_6, window_bounds = array<i64: 16, 32, 32>}, {pipeline_mode = #tpu.pipeline_mode<synchronous>, transform_indices = @transform_7, window_bounds = array<i64: 1, 32>}, {pipeline_mode = #tpu.pipeline_mode<synchronous>, transform_indices = @transform_8, window_bounds = array<i64: 32, 3>}, {pipeline_mode = #tpu.pipeline_mode<synchronous>, transform_indices = @transform_9, window_bounds = array<i64: 1, 3>}, {transform_indices = @transform_10, window_bounds = array<i64: 1, 2, 3>}]} {
    %0 = tpu.iota {dimensions = array<i32: 0>} : vector<8x8xi32>
    %1 = tpu.iota {dimensions = array<i32: 1>} : vector<8x8xi32>
    %c0_i32 = arith.constant 0 : i32
    %2 = vector.broadcast %c0_i32 : i32 to vector<8x8xi32>
    %3 = arith.addi %0, %2 : vector<8x8xi32>
    %4 = arith.cmpi eq, %3, %1 : vector<8x8xi32>
    %5 = arith.extui %4 : vector<8x8xi1> to vector<8x8xi32>
    %6 = arith.sitofp %5 : vector<8x8xi32> to vector<8x8xf32>
    %c0 = arith.constant 0 : index
    %c0_0 = arith.constant 0 : index
    %c0_1 = arith.constant 0 : index
    %7 = vector.load %arg2[%c0, %c0_0, %c0_1] : memref<2x8x8xf32, #tpu.memory_space<vmem>>, vector<2x8x8xf32>
    %cst = arith.constant 1.000000e+00 : f32
    %8 = vector.broadcast %cst : f32 to vector<8x8xf32>
    %9 = arith.subf %8, %6 : vector<8x8xf32>
    %10 = vector.shape_cast %9 : vector<8x8xf32> to vector<1x8x8xf32>
    %11 = vector.broadcast %10 : vector<1x8x8xf32> to vector<2x8x8xf32>
    %12 = arith.mulf %7, %11 : vector<2x8x8xf32>
    %13 = vector.shape_cast %6 : vector<8x8xf32> to vector<1x8x8xf32>
    %14 = vector.broadcast %13 : vector<1x8x8xf32> to vector<2x8x8xf32>
    %15 = arith.addf %12, %14 : vector<2x8x8xf32>
    %cst_2 = arith.constant dense<0.000000e+00> : vector<2x8xf32>
    %16 = vector.multi_reduction <add>, %15, %cst_2 [1] : vector<2x8x8xf32> to vector<2x8xf32>
    %17 = vector.shape_cast %16 : vector<2x8xf32> to vector<2x1x8xf32>
    %18 = math.rsqrt %17 : vector<2x1x8xf32>
    %c0_3 = arith.constant 0 : index
    %c0_4 = arith.constant 0 : index
    %c0_5 = arith.constant 0 : index
    %19 = vector.load %arg1[%c0_3, %c0_4, %c0_5] : memref<2x64x8xf32, #tpu.memory_space<vmem>>, vector<2x64x8xf32>
    %20 = vector.broadcast %18 : vector<2x1x8xf32> to vector<2x64x8xf32>
    %21 = arith.mulf %19, %20 : vector<2x64x8xf32>
    "tpu.trace_start"() <{level = 10 : i32, message = "bln,bnm->blm"}> : () -> ()
    %cst_6 = arith.constant dense<0.000000e+00> : vector<2x64x8xf32>
    %22 = tpu.matmul %21, %15, %cst_6 {dimension_numbers = #tpu.dot_dimension_numbers<[2], [1], [1], [2], [0, 0, 0, 1, 1, 2], [0], [0]>} : vector<2x64x8xf32>, vector<2x8x8xf32>, vector<2x64x8xf32> -> vector<2x64x8xf32>
    "tpu.trace_stop"() : () -> ()
    %cst_7 = arith.constant 1.000000e+01 : f32
    %23 = vector.broadcast %cst_7 : f32 to vector<2x64x8xf32>
    %24 = arith.mulf %23, %22 : vector<2x64x8xf32>
    %25 = vector.broadcast %18 : vector<2x1x8xf32> to vector<2x64x8xf32>
    %26 = arith.mulf %24, %25 : vector<2x64x8xf32>
    %cst_8 = arith.constant 0.000000e+00 : f32
    %27 = vector.broadcast %cst_8 : f32 to vector<2x64x8xf32>
    %28 = arith.cmpf oge, %26, %27 : vector<2x64x8xf32>
    %cst_9 = arith.constant 0.00999999977 : f32
    %29 = vector.broadcast %cst_9 : f32 to vector<2x64x8xf32>
    %30 = arith.mulf %29, %26 : vector<2x64x8xf32>
    %31 = arith.select %28, %26, %30 : vector<2x64x8xi1>, vector<2x64x8xf32>
    %32 = vector.extract_strided_slice %31 {offsets = [0, 0, 0], sizes = [2, 16, 8], strides = [1, 1, 1]} : vector<2x64x8xf32> to vector<2x16x8xf32>
    %33 = vector.shape_cast %32 : vector<2x16x8xf32> to vector<32x8xf32>
    %c0_10 = arith.constant 0 : index
    %c0_11 = arith.constant 0 : index
    %c0_12 = arith.constant 0 : index
    %34 = vector.load %arg3[%c0_10, %c0_11, %c0_12] : memref<4x8x96xf32, #tpu.memory_space<vmem>>, vector<1x8x96xf32>
    %35 = vector.shape_cast %34 : vector<1x8x96xf32> to vector<8x96xf32>
    %cst_13 = arith.constant dense<0.000000e+00> : vector<32x96xf32>
    %36 = tpu.matmul %33, %35, %cst_13 {dimension_numbers = #tpu.dot_dimension_numbers<[1], [0], [0], [1], [0, 0, 1, 1], [], []>} : vector<32x8xf32>, vector<8x96xf32>, vector<32x96xf32> -> vector<32x96xf32>
    %37 = vector.extract_strided_slice %31 {offsets = [0, 16, 0], sizes = [2, 16, 8], strides = [1, 1, 1]} : vector<2x64x8xf32> to vector<2x16x8xf32>
    %38 = vector.shape_cast %37 : vector<2x16x8xf32> to vector<32x8xf32>
    %c1 = arith.constant 1 : index
    %c0_14 = arith.constant 0 : index
    %c0_15 = arith.constant 0 : index
    %39 = vector.load %arg3[%c1, %c0_14, %c0_15] : memref<4x8x96xf32, #tpu.memory_space<vmem>>, vector<1x8x96xf32>
    %40 = vector.shape_cast %39 : vector<1x8x96xf32> to vector<8x96xf32>
    %cst_16 = arith.constant dense<0.000000e+00> : vector<32x96xf32>
    %41 = tpu.matmul %38, %40, %cst_16 {dimension_numbers = #tpu.dot_dimension_numbers<[1], [0], [0], [1], [0, 0, 1, 1], [], []>} : vector<32x8xf32>, vector<8x96xf32>, vector<32x96xf32> -> vector<32x96xf32>
    %42 = arith.addf %36, %41 : vector<32x96xf32>
    %43 = vector.extract_strided_slice %31 {offsets = [0, 32, 0], sizes = [2, 16, 8], strides = [1, 1, 1]} : vector<2x64x8xf32> to vector<2x16x8xf32>
    %44 = vector.shape_cast %43 : vector<2x16x8xf32> to vector<32x8xf32>
    %c2 = arith.constant 2 : index
    %c0_17 = arith.constant 0 : index
    %c0_18 = arith.constant 0 : index
    %45 = vector.load %arg3[%c2, %c0_17, %c0_18] : memref<4x8x96xf32, #tpu.memory_space<vmem>>, vector<1x8x96xf32>
    %46 = vector.shape_cast %45 : vector<1x8x96xf32> to vector<8x96xf32>
    %cst_19 = arith.constant dense<0.000000e+00> : vector<32x96xf32>
    %47 = tpu.matmul %44, %46, %cst_19 {dimension_numbers = #tpu.dot_dimension_numbers<[1], [0], [0], [1], [0, 0, 1, 1], [], []>} : vector<32x8xf32>, vector<8x96xf32>, vector<32x96xf32> -> vector<32x96xf32>
    %48 = arith.addf %42, %47 : vector<32x96xf32>
    %49 = vector.extract_strided_slice %31 {offsets = [0, 48, 0], sizes = [2, 16, 8], strides = [1, 1, 1]} : vector<2x64x8xf32> to vector<2x16x8xf32>
    %50 = vector.shape_cast %49 : vector<2x16x8xf32> to vector<32x8xf32>
    %c3 = arith.constant 3 : index
    %c0_20 = arith.constant 0 : index
    %c0_21 = arith.constant 0 : index
    %51 = vector.load %arg3[%c3, %c0_20, %c0_21] : memref<4x8x96xf32, #tpu.memory_space<vmem>>, vector<1x8x96xf32>
    %52 = vector.shape_cast %51 : vector<1x8x96xf32> to vector<8x96xf32>
    %cst_22 = arith.constant dense<0.000000e+00> : vector<32x96xf32>
    %53 = tpu.matmul %50, %52, %cst_22 {dimension_numbers = #tpu.dot_dimension_numbers<[1], [0], [0], [1], [0, 0, 1, 1], [], []>} : vector<32x8xf32>, vector<8x96xf32>, vector<32x96xf32> -> vector<32x96xf32>
    %54 = arith.addf %48, %53 : vector<32x96xf32>
    %c0_23 = arith.constant 0 : index
    %c0_24 = arith.constant 0 : index
    %55 = vector.load %arg4[%c0_23, %c0_24] : memref<1x96xf32, #tpu.memory_space<vmem>>, vector<1x96xf32>
    %56 = vector.broadcast %55 : vector<1x96xf32> to vector<32x96xf32>
    %57 = arith.addf %54, %56 : vector<32x96xf32>
    %58 = vector.shape_cast %57 : vector<32x96xf32> to vector<2x16x96xf32>
    %c0_25 = arith.constant 0 : index
    %c0_26 = arith.constant 0 : index
    %59 = vector.load %arg5[%c0_25, %c0_26] : memref<32x96xf32, #tpu.memory_space<vmem>>, vector<32x96xf32>
    %c0_27 = arith.constant 0 : index
    %c0_28 = arith.constant 0 : index
    %60 = vector.load %arg6[%c0_27, %c0_28] : memref<1x96xf32, #tpu.memory_space<vmem>>, vector<1x96xf32>
    %cst_29 = arith.constant 0.000000e+00 : f32
    %61 = vector.broadcast %cst_29 : f32 to vector<2x32xf32>
    %cst_30 = arith.constant 0.000000e+00 : f32
    %62 = vector.broadcast %cst_30 : f32 to vector<2x32xf32>
    %63 = vector.extract_strided_slice %58 {offsets = [0, 0, 0], sizes = [2, 1, 96], strides = [1, 1, 1]} : vector<2x16x96xf32> to vector<2x1x96xf32>
    %64 = vector.shape_cast %63 : vector<2x1x96xf32> to vector<2x96xf32>
    %cst_31 = arith.constant dense<0.000000e+00> : vector<2x96xf32>
    %65 = tpu.matmul %61, %59, %cst_31 {dimension_numbers = #tpu.dot_dimension_numbers<[1], [0], [0], [1], [0, 0, 1, 1], [], []>} : vector<2x32xf32>, vector<32x96xf32>, vector<2x96xf32> -> vector<2x96xf32>
    %66 = vector.broadcast %60 : vector<1x96xf32> to vector<2x96xf32>
    %67 = arith.addf %65, %66 : vector<2x96xf32>
    %68 = vector.extract_strided_slice %64 {offsets = [0, 0], sizes = [2, 64], strides = [1, 1]} : vector<2x96xf32> to vector<2x64xf32>
    %69 = vector.extract_strided_slice %67 {offsets = [0, 0], sizes = [2, 64], strides = [1, 1]} : vector<2x96xf32> to vector<2x64xf32>
    %70 = arith.addf %68, %69 : vector<2x64xf32>
    %71 = arith.negf %70 : vector<2x64xf32>
    %72 = math.exp %71 : vector<2x64xf32>
    %cst_32 = arith.constant 1.000000e+00 : f32
    %73 = vector.broadcast %cst_32 : f32 to vector<2x64xf32>
    %74 = arith.addf %73, %72 : vector<2x64xf32>
    %75 = arith.divf %73, %74 : vector<2x64xf32>
    %76 = vector.extract_strided_slice %75 {offsets = [0, 0], sizes = [2, 32], strides = [1, 1]} : vector<2x64xf32> to vector<2x32xf32>
    %77 = vector.extract_strided_slice %75 {offsets = [0, 32], sizes = [2, 32], strides = [1, 1]} : vector<2x64xf32> to vector<2x32xf32>
    %78 = vector.extract_strided_slice %64 {offsets = [0, 64], sizes = [2, 32], strides = [1, 1]} : vector<2x96xf32> to vector<2x32xf32>
    %79 = vector.extract_strided_slice %67 {offsets = [0, 64], sizes = [2, 32], strides = [1, 1]} : vector<2x96xf32> to vector<2x32xf32>
    %80 = arith.mulf %76, %79 : vector<2x32xf32>
    %81 = arith.addf %78, %80 : vector<2x32xf32>
    %82 = math.tanh %81 : vector<2x32xf32>
    %cst_33 = arith.constant 1.000000e+00 : f32
    %83 = vector.broadcast %cst_33 : f32 to vector<2x32xf32>
    %84 = arith.subf %83, %77 : vector<2x32xf32>
    %85 = arith.mulf %84, %82 : vector<2x32xf32>
    %86 = arith.mulf %77, %61 : vector<2x32xf32>
    %87 = arith.addf %85, %86 : vector<2x32xf32>
    %c0_34 = arith.constant 0 : index
    %c0_35 = arith.constant 0 : index
    %c0_36 = arith.constant 0 : index
    %88 = vector.load %arg7[%c0_34, %c0_35, %c0_36] : memref<16x32x32xf32, #tpu.memory_space<vmem>>, vector<1x32x32xf32>
    %89 = vector.shape_cast %88 : vector<1x32x32xf32> to vector<32x32xf32>
    %cst_37 = arith.constant dense<0.000000e+00> : vector<2x32xf32>
    %90 = tpu.matmul %87, %89, %cst_37 {dimension_numbers = #tpu.dot_dimension_numbers<[1], [0], [0], [1], [0, 0, 1, 1], [], []>} : vector<2x32xf32>, vector<32x32xf32>, vector<2x32xf32> -> vector<2x32xf32>
    %91 = arith.addf %62, %90 : vector<2x32xf32>
    %92 = vector.extract_strided_slice %58 {offsets = [0, 1, 0], sizes = [2, 1, 96], strides = [1, 1, 1]} : vector<2x16x96xf32> to vector<2x1x96xf32>
    %93 = vector.shape_cast %92 : vector<2x1x96xf32> to vector<2x96xf32>
    %cst_38 = arith.constant dense<0.000000e+00> : vector<2x96xf32>
    %94 = tpu.matmul %87, %59, %cst_38 {dimension_numbers = #tpu.dot_dimension_numbers<[1], [0], [0], [1], [0, 0, 1, 1], [], []>} : vector<2x32xf32>, vector<32x96xf32>, vector<2x96xf32> -> vector<2x96xf32>
    %95 = vector.broadcast %60 : vector<1x96xf32> to vector<2x96xf32>
    %96 = arith.addf %94, %95 : vector<2x96xf32>
    %97 = vector.extract_strided_slice %93 {offsets = [0, 0], sizes = [2, 64], strides = [1, 1]} : vector<2x96xf32> to vector<2x64xf32>
    %98 = vector.extract_strided_slice %96 {offsets = [0, 0], sizes = [2, 64], strides = [1, 1]} : vector<2x96xf32> to vector<2x64xf32>
    %99 = arith.addf %97, %98 : vector<2x64xf32>
    %100 = arith.negf %99 : vector<2x64xf32>
    %101 = math.exp %100 : vector<2x64xf32>
    %cst_39 = arith.constant 1.000000e+00 : f32
    %102 = vector.broadcast %cst_39 : f32 to vector<2x64xf32>
    %103 = arith.addf %102, %101 : vector<2x64xf32>
    %104 = arith.divf %102, %103 : vector<2x64xf32>
    %105 = vector.extract_strided_slice %104 {offsets = [0, 0], sizes = [2, 32], strides = [1, 1]} : vector<2x64xf32> to vector<2x32xf32>
    %106 = vector.extract_strided_slice %104 {offsets = [0, 32], sizes = [2, 32], strides = [1, 1]} : vector<2x64xf32> to vector<2x32xf32>
    %107 = vector.extract_strided_slice %93 {offsets = [0, 64], sizes = [2, 32], strides = [1, 1]} : vector<2x96xf32> to vector<2x32xf32>
    %108 = vector.extract_strided_slice %96 {offsets = [0, 64], sizes = [2, 32], strides = [1, 1]} : vector<2x96xf32> to vector<2x32xf32>
    %109 = arith.mulf %105, %108 : vector<2x32xf32>
    %110 = arith.addf %107, %109 : vector<2x32xf32>
    %111 = math.tanh %110 : vector<2x32xf32>
    %cst_40 = arith.constant 1.000000e+00 : f32
    %112 = vector.broadcast %cst_40 : f32 to vector<2x32xf32>
    %113 = arith.subf %112, %106 : vector<2x32xf32>
    %114 = arith.mulf %113, %111 : vector<2x32xf32>
    %115 = arith.mulf %106, %87 : vector<2x32xf32>
    %116 = arith.addf %114, %115 : vector<2x32xf32>
    %c1_41 = arith.constant 1 : index
    %c0_42 = arith.constant 0 : index
    %c0_43 = arith.constant 0 : index
    %117 = vector.load %arg7[%c1_41, %c0_42, %c0_43] : memref<16x32x32xf32, #tpu.memory_space<vmem>>, vector<1x32x32xf32>
    %118 = vector.shape_cast %117 : vector<1x32x32xf32> to vector<32x32xf32>
    %cst_44 = arith.constant dense<0.000000e+00> : vector<2x32xf32>
    %119 = tpu.matmul %116, %118, %cst_44 {dimension_numbers = #tpu.dot_dimension_numbers<[1], [0], [0], [1], [0, 0, 1, 1], [], []>} : vector<2x32xf32>, vector<32x32xf32>, vector<2x32xf32> -> vector<2x32xf32>
    %120 = arith.addf %91, %119 : vector<2x32xf32>
    %121 = vector.extract_strided_slice %58 {offsets = [0, 2, 0], sizes = [2, 1, 96], strides = [1, 1, 1]} : vector<2x16x96xf32> to vector<2x1x96xf32>
    %122 = vector.shape_cast %121 : vector<2x1x96xf32> to vector<2x96xf32>
    %cst_45 = arith.constant dense<0.000000e+00> : vector<2x96xf32>
    %123 = tpu.matmul %116, %59, %cst_45 {dimension_numbers = #tpu.dot_dimension_numbers<[1], [0], [0], [1], [0, 0, 1, 1], [], []>} : vector<2x32xf32>, vector<32x96xf32>, vector<2x96xf32> -> vector<2x96xf32>
    %124 = vector.broadcast %60 : vector<1x96xf32> to vector<2x96xf32>
    %125 = arith.addf %123, %124 : vector<2x96xf32>
    %126 = vector.extract_strided_slice %122 {offsets = [0, 0], sizes = [2, 64], strides = [1, 1]} : vector<2x96xf32> to vector<2x64xf32>
    %127 = vector.extract_strided_slice %125 {offsets = [0, 0], sizes = [2, 64], strides = [1, 1]} : vector<2x96xf32> to vector<2x64xf32>
    %128 = arith.addf %126, %127 : vector<2x64xf32>
    %129 = arith.negf %128 : vector<2x64xf32>
    %130 = math.exp %129 : vector<2x64xf32>
    %cst_46 = arith.constant 1.000000e+00 : f32
    %131 = vector.broadcast %cst_46 : f32 to vector<2x64xf32>
    %132 = arith.addf %131, %130 : vector<2x64xf32>
    %133 = arith.divf %131, %132 : vector<2x64xf32>
    %134 = vector.extract_strided_slice %133 {offsets = [0, 0], sizes = [2, 32], strides = [1, 1]} : vector<2x64xf32> to vector<2x32xf32>
    %135 = vector.extract_strided_slice %133 {offsets = [0, 32], sizes = [2, 32], strides = [1, 1]} : vector<2x64xf32> to vector<2x32xf32>
    %136 = vector.extract_strided_slice %122 {offsets = [0, 64], sizes = [2, 32], strides = [1, 1]} : vector<2x96xf32> to vector<2x32xf32>
    %137 = vector.extract_strided_slice %125 {offsets = [0, 64], sizes = [2, 32], strides = [1, 1]} : vector<2x96xf32> to vector<2x32xf32>
    %138 = arith.mulf %134, %137 : vector<2x32xf32>
    %139 = arith.addf %136, %138 : vector<2x32xf32>
    %140 = math.tanh %139 : vector<2x32xf32>
    %cst_47 = arith.constant 1.000000e+00 : f32
    %141 = vector.broadcast %cst_47 : f32 to vector<2x32xf32>
    %142 = arith.subf %141, %135 : vector<2x32xf32>
    %143 = arith.mulf %142, %140 : vector<2x32xf32>
    %144 = arith.mulf %135, %116 : vector<2x32xf32>
    %145 = arith.addf %143, %144 : vector<2x32xf32>
    %c2_48 = arith.constant 2 : index
    %c0_49 = arith.constant 0 : index
    %c0_50 = arith.constant 0 : index
    %146 = vector.load %arg7[%c2_48, %c0_49, %c0_50] : memref<16x32x32xf32, #tpu.memory_space<vmem>>, vector<1x32x32xf32>
    %147 = vector.shape_cast %146 : vector<1x32x32xf32> to vector<32x32xf32>
    %cst_51 = arith.constant dense<0.000000e+00> : vector<2x32xf32>
    %148 = tpu.matmul %145, %147, %cst_51 {dimension_numbers = #tpu.dot_dimension_numbers<[1], [0], [0], [1], [0, 0, 1, 1], [], []>} : vector<2x32xf32>, vector<32x32xf32>, vector<2x32xf32> -> vector<2x32xf32>
    %149 = arith.addf %120, %148 : vector<2x32xf32>
    %150 = vector.extract_strided_slice %58 {offsets = [0, 3, 0], sizes = [2, 1, 96], strides = [1, 1, 1]} : vector<2x16x96xf32> to vector<2x1x96xf32>
    %151 = vector.shape_cast %150 : vector<2x1x96xf32> to vector<2x96xf32>
    %cst_52 = arith.constant dense<0.000000e+00> : vector<2x96xf32>
    %152 = tpu.matmul %145, %59, %cst_52 {dimension_numbers = #tpu.dot_dimension_numbers<[1], [0], [0], [1], [0, 0, 1, 1], [], []>} : vector<2x32xf32>, vector<32x96xf32>, vector<2x96xf32> -> vector<2x96xf32>
    %153 = vector.broadcast %60 : vector<1x96xf32> to vector<2x96xf32>
    %154 = arith.addf %152, %153 : vector<2x96xf32>
    %155 = vector.extract_strided_slice %151 {offsets = [0, 0], sizes = [2, 64], strides = [1, 1]} : vector<2x96xf32> to vector<2x64xf32>
    %156 = vector.extract_strided_slice %154 {offsets = [0, 0], sizes = [2, 64], strides = [1, 1]} : vector<2x96xf32> to vector<2x64xf32>
    %157 = arith.addf %155, %156 : vector<2x64xf32>
    %158 = arith.negf %157 : vector<2x64xf32>
    %159 = math.exp %158 : vector<2x64xf32>
    %cst_53 = arith.constant 1.000000e+00 : f32
    %160 = vector.broadcast %cst_53 : f32 to vector<2x64xf32>
    %161 = arith.addf %160, %159 : vector<2x64xf32>
    %162 = arith.divf %160, %161 : vector<2x64xf32>
    %163 = vector.extract_strided_slice %162 {offsets = [0, 0], sizes = [2, 32], strides = [1, 1]} : vector<2x64xf32> to vector<2x32xf32>
    %164 = vector.extract_strided_slice %162 {offsets = [0, 32], sizes = [2, 32], strides = [1, 1]} : vector<2x64xf32> to vector<2x32xf32>
    %165 = vector.extract_strided_slice %151 {offsets = [0, 64], sizes = [2, 32], strides = [1, 1]} : vector<2x96xf32> to vector<2x32xf32>
    %166 = vector.extract_strided_slice %154 {offsets = [0, 64], sizes = [2, 32], strides = [1, 1]} : vector<2x96xf32> to vector<2x32xf32>
    %167 = arith.mulf %163, %166 : vector<2x32xf32>
    %168 = arith.addf %165, %167 : vector<2x32xf32>
    %169 = math.tanh %168 : vector<2x32xf32>
    %cst_54 = arith.constant 1.000000e+00 : f32
    %170 = vector.broadcast %cst_54 : f32 to vector<2x32xf32>
    %171 = arith.subf %170, %164 : vector<2x32xf32>
    %172 = arith.mulf %171, %169 : vector<2x32xf32>
    %173 = arith.mulf %164, %145 : vector<2x32xf32>
    %174 = arith.addf %172, %173 : vector<2x32xf32>
    %c3_55 = arith.constant 3 : index
    %c0_56 = arith.constant 0 : index
    %c0_57 = arith.constant 0 : index
    %175 = vector.load %arg7[%c3_55, %c0_56, %c0_57] : memref<16x32x32xf32, #tpu.memory_space<vmem>>, vector<1x32x32xf32>
    %176 = vector.shape_cast %175 : vector<1x32x32xf32> to vector<32x32xf32>
    %cst_58 = arith.constant dense<0.000000e+00> : vector<2x32xf32>
    %177 = tpu.matmul %174, %176, %cst_58 {dimension_numbers = #tpu.dot_dimension_numbers<[1], [0], [0], [1], [0, 0, 1, 1], [], []>} : vector<2x32xf32>, vector<32x32xf32>, vector<2x32xf32> -> vector<2x32xf32>
    %178 = arith.addf %149, %177 : vector<2x32xf32>
    %179 = vector.extract_strided_slice %58 {offsets = [0, 4, 0], sizes = [2, 1, 96], strides = [1, 1, 1]} : vector<2x16x96xf32> to vector<2x1x96xf32>
    %180 = vector.shape_cast %179 : vector<2x1x96xf32> to vector<2x96xf32>
    %cst_59 = arith.constant dense<0.000000e+00> : vector<2x96xf32>
    %181 = tpu.matmul %174, %59, %cst_59 {dimension_numbers = #tpu.dot_dimension_numbers<[1], [0], [0], [1], [0, 0, 1, 1], [], []>} : vector<2x32xf32>, vector<32x96xf32>, vector<2x96xf32> -> vector<2x96xf32>
    %182 = vector.broadcast %60 : vector<1x96xf32> to vector<2x96xf32>
    %183 = arith.addf %181, %182 : vector<2x96xf32>
    %184 = vector.extract_strided_slice %180 {offsets = [0, 0], sizes = [2, 64], strides = [1, 1]} : vector<2x96xf32> to vector<2x64xf32>
    %185 = vector.extract_strided_slice %183 {offsets = [0, 0], sizes = [2, 64], strides = [1, 1]} : vector<2x96xf32> to vector<2x64xf32>
    %186 = arith.addf %184, %185 : vector<2x64xf32>
    %187 = arith.negf %186 : vector<2x64xf32>
    %188 = math.exp %187 : vector<2x64xf32>
    %cst_60 = arith.constant 1.000000e+00 : f32
    %189 = vector.broadcast %cst_60 : f32 to vector<2x64xf32>
    %190 = arith.addf %189, %188 : vector<2x64xf32>
    %191 = arith.divf %189, %190 : vector<2x64xf32>
    %192 = vector.extract_strided_slice %191 {offsets = [0, 0], sizes = [2, 32], strides = [1, 1]} : vector<2x64xf32> to vector<2x32xf32>
    %193 = vector.extract_strided_slice %191 {offsets = [0, 32], sizes = [2, 32], strides = [1, 1]} : vector<2x64xf32> to vector<2x32xf32>
    %194 = vector.extract_strided_slice %180 {offsets = [0, 64], sizes = [2, 32], strides = [1, 1]} : vector<2x96xf32> to vector<2x32xf32>
    %195 = vector.extract_strided_slice %183 {offsets = [0, 64], sizes = [2, 32], strides = [1, 1]} : vector<2x96xf32> to vector<2x32xf32>
    %196 = arith.mulf %192, %195 : vector<2x32xf32>
    %197 = arith.addf %194, %196 : vector<2x32xf32>
    %198 = math.tanh %197 : vector<2x32xf32>
    %cst_61 = arith.constant 1.000000e+00 : f32
    %199 = vector.broadcast %cst_61 : f32 to vector<2x32xf32>
    %200 = arith.subf %199, %193 : vector<2x32xf32>
    %201 = arith.mulf %200, %198 : vector<2x32xf32>
    %202 = arith.mulf %193, %174 : vector<2x32xf32>
    %203 = arith.addf %201, %202 : vector<2x32xf32>
    %c4 = arith.constant 4 : index
    %c0_62 = arith.constant 0 : index
    %c0_63 = arith.constant 0 : index
    %204 = vector.load %arg7[%c4, %c0_62, %c0_63] : memref<16x32x32xf32, #tpu.memory_space<vmem>>, vector<1x32x32xf32>
    %205 = vector.shape_cast %204 : vector<1x32x32xf32> to vector<32x32xf32>
    %cst_64 = arith.constant dense<0.000000e+00> : vector<2x32xf32>
    %206 = tpu.matmul %203, %205, %cst_64 {dimension_numbers = #tpu.dot_dimension_numbers<[1], [0], [0], [1], [0, 0, 1, 1], [], []>} : vector<2x32xf32>, vector<32x32xf32>, vector<2x32xf32> -> vector<2x32xf32>
    %207 = arith.addf %178, %206 : vector<2x32xf32>
    %208 = vector.extract_strided_slice %58 {offsets = [0, 5, 0], sizes = [2, 1, 96], strides = [1, 1, 1]} : vector<2x16x96xf32> to vector<2x1x96xf32>
    %209 = vector.shape_cast %208 : vector<2x1x96xf32> to vector<2x96xf32>
    %cst_65 = arith.constant dense<0.000000e+00> : vector<2x96xf32>
    %210 = tpu.matmul %203, %59, %cst_65 {dimension_numbers = #tpu.dot_dimension_numbers<[1], [0], [0], [1], [0, 0, 1, 1], [], []>} : vector<2x32xf32>, vector<32x96xf32>, vector<2x96xf32> -> vector<2x96xf32>
    %211 = vector.broadcast %60 : vector<1x96xf32> to vector<2x96xf32>
    %212 = arith.addf %210, %211 : vector<2x96xf32>
    %213 = vector.extract_strided_slice %209 {offsets = [0, 0], sizes = [2, 64], strides = [1, 1]} : vector<2x96xf32> to vector<2x64xf32>
    %214 = vector.extract_strided_slice %212 {offsets = [0, 0], sizes = [2, 64], strides = [1, 1]} : vector<2x96xf32> to vector<2x64xf32>
    %215 = arith.addf %213, %214 : vector<2x64xf32>
    %216 = arith.negf %215 : vector<2x64xf32>
    %217 = math.exp %216 : vector<2x64xf32>
    %cst_66 = arith.constant 1.000000e+00 : f32
    %218 = vector.broadcast %cst_66 : f32 to vector<2x64xf32>
    %219 = arith.addf %218, %217 : vector<2x64xf32>
    %220 = arith.divf %218, %219 : vector<2x64xf32>
    %221 = vector.extract_strided_slice %220 {offsets = [0, 0], sizes = [2, 32], strides = [1, 1]} : vector<2x64xf32> to vector<2x32xf32>
    %222 = vector.extract_strided_slice %220 {offsets = [0, 32], sizes = [2, 32], strides = [1, 1]} : vector<2x64xf32> to vector<2x32xf32>
    %223 = vector.extract_strided_slice %209 {offsets = [0, 64], sizes = [2, 32], strides = [1, 1]} : vector<2x96xf32> to vector<2x32xf32>
    %224 = vector.extract_strided_slice %212 {offsets = [0, 64], sizes = [2, 32], strides = [1, 1]} : vector<2x96xf32> to vector<2x32xf32>
    %225 = arith.mulf %221, %224 : vector<2x32xf32>
    %226 = arith.addf %223, %225 : vector<2x32xf32>
    %227 = math.tanh %226 : vector<2x32xf32>
    %cst_67 = arith.constant 1.000000e+00 : f32
    %228 = vector.broadcast %cst_67 : f32 to vector<2x32xf32>
    %229 = arith.subf %228, %222 : vector<2x32xf32>
    %230 = arith.mulf %229, %227 : vector<2x32xf32>
    %231 = arith.mulf %222, %203 : vector<2x32xf32>
    %232 = arith.addf %230, %231 : vector<2x32xf32>
    %c5 = arith.constant 5 : index
    %c0_68 = arith.constant 0 : index
    %c0_69 = arith.constant 0 : index
    %233 = vector.load %arg7[%c5, %c0_68, %c0_69] : memref<16x32x32xf32, #tpu.memory_space<vmem>>, vector<1x32x32xf32>
    %234 = vector.shape_cast %233 : vector<1x32x32xf32> to vector<32x32xf32>
    %cst_70 = arith.constant dense<0.000000e+00> : vector<2x32xf32>
    %235 = tpu.matmul %232, %234, %cst_70 {dimension_numbers = #tpu.dot_dimension_numbers<[1], [0], [0], [1], [0, 0, 1, 1], [], []>} : vector<2x32xf32>, vector<32x32xf32>, vector<2x32xf32> -> vector<2x32xf32>
    %236 = arith.addf %207, %235 : vector<2x32xf32>
    %237 = vector.extract_strided_slice %58 {offsets = [0, 6, 0], sizes = [2, 1, 96], strides = [1, 1, 1]} : vector<2x16x96xf32> to vector<2x1x96xf32>
    %238 = vector.shape_cast %237 : vector<2x1x96xf32> to vector<2x96xf32>
    %cst_71 = arith.constant dense<0.000000e+00> : vector<2x96xf32>
    %239 = tpu.matmul %232, %59, %cst_71 {dimension_numbers = #tpu.dot_dimension_numbers<[1], [0], [0], [1], [0, 0, 1, 1], [], []>} : vector<2x32xf32>, vector<32x96xf32>, vector<2x96xf32> -> vector<2x96xf32>
    %240 = vector.broadcast %60 : vector<1x96xf32> to vector<2x96xf32>
    %241 = arith.addf %239, %240 : vector<2x96xf32>
    %242 = vector.extract_strided_slice %238 {offsets = [0, 0], sizes = [2, 64], strides = [1, 1]} : vector<2x96xf32> to vector<2x64xf32>
    %243 = vector.extract_strided_slice %241 {offsets = [0, 0], sizes = [2, 64], strides = [1, 1]} : vector<2x96xf32> to vector<2x64xf32>
    %244 = arith.addf %242, %243 : vector<2x64xf32>
    %245 = arith.negf %244 : vector<2x64xf32>
    %246 = math.exp %245 : vector<2x64xf32>
    %cst_72 = arith.constant 1.000000e+00 : f32
    %247 = vector.broadcast %cst_72 : f32 to vector<2x64xf32>
    %248 = arith.addf %247, %246 : vector<2x64xf32>
    %249 = arith.divf %247, %248 : vector<2x64xf32>
    %250 = vector.extract_strided_slice %249 {offsets = [0, 0], sizes = [2, 32], strides = [1, 1]} : vector<2x64xf32> to vector<2x32xf32>
    %251 = vector.extract_strided_slice %249 {offsets = [0, 32], sizes = [2, 32], strides = [1, 1]} : vector<2x64xf32> to vector<2x32xf32>
    %252 = vector.extract_strided_slice %238 {offsets = [0, 64], sizes = [2, 32], strides = [1, 1]} : vector<2x96xf32> to vector<2x32xf32>
    %253 = vector.extract_strided_slice %241 {offsets = [0, 64], sizes = [2, 32], strides = [1, 1]} : vector<2x96xf32> to vector<2x32xf32>
    %254 = arith.mulf %250, %253 : vector<2x32xf32>
    %255 = arith.addf %252, %254 : vector<2x32xf32>
    %256 = math.tanh %255 : vector<2x32xf32>
    %cst_73 = arith.constant 1.000000e+00 : f32
    %257 = vector.broadcast %cst_73 : f32 to vector<2x32xf32>
    %258 = arith.subf %257, %251 : vector<2x32xf32>
    %259 = arith.mulf %258, %256 : vector<2x32xf32>
    %260 = arith.mulf %251, %232 : vector<2x32xf32>
    %261 = arith.addf %259, %260 : vector<2x32xf32>
    %c6 = arith.constant 6 : index
    %c0_74 = arith.constant 0 : index
    %c0_75 = arith.constant 0 : index
    %262 = vector.load %arg7[%c6, %c0_74, %c0_75] : memref<16x32x32xf32, #tpu.memory_space<vmem>>, vector<1x32x32xf32>
    %263 = vector.shape_cast %262 : vector<1x32x32xf32> to vector<32x32xf32>
    %cst_76 = arith.constant dense<0.000000e+00> : vector<2x32xf32>
    %264 = tpu.matmul %261, %263, %cst_76 {dimension_numbers = #tpu.dot_dimension_numbers<[1], [0], [0], [1], [0, 0, 1, 1], [], []>} : vector<2x32xf32>, vector<32x32xf32>, vector<2x32xf32> -> vector<2x32xf32>
    %265 = arith.addf %236, %264 : vector<2x32xf32>
    %266 = vector.extract_strided_slice %58 {offsets = [0, 7, 0], sizes = [2, 1, 96], strides = [1, 1, 1]} : vector<2x16x96xf32> to vector<2x1x96xf32>
    %267 = vector.shape_cast %266 : vector<2x1x96xf32> to vector<2x96xf32>
    %cst_77 = arith.constant dense<0.000000e+00> : vector<2x96xf32>
    %268 = tpu.matmul %261, %59, %cst_77 {dimension_numbers = #tpu.dot_dimension_numbers<[1], [0], [0], [1], [0, 0, 1, 1], [], []>} : vector<2x32xf32>, vector<32x96xf32>, vector<2x96xf32> -> vector<2x96xf32>
    %269 = vector.broadcast %60 : vector<1x96xf32> to vector<2x96xf32>
    %270 = arith.addf %268, %269 : vector<2x96xf32>
    %271 = vector.extract_strided_slice %267 {offsets = [0, 0], sizes = [2, 64], strides = [1, 1]} : vector<2x96xf32> to vector<2x64xf32>
    %272 = vector.extract_strided_slice %270 {offsets = [0, 0], sizes = [2, 64], strides = [1, 1]} : vector<2x96xf32> to vector<2x64xf32>
    %273 = arith.addf %271, %272 : vector<2x64xf32>
    %274 = arith.negf %273 : vector<2x64xf32>
    %275 = math.exp %274 : vector<2x64xf32>
    %cst_78 = arith.constant 1.000000e+00 : f32
    %276 = vector.broadcast %cst_78 : f32 to vector<2x64xf32>
    %277 = arith.addf %276, %275 : vector<2x64xf32>
    %278 = arith.divf %276, %277 : vector<2x64xf32>
    %279 = vector.extract_strided_slice %278 {offsets = [0, 0], sizes = [2, 32], strides = [1, 1]} : vector<2x64xf32> to vector<2x32xf32>
    %280 = vector.extract_strided_slice %278 {offsets = [0, 32], sizes = [2, 32], strides = [1, 1]} : vector<2x64xf32> to vector<2x32xf32>
    %281 = vector.extract_strided_slice %267 {offsets = [0, 64], sizes = [2, 32], strides = [1, 1]} : vector<2x96xf32> to vector<2x32xf32>
    %282 = vector.extract_strided_slice %270 {offsets = [0, 64], sizes = [2, 32], strides = [1, 1]} : vector<2x96xf32> to vector<2x32xf32>
    %283 = arith.mulf %279, %282 : vector<2x32xf32>
    %284 = arith.addf %281, %283 : vector<2x32xf32>
    %285 = math.tanh %284 : vector<2x32xf32>
    %cst_79 = arith.constant 1.000000e+00 : f32
    %286 = vector.broadcast %cst_79 : f32 to vector<2x32xf32>
    %287 = arith.subf %286, %280 : vector<2x32xf32>
    %288 = arith.mulf %287, %285 : vector<2x32xf32>
    %289 = arith.mulf %280, %261 : vector<2x32xf32>
    %290 = arith.addf %288, %289 : vector<2x32xf32>
    %c7 = arith.constant 7 : index
    %c0_80 = arith.constant 0 : index
    %c0_81 = arith.constant 0 : index
    %291 = vector.load %arg7[%c7, %c0_80, %c0_81] : memref<16x32x32xf32, #tpu.memory_space<vmem>>, vector<1x32x32xf32>
    %292 = vector.shape_cast %291 : vector<1x32x32xf32> to vector<32x32xf32>
    %cst_82 = arith.constant dense<0.000000e+00> : vector<2x32xf32>
    %293 = tpu.matmul %290, %292, %cst_82 {dimension_numbers = #tpu.dot_dimension_numbers<[1], [0], [0], [1], [0, 0, 1, 1], [], []>} : vector<2x32xf32>, vector<32x32xf32>, vector<2x32xf32> -> vector<2x32xf32>
    %294 = arith.addf %265, %293 : vector<2x32xf32>
    %295 = vector.extract_strided_slice %58 {offsets = [0, 8, 0], sizes = [2, 1, 96], strides = [1, 1, 1]} : vector<2x16x96xf32> to vector<2x1x96xf32>
    %296 = vector.shape_cast %295 : vector<2x1x96xf32> to vector<2x96xf32>
    %cst_83 = arith.constant dense<0.000000e+00> : vector<2x96xf32>
    %297 = tpu.matmul %290, %59, %cst_83 {dimension_numbers = #tpu.dot_dimension_numbers<[1], [0], [0], [1], [0, 0, 1, 1], [], []>} : vector<2x32xf32>, vector<32x96xf32>, vector<2x96xf32> -> vector<2x96xf32>
    %298 = vector.broadcast %60 : vector<1x96xf32> to vector<2x96xf32>
    %299 = arith.addf %297, %298 : vector<2x96xf32>
    %300 = vector.extract_strided_slice %296 {offsets = [0, 0], sizes = [2, 64], strides = [1, 1]} : vector<2x96xf32> to vector<2x64xf32>
    %301 = vector.extract_strided_slice %299 {offsets = [0, 0], sizes = [2, 64], strides = [1, 1]} : vector<2x96xf32> to vector<2x64xf32>
    %302 = arith.addf %300, %301 : vector<2x64xf32>
    %303 = arith.negf %302 : vector<2x64xf32>
    %304 = math.exp %303 : vector<2x64xf32>
    %cst_84 = arith.constant 1.000000e+00 : f32
    %305 = vector.broadcast %cst_84 : f32 to vector<2x64xf32>
    %306 = arith.addf %305, %304 : vector<2x64xf32>
    %307 = arith.divf %305, %306 : vector<2x64xf32>
    %308 = vector.extract_strided_slice %307 {offsets = [0, 0], sizes = [2, 32], strides = [1, 1]} : vector<2x64xf32> to vector<2x32xf32>
    %309 = vector.extract_strided_slice %307 {offsets = [0, 32], sizes = [2, 32], strides = [1, 1]} : vector<2x64xf32> to vector<2x32xf32>
    %310 = vector.extract_strided_slice %296 {offsets = [0, 64], sizes = [2, 32], strides = [1, 1]} : vector<2x96xf32> to vector<2x32xf32>
    %311 = vector.extract_strided_slice %299 {offsets = [0, 64], sizes = [2, 32], strides = [1, 1]} : vector<2x96xf32> to vector<2x32xf32>
    %312 = arith.mulf %308, %311 : vector<2x32xf32>
    %313 = arith.addf %310, %312 : vector<2x32xf32>
    %314 = math.tanh %313 : vector<2x32xf32>
    %cst_85 = arith.constant 1.000000e+00 : f32
    %315 = vector.broadcast %cst_85 : f32 to vector<2x32xf32>
    %316 = arith.subf %315, %309 : vector<2x32xf32>
    %317 = arith.mulf %316, %314 : vector<2x32xf32>
    %318 = arith.mulf %309, %290 : vector<2x32xf32>
    %319 = arith.addf %317, %318 : vector<2x32xf32>
    %c8 = arith.constant 8 : index
    %c0_86 = arith.constant 0 : index
    %c0_87 = arith.constant 0 : index
    %320 = vector.load %arg7[%c8, %c0_86, %c0_87] : memref<16x32x32xf32, #tpu.memory_space<vmem>>, vector<1x32x32xf32>
    %321 = vector.shape_cast %320 : vector<1x32x32xf32> to vector<32x32xf32>
    %cst_88 = arith.constant dense<0.000000e+00> : vector<2x32xf32>
    %322 = tpu.matmul %319, %321, %cst_88 {dimension_numbers = #tpu.dot_dimension_numbers<[1], [0], [0], [1], [0, 0, 1, 1], [], []>} : vector<2x32xf32>, vector<32x32xf32>, vector<2x32xf32> -> vector<2x32xf32>
    %323 = arith.addf %294, %322 : vector<2x32xf32>
    %324 = vector.extract_strided_slice %58 {offsets = [0, 9, 0], sizes = [2, 1, 96], strides = [1, 1, 1]} : vector<2x16x96xf32> to vector<2x1x96xf32>
    %325 = vector.shape_cast %324 : vector<2x1x96xf32> to vector<2x96xf32>
    %cst_89 = arith.constant dense<0.000000e+00> : vector<2x96xf32>
    %326 = tpu.matmul %319, %59, %cst_89 {dimension_numbers = #tpu.dot_dimension_numbers<[1], [0], [0], [1], [0, 0, 1, 1], [], []>} : vector<2x32xf32>, vector<32x96xf32>, vector<2x96xf32> -> vector<2x96xf32>
    %327 = vector.broadcast %60 : vector<1x96xf32> to vector<2x96xf32>
    %328 = arith.addf %326, %327 : vector<2x96xf32>
    %329 = vector.extract_strided_slice %325 {offsets = [0, 0], sizes = [2, 64], strides = [1, 1]} : vector<2x96xf32> to vector<2x64xf32>
    %330 = vector.extract_strided_slice %328 {offsets = [0, 0], sizes = [2, 64], strides = [1, 1]} : vector<2x96xf32> to vector<2x64xf32>
    %331 = arith.addf %329, %330 : vector<2x64xf32>
    %332 = arith.negf %331 : vector<2x64xf32>
    %333 = math.exp %332 : vector<2x64xf32>
    %cst_90 = arith.constant 1.000000e+00 : f32
    %334 = vector.broadcast %cst_90 : f32 to vector<2x64xf32>
    %335 = arith.addf %334, %333 : vector<2x64xf32>
    %336 = arith.divf %334, %335 : vector<2x64xf32>
    %337 = vector.extract_strided_slice %336 {offsets = [0, 0], sizes = [2, 32], strides = [1, 1]} : vector<2x64xf32> to vector<2x32xf32>
    %338 = vector.extract_strided_slice %336 {offsets = [0, 32], sizes = [2, 32], strides = [1, 1]} : vector<2x64xf32> to vector<2x32xf32>
    %339 = vector.extract_strided_slice %325 {offsets = [0, 64], sizes = [2, 32], strides = [1, 1]} : vector<2x96xf32> to vector<2x32xf32>
    %340 = vector.extract_strided_slice %328 {offsets = [0, 64], sizes = [2, 32], strides = [1, 1]} : vector<2x96xf32> to vector<2x32xf32>
    %341 = arith.mulf %337, %340 : vector<2x32xf32>
    %342 = arith.addf %339, %341 : vector<2x32xf32>
    %343 = math.tanh %342 : vector<2x32xf32>
    %cst_91 = arith.constant 1.000000e+00 : f32
    %344 = vector.broadcast %cst_91 : f32 to vector<2x32xf32>
    %345 = arith.subf %344, %338 : vector<2x32xf32>
    %346 = arith.mulf %345, %343 : vector<2x32xf32>
    %347 = arith.mulf %338, %319 : vector<2x32xf32>
    %348 = arith.addf %346, %347 : vector<2x32xf32>
    %c9 = arith.constant 9 : index
    %c0_92 = arith.constant 0 : index
    %c0_93 = arith.constant 0 : index
    %349 = vector.load %arg7[%c9, %c0_92, %c0_93] : memref<16x32x32xf32, #tpu.memory_space<vmem>>, vector<1x32x32xf32>
    %350 = vector.shape_cast %349 : vector<1x32x32xf32> to vector<32x32xf32>
    %cst_94 = arith.constant dense<0.000000e+00> : vector<2x32xf32>
    %351 = tpu.matmul %348, %350, %cst_94 {dimension_numbers = #tpu.dot_dimension_numbers<[1], [0], [0], [1], [0, 0, 1, 1], [], []>} : vector<2x32xf32>, vector<32x32xf32>, vector<2x32xf32> -> vector<2x32xf32>
    %352 = arith.addf %323, %351 : vector<2x32xf32>
    %353 = vector.extract_strided_slice %58 {offsets = [0, 10, 0], sizes = [2, 1, 96], strides = [1, 1, 1]} : vector<2x16x96xf32> to vector<2x1x96xf32>
    %354 = vector.shape_cast %353 : vector<2x1x96xf32> to vector<2x96xf32>
    %cst_95 = arith.constant dense<0.000000e+00> : vector<2x96xf32>
    %355 = tpu.matmul %348, %59, %cst_95 {dimension_numbers = #tpu.dot_dimension_numbers<[1], [0], [0], [1], [0, 0, 1, 1], [], []>} : vector<2x32xf32>, vector<32x96xf32>, vector<2x96xf32> -> vector<2x96xf32>
    %356 = vector.broadcast %60 : vector<1x96xf32> to vector<2x96xf32>
    %357 = arith.addf %355, %356 : vector<2x96xf32>
    %358 = vector.extract_strided_slice %354 {offsets = [0, 0], sizes = [2, 64], strides = [1, 1]} : vector<2x96xf32> to vector<2x64xf32>
    %359 = vector.extract_strided_slice %357 {offsets = [0, 0], sizes = [2, 64], strides = [1, 1]} : vector<2x96xf32> to vector<2x64xf32>
    %360 = arith.addf %358, %359 : vector<2x64xf32>
    %361 = arith.negf %360 : vector<2x64xf32>
    %362 = math.exp %361 : vector<2x64xf32>
    %cst_96 = arith.constant 1.000000e+00 : f32
    %363 = vector.broadcast %cst_96 : f32 to vector<2x64xf32>
    %364 = arith.addf %363, %362 : vector<2x64xf32>
    %365 = arith.divf %363, %364 : vector<2x64xf32>
    %366 = vector.extract_strided_slice %365 {offsets = [0, 0], sizes = [2, 32], strides = [1, 1]} : vector<2x64xf32> to vector<2x32xf32>
    %367 = vector.extract_strided_slice %365 {offsets = [0, 32], sizes = [2, 32], strides = [1, 1]} : vector<2x64xf32> to vector<2x32xf32>
    %368 = vector.extract_strided_slice %354 {offsets = [0, 64], sizes = [2, 32], strides = [1, 1]} : vector<2x96xf32> to vector<2x32xf32>
    %369 = vector.extract_strided_slice %357 {offsets = [0, 64], sizes = [2, 32], strides = [1, 1]} : vector<2x96xf32> to vector<2x32xf32>
    %370 = arith.mulf %366, %369 : vector<2x32xf32>
    %371 = arith.addf %368, %370 : vector<2x32xf32>
    %372 = math.tanh %371 : vector<2x32xf32>
    %cst_97 = arith.constant 1.000000e+00 : f32
    %373 = vector.broadcast %cst_97 : f32 to vector<2x32xf32>
    %374 = arith.subf %373, %367 : vector<2x32xf32>
    %375 = arith.mulf %374, %372 : vector<2x32xf32>
    %376 = arith.mulf %367, %348 : vector<2x32xf32>
    %377 = arith.addf %375, %376 : vector<2x32xf32>
    %c10 = arith.constant 10 : index
    %c0_98 = arith.constant 0 : index
    %c0_99 = arith.constant 0 : index
    %378 = vector.load %arg7[%c10, %c0_98, %c0_99] : memref<16x32x32xf32, #tpu.memory_space<vmem>>, vector<1x32x32xf32>
    %379 = vector.shape_cast %378 : vector<1x32x32xf32> to vector<32x32xf32>
    %cst_100 = arith.constant dense<0.000000e+00> : vector<2x32xf32>
    %380 = tpu.matmul %377, %379, %cst_100 {dimension_numbers = #tpu.dot_dimension_numbers<[1], [0], [0], [1], [0, 0, 1, 1], [], []>} : vector<2x32xf32>, vector<32x32xf32>, vector<2x32xf32> -> vector<2x32xf32>
    %381 = arith.addf %352, %380 : vector<2x32xf32>
    %382 = vector.extract_strided_slice %58 {offsets = [0, 11, 0], sizes = [2, 1, 96], strides = [1, 1, 1]} : vector<2x16x96xf32> to vector<2x1x96xf32>
    %383 = vector.shape_cast %382 : vector<2x1x96xf32> to vector<2x96xf32>
    %cst_101 = arith.constant dense<0.000000e+00> : vector<2x96xf32>
    %384 = tpu.matmul %377, %59, %cst_101 {dimension_numbers = #tpu.dot_dimension_numbers<[1], [0], [0], [1], [0, 0, 1, 1], [], []>} : vector<2x32xf32>, vector<32x96xf32>, vector<2x96xf32> -> vector<2x96xf32>
    %385 = vector.broadcast %60 : vector<1x96xf32> to vector<2x96xf32>
    %386 = arith.addf %384, %385 : vector<2x96xf32>
    %387 = vector.extract_strided_slice %383 {offsets = [0, 0], sizes = [2, 64], strides = [1, 1]} : vector<2x96xf32> to vector<2x64xf32>
    %388 = vector.extract_strided_slice %386 {offsets = [0, 0], sizes = [2, 64], strides = [1, 1]} : vector<2x96xf32> to vector<2x64xf32>
    %389 = arith.addf %387, %388 : vector<2x64xf32>
    %390 = arith.negf %389 : vector<2x64xf32>
    %391 = math.exp %390 : vector<2x64xf32>
    %cst_102 = arith.constant 1.000000e+00 : f32
    %392 = vector.broadcast %cst_102 : f32 to vector<2x64xf32>
    %393 = arith.addf %392, %391 : vector<2x64xf32>
    %394 = arith.divf %392, %393 : vector<2x64xf32>
    %395 = vector.extract_strided_slice %394 {offsets = [0, 0], sizes = [2, 32], strides = [1, 1]} : vector<2x64xf32> to vector<2x32xf32>
    %396 = vector.extract_strided_slice %394 {offsets = [0, 32], sizes = [2, 32], strides = [1, 1]} : vector<2x64xf32> to vector<2x32xf32>
    %397 = vector.extract_strided_slice %383 {offsets = [0, 64], sizes = [2, 32], strides = [1, 1]} : vector<2x96xf32> to vector<2x32xf32>
    %398 = vector.extract_strided_slice %386 {offsets = [0, 64], sizes = [2, 32], strides = [1, 1]} : vector<2x96xf32> to vector<2x32xf32>
    %399 = arith.mulf %395, %398 : vector<2x32xf32>
    %400 = arith.addf %397, %399 : vector<2x32xf32>
    %401 = math.tanh %400 : vector<2x32xf32>
    %cst_103 = arith.constant 1.000000e+00 : f32
    %402 = vector.broadcast %cst_103 : f32 to vector<2x32xf32>
    %403 = arith.subf %402, %396 : vector<2x32xf32>
    %404 = arith.mulf %403, %401 : vector<2x32xf32>
    %405 = arith.mulf %396, %377 : vector<2x32xf32>
    %406 = arith.addf %404, %405 : vector<2x32xf32>
    %c11 = arith.constant 11 : index
    %c0_104 = arith.constant 0 : index
    %c0_105 = arith.constant 0 : index
    %407 = vector.load %arg7[%c11, %c0_104, %c0_105] : memref<16x32x32xf32, #tpu.memory_space<vmem>>, vector<1x32x32xf32>
    %408 = vector.shape_cast %407 : vector<1x32x32xf32> to vector<32x32xf32>
    %cst_106 = arith.constant dense<0.000000e+00> : vector<2x32xf32>
    %409 = tpu.matmul %406, %408, %cst_106 {dimension_numbers = #tpu.dot_dimension_numbers<[1], [0], [0], [1], [0, 0, 1, 1], [], []>} : vector<2x32xf32>, vector<32x32xf32>, vector<2x32xf32> -> vector<2x32xf32>
    %410 = arith.addf %381, %409 : vector<2x32xf32>
    %411 = vector.extract_strided_slice %58 {offsets = [0, 12, 0], sizes = [2, 1, 96], strides = [1, 1, 1]} : vector<2x16x96xf32> to vector<2x1x96xf32>
    %412 = vector.shape_cast %411 : vector<2x1x96xf32> to vector<2x96xf32>
    %cst_107 = arith.constant dense<0.000000e+00> : vector<2x96xf32>
    %413 = tpu.matmul %406, %59, %cst_107 {dimension_numbers = #tpu.dot_dimension_numbers<[1], [0], [0], [1], [0, 0, 1, 1], [], []>} : vector<2x32xf32>, vector<32x96xf32>, vector<2x96xf32> -> vector<2x96xf32>
    %414 = vector.broadcast %60 : vector<1x96xf32> to vector<2x96xf32>
    %415 = arith.addf %413, %414 : vector<2x96xf32>
    %416 = vector.extract_strided_slice %412 {offsets = [0, 0], sizes = [2, 64], strides = [1, 1]} : vector<2x96xf32> to vector<2x64xf32>
    %417 = vector.extract_strided_slice %415 {offsets = [0, 0], sizes = [2, 64], strides = [1, 1]} : vector<2x96xf32> to vector<2x64xf32>
    %418 = arith.addf %416, %417 : vector<2x64xf32>
    %419 = arith.negf %418 : vector<2x64xf32>
    %420 = math.exp %419 : vector<2x64xf32>
    %cst_108 = arith.constant 1.000000e+00 : f32
    %421 = vector.broadcast %cst_108 : f32 to vector<2x64xf32>
    %422 = arith.addf %421, %420 : vector<2x64xf32>
    %423 = arith.divf %421, %422 : vector<2x64xf32>
    %424 = vector.extract_strided_slice %423 {offsets = [0, 0], sizes = [2, 32], strides = [1, 1]} : vector<2x64xf32> to vector<2x32xf32>
    %425 = vector.extract_strided_slice %423 {offsets = [0, 32], sizes = [2, 32], strides = [1, 1]} : vector<2x64xf32> to vector<2x32xf32>
    %426 = vector.extract_strided_slice %412 {offsets = [0, 64], sizes = [2, 32], strides = [1, 1]} : vector<2x96xf32> to vector<2x32xf32>
    %427 = vector.extract_strided_slice %415 {offsets = [0, 64], sizes = [2, 32], strides = [1, 1]} : vector<2x96xf32> to vector<2x32xf32>
    %428 = arith.mulf %424, %427 : vector<2x32xf32>
    %429 = arith.addf %426, %428 : vector<2x32xf32>
    %430 = math.tanh %429 : vector<2x32xf32>
    %cst_109 = arith.constant 1.000000e+00 : f32
    %431 = vector.broadcast %cst_109 : f32 to vector<2x32xf32>
    %432 = arith.subf %431, %425 : vector<2x32xf32>
    %433 = arith.mulf %432, %430 : vector<2x32xf32>
    %434 = arith.mulf %425, %406 : vector<2x32xf32>
    %435 = arith.addf %433, %434 : vector<2x32xf32>
    %c12 = arith.constant 12 : index
    %c0_110 = arith.constant 0 : index
    %c0_111 = arith.constant 0 : index
    %436 = vector.load %arg7[%c12, %c0_110, %c0_111] : memref<16x32x32xf32, #tpu.memory_space<vmem>>, vector<1x32x32xf32>
    %437 = vector.shape_cast %436 : vector<1x32x32xf32> to vector<32x32xf32>
    %cst_112 = arith.constant dense<0.000000e+00> : vector<2x32xf32>
    %438 = tpu.matmul %435, %437, %cst_112 {dimension_numbers = #tpu.dot_dimension_numbers<[1], [0], [0], [1], [0, 0, 1, 1], [], []>} : vector<2x32xf32>, vector<32x32xf32>, vector<2x32xf32> -> vector<2x32xf32>
    %439 = arith.addf %410, %438 : vector<2x32xf32>
    %440 = vector.extract_strided_slice %58 {offsets = [0, 13, 0], sizes = [2, 1, 96], strides = [1, 1, 1]} : vector<2x16x96xf32> to vector<2x1x96xf32>
    %441 = vector.shape_cast %440 : vector<2x1x96xf32> to vector<2x96xf32>
    %cst_113 = arith.constant dense<0.000000e+00> : vector<2x96xf32>
    %442 = tpu.matmul %435, %59, %cst_113 {dimension_numbers = #tpu.dot_dimension_numbers<[1], [0], [0], [1], [0, 0, 1, 1], [], []>} : vector<2x32xf32>, vector<32x96xf32>, vector<2x96xf32> -> vector<2x96xf32>
    %443 = vector.broadcast %60 : vector<1x96xf32> to vector<2x96xf32>
    %444 = arith.addf %442, %443 : vector<2x96xf32>
    %445 = vector.extract_strided_slice %441 {offsets = [0, 0], sizes = [2, 64], strides = [1, 1]} : vector<2x96xf32> to vector<2x64xf32>
    %446 = vector.extract_strided_slice %444 {offsets = [0, 0], sizes = [2, 64], strides = [1, 1]} : vector<2x96xf32> to vector<2x64xf32>
    %447 = arith.addf %445, %446 : vector<2x64xf32>
    %448 = arith.negf %447 : vector<2x64xf32>
    %449 = math.exp %448 : vector<2x64xf32>
    %cst_114 = arith.constant 1.000000e+00 : f32
    %450 = vector.broadcast %cst_114 : f32 to vector<2x64xf32>
    %451 = arith.addf %450, %449 : vector<2x64xf32>
    %452 = arith.divf %450, %451 : vector<2x64xf32>
    %453 = vector.extract_strided_slice %452 {offsets = [0, 0], sizes = [2, 32], strides = [1, 1]} : vector<2x64xf32> to vector<2x32xf32>
    %454 = vector.extract_strided_slice %452 {offsets = [0, 32], sizes = [2, 32], strides = [1, 1]} : vector<2x64xf32> to vector<2x32xf32>
    %455 = vector.extract_strided_slice %441 {offsets = [0, 64], sizes = [2, 32], strides = [1, 1]} : vector<2x96xf32> to vector<2x32xf32>
    %456 = vector.extract_strided_slice %444 {offsets = [0, 64], sizes = [2, 32], strides = [1, 1]} : vector<2x96xf32> to vector<2x32xf32>
    %457 = arith.mulf %453, %456 : vector<2x32xf32>
    %458 = arith.addf %455, %457 : vector<2x32xf32>
    %459 = math.tanh %458 : vector<2x32xf32>
    %cst_115 = arith.constant 1.000000e+00 : f32
    %460 = vector.broadcast %cst_115 : f32 to vector<2x32xf32>
    %461 = arith.subf %460, %454 : vector<2x32xf32>
    %462 = arith.mulf %461, %459 : vector<2x32xf32>
    %463 = arith.mulf %454, %435 : vector<2x32xf32>
    %464 = arith.addf %462, %463 : vector<2x32xf32>
    %c13 = arith.constant 13 : index
    %c0_116 = arith.constant 0 : index
    %c0_117 = arith.constant 0 : index
    %465 = vector.load %arg7[%c13, %c0_116, %c0_117] : memref<16x32x32xf32, #tpu.memory_space<vmem>>, vector<1x32x32xf32>
    %466 = vector.shape_cast %465 : vector<1x32x32xf32> to vector<32x32xf32>
    %cst_118 = arith.constant dense<0.000000e+00> : vector<2x32xf32>
    %467 = tpu.matmul %464, %466, %cst_118 {dimension_numbers = #tpu.dot_dimension_numbers<[1], [0], [0], [1], [0, 0, 1, 1], [], []>} : vector<2x32xf32>, vector<32x32xf32>, vector<2x32xf32> -> vector<2x32xf32>
    %468 = arith.addf %439, %467 : vector<2x32xf32>
    %469 = vector.extract_strided_slice %58 {offsets = [0, 14, 0], sizes = [2, 1, 96], strides = [1, 1, 1]} : vector<2x16x96xf32> to vector<2x1x96xf32>
    %470 = vector.shape_cast %469 : vector<2x1x96xf32> to vector<2x96xf32>
    %cst_119 = arith.constant dense<0.000000e+00> : vector<2x96xf32>
    %471 = tpu.matmul %464, %59, %cst_119 {dimension_numbers = #tpu.dot_dimension_numbers<[1], [0], [0], [1], [0, 0, 1, 1], [], []>} : vector<2x32xf32>, vector<32x96xf32>, vector<2x96xf32> -> vector<2x96xf32>
    %472 = vector.broadcast %60 : vector<1x96xf32> to vector<2x96xf32>
    %473 = arith.addf %471, %472 : vector<2x96xf32>
    %474 = vector.extract_strided_slice %470 {offsets = [0, 0], sizes = [2, 64], strides = [1, 1]} : vector<2x96xf32> to vector<2x64xf32>
    %475 = vector.extract_strided_slice %473 {offsets = [0, 0], sizes = [2, 64], strides = [1, 1]} : vector<2x96xf32> to vector<2x64xf32>
    %476 = arith.addf %474, %475 : vector<2x64xf32>
    %477 = arith.negf %476 : vector<2x64xf32>
    %478 = math.exp %477 : vector<2x64xf32>
    %cst_120 = arith.constant 1.000000e+00 : f32
    %479 = vector.broadcast %cst_120 : f32 to vector<2x64xf32>
    %480 = arith.addf %479, %478 : vector<2x64xf32>
    %481 = arith.divf %479, %480 : vector<2x64xf32>
    %482 = vector.extract_strided_slice %481 {offsets = [0, 0], sizes = [2, 32], strides = [1, 1]} : vector<2x64xf32> to vector<2x32xf32>
    %483 = vector.extract_strided_slice %481 {offsets = [0, 32], sizes = [2, 32], strides = [1, 1]} : vector<2x64xf32> to vector<2x32xf32>
    %484 = vector.extract_strided_slice %470 {offsets = [0, 64], sizes = [2, 32], strides = [1, 1]} : vector<2x96xf32> to vector<2x32xf32>
    %485 = vector.extract_strided_slice %473 {offsets = [0, 64], sizes = [2, 32], strides = [1, 1]} : vector<2x96xf32> to vector<2x32xf32>
    %486 = arith.mulf %482, %485 : vector<2x32xf32>
    %487 = arith.addf %484, %486 : vector<2x32xf32>
    %488 = math.tanh %487 : vector<2x32xf32>
    %cst_121 = arith.constant 1.000000e+00 : f32
    %489 = vector.broadcast %cst_121 : f32 to vector<2x32xf32>
    %490 = arith.subf %489, %483 : vector<2x32xf32>
    %491 = arith.mulf %490, %488 : vector<2x32xf32>
    %492 = arith.mulf %483, %464 : vector<2x32xf32>
    %493 = arith.addf %491, %492 : vector<2x32xf32>
    %c14 = arith.constant 14 : index
    %c0_122 = arith.constant 0 : index
    %c0_123 = arith.constant 0 : index
    %494 = vector.load %arg7[%c14, %c0_122, %c0_123] : memref<16x32x32xf32, #tpu.memory_space<vmem>>, vector<1x32x32xf32>
    %495 = vector.shape_cast %494 : vector<1x32x32xf32> to vector<32x32xf32>
    %cst_124 = arith.constant dense<0.000000e+00> : vector<2x32xf32>
    %496 = tpu.matmul %493, %495, %cst_124 {dimension_numbers = #tpu.dot_dimension_numbers<[1], [0], [0], [1], [0, 0, 1, 1], [], []>} : vector<2x32xf32>, vector<32x32xf32>, vector<2x32xf32> -> vector<2x32xf32>
    %497 = arith.addf %468, %496 : vector<2x32xf32>
    %498 = vector.extract_strided_slice %58 {offsets = [0, 15, 0], sizes = [2, 1, 96], strides = [1, 1, 1]} : vector<2x16x96xf32> to vector<2x1x96xf32>
    %499 = vector.shape_cast %498 : vector<2x1x96xf32> to vector<2x96xf32>
    %cst_125 = arith.constant dense<0.000000e+00> : vector<2x96xf32>
    %500 = tpu.matmul %493, %59, %cst_125 {dimension_numbers = #tpu.dot_dimension_numbers<[1], [0], [0], [1], [0, 0, 1, 1], [], []>} : vector<2x32xf32>, vector<32x96xf32>, vector<2x96xf32> -> vector<2x96xf32>
    %501 = vector.broadcast %60 : vector<1x96xf32> to vector<2x96xf32>
    %502 = arith.addf %500, %501 : vector<2x96xf32>
    %503 = vector.extract_strided_slice %499 {offsets = [0, 0], sizes = [2, 64], strides = [1, 1]} : vector<2x96xf32> to vector<2x64xf32>
    %504 = vector.extract_strided_slice %502 {offsets = [0, 0], sizes = [2, 64], strides = [1, 1]} : vector<2x96xf32> to vector<2x64xf32>
    %505 = arith.addf %503, %504 : vector<2x64xf32>
    %506 = arith.negf %505 : vector<2x64xf32>
    %507 = math.exp %506 : vector<2x64xf32>
    %cst_126 = arith.constant 1.000000e+00 : f32
    %508 = vector.broadcast %cst_126 : f32 to vector<2x64xf32>
    %509 = arith.addf %508, %507 : vector<2x64xf32>
    %510 = arith.divf %508, %509 : vector<2x64xf32>
    %511 = vector.extract_strided_slice %510 {offsets = [0, 0], sizes = [2, 32], strides = [1, 1]} : vector<2x64xf32> to vector<2x32xf32>
    %512 = vector.extract_strided_slice %510 {offsets = [0, 32], sizes = [2, 32], strides = [1, 1]} : vector<2x64xf32> to vector<2x32xf32>
    %513 = vector.extract_strided_slice %499 {offsets = [0, 64], sizes = [2, 32], strides = [1, 1]} : vector<2x96xf32> to vector<2x32xf32>
    %514 = vector.extract_strided_slice %502 {offsets = [0, 64], sizes = [2, 32], strides = [1, 1]} : vector<2x96xf32> to vector<2x32xf32>
    %515 = arith.mulf %511, %514 : vector<2x32xf32>
    %516 = arith.addf %513, %515 : vector<2x32xf32>
    %517 = math.tanh %516 : vector<2x32xf32>
    %cst_127 = arith.constant 1.000000e+00 : f32
    %518 = vector.broadcast %cst_127 : f32 to vector<2x32xf32>
    %519 = arith.subf %518, %512 : vector<2x32xf32>
    %520 = arith.mulf %519, %517 : vector<2x32xf32>
    %521 = arith.mulf %512, %493 : vector<2x32xf32>
    %522 = arith.addf %520, %521 : vector<2x32xf32>
    %c15 = arith.constant 15 : index
    %c0_128 = arith.constant 0 : index
    %c0_129 = arith.constant 0 : index
    %523 = vector.load %arg7[%c15, %c0_128, %c0_129] : memref<16x32x32xf32, #tpu.memory_space<vmem>>, vector<1x32x32xf32>
    %524 = vector.shape_cast %523 : vector<1x32x32xf32> to vector<32x32xf32>
    %cst_130 = arith.constant dense<0.000000e+00> : vector<2x32xf32>
    %525 = tpu.matmul %522, %524, %cst_130 {dimension_numbers = #tpu.dot_dimension_numbers<[1], [0], [0], [1], [0, 0, 1, 1], [], []>} : vector<2x32xf32>, vector<32x32xf32>, vector<2x32xf32> -> vector<2x32xf32>
    %526 = arith.addf %497, %525 : vector<2x32xf32>
    %c0_131 = arith.constant 0 : index
    %c0_132 = arith.constant 0 : index
    %527 = vector.load %arg8[%c0_131, %c0_132] : memref<1x32xf32, #tpu.memory_space<vmem>>, vector<1x32xf32>
    %528 = vector.broadcast %527 : vector<1x32xf32> to vector<2x32xf32>
    %529 = arith.addf %526, %528 : vector<2x32xf32>
    %cst_133 = arith.constant 0.000000e+00 : f32
    %530 = vector.broadcast %cst_133 : f32 to vector<2x32xf32>
    %531 = arith.cmpf oge, %529, %530 : vector<2x32xf32>
    %cst_134 = arith.constant 0.00999999977 : f32
    %532 = vector.broadcast %cst_134 : f32 to vector<2x32xf32>
    %533 = arith.mulf %532, %529 : vector<2x32xf32>
    %534 = arith.select %531, %529, %533 : vector<2x32xi1>, vector<2x32xf32>
    %c0_135 = arith.constant 0 : index
    %c0_136 = arith.constant 0 : index
    %535 = vector.load %arg9[%c0_135, %c0_136] : memref<32x3xf32, #tpu.memory_space<vmem>>, vector<32x3xf32>
    %cst_137 = arith.constant dense<0.000000e+00> : vector<2x3xf32>
    %536 = tpu.matmul %534, %535, %cst_137 {dimension_numbers = #tpu.dot_dimension_numbers<[1], [0], [0], [1], [0, 0, 1, 1], [], []>} : vector<2x32xf32>, vector<32x3xf32>, vector<2x3xf32> -> vector<2x3xf32>
    %c0_138 = arith.constant 0 : index
    %c0_139 = arith.constant 0 : index
    %537 = vector.load %arg10[%c0_138, %c0_139] : memref<1x3xf32, #tpu.memory_space<vmem>>, vector<1x3xf32>
    %538 = vector.broadcast %537 : vector<1x3xf32> to vector<2x3xf32>
    %539 = arith.addf %536, %538 : vector<2x3xf32>
    %540 = vector.shape_cast %539 : vector<2x3xf32> to vector<1x2x3xf32>
    %c0_140 = arith.constant 0 : index
    %c0_141 = arith.constant 0 : index
    %c0_142 = arith.constant 0 : index
    %541 = vector.load %arg11[%c0_140, %c0_141, %c0_142] : memref<1x2x3xf32, #tpu.memory_space<vmem>>, vector<1x2x3xf32>
    tpu.vector_store %arg11[%c0_140, %c0_141, %c0_142], %540 {strides = array<i32>} : memref<1x2x3xf32, #tpu.memory_space<vmem>>, vector<1x2x3xf32>,
    return
  }
  func.func @transform_0(%arg0: i32) -> (i32, i32, i32) {
    %c0_i32 = arith.constant 0 : i32
    %c0_i32_0 = arith.constant 0 : i32
    %c0_i32_1 = arith.constant 0 : i32
    return %arg0, %c0_i32, %c0_i32_0 : i32, i32, i32
  }
  func.func @transform_1(%arg0: i32) -> (i32, i32, i32) {
    %c0_i32 = arith.constant 0 : i32
    %c0_i32_0 = arith.constant 0 : i32
    %c0_i32_1 = arith.constant 0 : i32
    return %arg0, %c0_i32, %c0_i32_0 : i32, i32, i32
  }
  func.func @transform_2(%arg0: i32) -> (i32, i32, i32) {
    %c0_i32 = arith.constant 0 : i32
    %c0_i32_0 = arith.constant 0 : i32
    %c0_i32_1 = arith.constant 0 : i32
    %c0_i32_2 = arith.constant 0 : i32
    return %c0_i32, %c0_i32_0, %c0_i32_1 : i32, i32, i32
  }
  func.func @transform_3(%arg0: i32) -> (i32, i32) {
    %c0_i32 = arith.constant 0 : i32
    %c0_i32_0 = arith.constant 0 : i32
    %c0_i32_1 = arith.constant 0 : i32
    return %c0_i32, %c0_i32_0 : i32, i32
  }
  func.func @transform_4(%arg0: i32) -> (i32, i32) {
    %c0_i32 = arith.constant 0 : i32
    %c0_i32_0 = arith.constant 0 : i32
    %c0_i32_1 = arith.constant 0 : i32
    return %c0_i32, %c0_i32_0 : i32, i32
  }
  func.func @transform_5(%arg0: i32) -> (i32, i32) {
    %c0_i32 = arith.constant 0 : i32
    %c0_i32_0 = arith.constant 0 : i32
    %c0_i32_1 = arith.constant 0 : i32
    return %c0_i32, %c0_i32_0 : i32, i32
  }
  func.func @transform_6(%arg0: i32) -> (i32, i32, i32) {
    %c0_i32 = arith.constant 0 : i32
    %c0_i32_0 = arith.constant 0 : i32
    %c0_i32_1 = arith.constant 0 : i32
    %c0_i32_2 = arith.constant 0 : i32
    return %c0_i32, %c0_i32_0, %c0_i32_1 : i32, i32, i32
  }
  func.func @transform_7(%arg0: i32) -> (i32, i32) {
    %c0_i32 = arith.constant 0 : i32
    %c0_i32_0 = arith.constant 0 : i32
    %c0_i32_1 = arith.constant 0 : i32
    return %c0_i32, %c0_i32_0 : i32, i32
  }
  func.func @transform_8(%arg0: i32) -> (i32, i32) {
    %c0_i32 = arith.constant 0 : i32
    %c0_i32_0 = arith.constant 0 : i32
    %c0_i32_1 = arith.constant 0 : i32
    return %c0_i32, %c0_i32_0 : i32, i32
  }
  func.func @transform_9(%arg0: i32) -> (i32, i32) {
    %c0_i32 = arith.constant 0 : i32
    %c0_i32_0 = arith.constant 0 : i32
    %c0_i32_1 = arith.constant 0 : i32
    return %c0_i32, %c0_i32_0 : i32, i32
  }
  func.func @transform_10(%arg0: i32) -> (i32, i32, i32) {
    %c0_i32 = arith.constant 0 : i32
    %c0_i32_0 = arith.constant 0 : i32
    %c0_i32_1 = arith.constant 0 : i32
    return %arg0, %c0_i32, %c0_i32_0 : i32, i32, i32
  }
}

</mosaic_0001>

<bundles_post_ra>
// kernel: het_model_forward.1
= control target key start
LH: loop header
LB: loop body
LE: loop exit
PB: predicated region body
PF: predicated region fallthrough
CT: control target
= control target key end

     0   :  { %v36_v0 = vlaneseq  ;;  %v5409_v3 = vmov 0.0   ;;  %s6598_s0 = inlined_call_operand.vmem [shape: f32[2,64,8], index: 0, kind: input, shape index: {}]   ;;  %s6599_s1 = inlined_call_operand.vmem [shape: f32[2,8,8], index: 1, kind: input, shape index: {}]   ;;  %s6600_s2 = inlined_call_operand.vmem [shape: f32[4,8,96], index: 2, kind: input, shape index: {}]   ;;  %s6601_s3 = inlined_call_operand.vmem [shape: f32[1,96], index: 3, kind: input, shape index: {}]   ;;  %s6602_s4 = inlined_call_operand.vmem [shape: f32[32,96], index: 4, kind: input, shape index: {}]   ;;  %s6603_s5 = inlined_call_operand.vmem [shape: f32[1,96], index: 5, kind: input, shape index: {}]   ;;  %s6604_s6 = inlined_call_operand.vmem [shape: f32[16,32,32], index: 6, kind: input, shape index: {}]   ;;  %s6605_s7 = inlined_call_operand.vmem [shape: f32[1,32], index: 7, kind: input, shape index: {}]   ;;  %s6606_s8 = inlined_call_operand.vmem [shape: f32[32,3], index: 8, kind: input, shape index: {}]   ;;  %s6607_s9 = inlined_call_operand.vmem [shape: f32[1,3], index: 9, kind: input, shape index: {}]   ;;  %s6608_s10 = inlined_call_operand.hbm [shape: f32[1,2,3], index: 10, kind: output, shape index: {}]  }
   0x1   :  { %v43_v5 = vld [vmem:[%s6599_s1] sm:$0xff]  ;;  %v44_v6 = vld [vmem:[%s6599_s1 + $0x8] sm:$0xff] }
   0x2   :  { %v37_v1 = vshrl.u32 %v36_v0, 7  ;;  %v39_v2 = vand.u32 127, %v36_v0 }
   0x4   :  { %vm40_vm0 = vcmp.eq.s32.totalorder %v37_v1, %v39_v2 }
   0x5   :  { %v4384_v4 = vsel %vm40_vm0, 1.0, %v5409_v3 }
   0x6   :  { %v45_v7 = vsub.f32 1.0, %v4384_v4 }
   0x7   :  { %15 = vsyncpa [#allocation3], 0  ;;  %vm50_vm1 = vcmask 64512   ;;  %v67_v26 = vld [vmem:[%s6598_s0] sm:$0xff]  ;;  %v73_v27 = vld [vmem:[%s6598_s0 + $0x30] sm:$0xff]  ;;  %s5412_s24 = smov 96  }
   0x8   :  { %v46_v8 = vmul.f32 %v45_v7, %v43_v5  ;;  %v47_v9 = vmul.f32 %v45_v7, %v44_v6  ;;  %v68_v28 = vld [vmem:[%s6598_s0 + $0x8] sm:$0xff]  ;;  %v74_v29 = vld [vmem:[%s6598_s0 + $0x38] sm:$0xff]  ;;  %v69_v30 = vld [vmem:[%s6598_s0 + $0x10] sm:$0xff] }
   0x9   :  { %v75_v31 = vld [vmem:[%s6598_s0 + $0x40] sm:$0xff]  ;;  %v70_v38 = vld [vmem:[%s6598_s0 + $0x18] sm:$0xff]  ;;  %v76_v39 = vld [vmem:[%s6598_s0 + $0x48] sm:$0xff] }
   0xa   :  { %v48_v10 = vadd.f32 %v4384_v4, %v46_v8  ;;  %v49_v11 = vadd.f32 %v4384_v4, %v47_v9  ;;  %v71_v42 = vld [vmem:[%s6598_s0 + $0x20] sm:$0xff]  ;;  %v77_v43 = vld [vmem:[%s6598_s0 + $0x50] sm:$0xff]  ;;  %v72_v48 = vld [vmem:[%s6598_s0 + $0x28] sm:$0xff] }
   0xb   :  { %v78_v49 = vld [vmem:[%s6598_s0 + $0x58] sm:$0xff]  ;;  %v79_v50 = vld [vmem:[%s6598_s0 + $0x60] sm:$0xff]  ;;  %v80_v54 = vld [vmem:[%s6598_s0 + $0x68] sm:$0xff] }
   0xc   :  { %v51_v12 = vsel %vm50_vm1, %v48_v10, 0.0  ;;  %5174 = vmatprep.subr.mxu1 %v48_v10  ;;  %4751 = vmatprep.subr.mxu0 %v48_v10  ;;  %v58_v13 = vsel %vm50_vm1, %v49_v11, 0.0  ;;  %v81_v55 = vld [vmem:[%s6598_s0 + $0x70] sm:$0xff]  ;;  %v82_v58 = vld [vmem:[%s6598_s0 + $0x78] sm:$0xff]  ;;  %v4401_v60 = vld [vmem:[%s6600_s2 + $0x8] sm:$0xff] }
   0xd   :  { %v52_v14 = vrot.slane %v51_v12, 4  ;;  %5175 = vmatpush3.msra.mxu1 %v48_v10  ;;  %4752 = vmatpush3.msra.mxu0 %v48_v10  ;;  %v59_v15 = vrot.slane %v58_v13, 4  ;;  %v437_v61 = vld [vmem:[%s6600_s2] sm:$0xff]  ;;  %v5571_v62 = vld [vmem:[%s6600_s2 + $0x10] sm:$0xff]  ;;  %v5576_v63 = vld [vmem:[%s6600_s2 + $0x18] sm:$0xff] }
   0xe   :  { %4765 = vmatprep.subr.mxu1 %v49_v11  ;;  %4779 = vmatprep.subr.mxu0 %v4401_v60 }
   0xf   :  { %v53_v16 = vadd.f32 %v52_v14, %v51_v12  ;;  %v60_v17 = vadd.f32 %v59_v15, %v58_v13 }
  0x11   :  { %v54_v18 = vrot.slane %v53_v16, 2  ;;  %v61_v19 = vrot.slane %v60_v17, 2 }
  0x13   :  { %v55_v20 = vadd.f32 %v54_v18, %v53_v16  ;;  %v62_v21 = vadd.f32 %v61_v19, %v60_v17 }
  0x15   :  { %v56_v22 = vrot.slane %v55_v20, 1  ;;  %v63_v23 = vrot.slane %v62_v21, 1 }
  0x17   :  { %v57_v24 = vadd.f32 %v56_v22, %v55_v20  ;;  %v64_v25 = vadd.f32 %v63_v23, %v62_v21 }
  0x19   :  { %5181 = vrsqrt.f32 %v57_v24 }
  0x1a   :  { %5183 = vrsqrt.f32 %v64_v25 }
  0x26   :  { %v5496_v32 = vpop.eup %5181 }
  0x27   :  { %v5498_v33 = vpop.eup %5183  ;;  %v83_v34 = vmul.f32 %v5496_v32, %v67_v26  ;;  %v89_v35 = vmul.f32 %v5496_v32, %v73_v27  ;;  %v84_v36 = vmul.f32 %v5496_v32, %v68_v28  ;;  %v90_v37 = vmul.f32 %v5496_v32, %v74_v29 }
  0x28   :  { %v85_v40 = vmul.f32 %v5496_v32, %v69_v30  ;;  %v91_v41 = vmul.f32 %v5498_v33, %v75_v31  ;;  %v86_v44 = vmul.f32 %v5496_v32, %v70_v38  ;;  %v92_v45 = vmul.f32 %v5498_v33, %v76_v39 }
  0x29   :  { %4753 = vmatprep.mubr.msk.f32.mxu0 %vm50_vm1, %v83_v34  ;;  %4762 = vmatprep.mubr.msk.f32.mxu1 %vm50_vm1, %v89_v35  ;;  %v87_v46 = vmul.f32 %v5496_v32, %v71_v42  ;;  %v93_v47 = vmul.f32 %v5498_v33, %v77_v43  ;;  %v88_v51 = vmul.f32 %v5496_v32, %v72_v48 }
  0x2a   :  { %4754 = vmatmul.mubr.msk.f32.vlgmr.msra.gmra.mxu0 %vm50_vm1, %v84_v36  ;;  %4763 = vmatmul.mubr.msk.f32.vlgmr.msra.gmra.mxu1 %vm50_vm1, %v90_v37  ;;  %v94_v52 = vmul.f32 %v5498_v33, %v78_v49  ;;  %v95_v53 = vmul.f32 %v5498_v33, %v79_v50  ;;  %v96_v56 = vmul.f32 %v5498_v33, %v80_v54 }
  0x2b   :  { %4766 = vmatpush3.msra.mxu1 %v49_v11  ;;  %4756 = vmatprep.mubr.msk.f32.mxu0 %vm50_vm1, %v85_v40  ;;  %v97_v57 = vmul.f32 %v5498_v33, %v81_v55  ;;  %v98_v59 = vmul.f32 %v5498_v33, %v82_v58 }
  0x2c   :  { %4767 = vmatprep.mubr.msk.f32.mxu1 %vm50_vm1, %v91_v41  ;;  %4780 = vmatpush3.msra.mxu0 %v4401_v60 }
  0x2d   :  { %4787 = vmatprep.subr.mxu1 %v437_v61  ;;  %4795 = vmatprep.subr.mxu0 %v5571_v62 }
  0x2e   :  { %4757 = vmatmul.mubr.msk.f32.gmra.mxu0 %vm50_vm1, %v86_v44  ;;  %4768 = vmatmul.mubr.msk.f32.vlgmr.msra.gmra.mxu1 %vm50_vm1, %v92_v45 }
  0x2f   :  { %4759 = vmatprep.mubr.msk.f32.mxu0 %vm50_vm1, %v87_v46  ;;  %4770 = vmatprep.mubr.msk.f32.mxu1 %vm50_vm1, %v93_v47 }
  0x30   :  { %4788 = vmatpush3.msra.mxu1 %v437_v61 }
  0x31   :  { %4803 = vmatprep.subr.mxu1 %v5576_v63 }
  0x32   :  { %4760 = vmatmul.mubr.msk.f32.gmra.mxu0 %vm50_vm1, %v88_v51  ;;  %4771 = vmatmul.mubr.msk.f32.gmra.mxu1 %vm50_vm1, %v94_v52 }
  0x33   :  { %4773 = vmatprep.mubr.msk.f32.mxu1 %vm50_vm1, %v95_v53 }
  0x36   :  { %4774 = vmatmul.mubr.msk.f32.gmra.mxu1 %vm50_vm1, %v96_v56 }
  0x37   :  { %4776 = vmatprep.mubr.msk.f32.mxu1 %vm50_vm1, %v97_v57 }
  0x3a   :  { %4777 = vmatmul.mubr.msk.f32.gmra.mxu1 %vm50_vm1, %v98_v59 }
  0xea   :  { %v4755_v0 = vpop.f32.mrf.mxu0  ;;  %v4764_v1 = vpop.f32.mrf.mxu1 }
  0xeb   :  { %v358_v2 = vmul.f32 10.0, %v4755_v0  ;;  %v364_v4 = vmul.f32 10.0, %v4764_v1 }
  0xec   :  { %v189_v5 = vpop.f32.mrf.mxu0  ;;  %v219_v6 = vpop.f32.mrf.mxu1 }
  0xed   :  { %v374_v7 = vmul.f32 %v5496_v32, %v358_v2  ;;  %v357_v8 = vmul.f32 10.0, %v189_v5  ;;  %v363_v9 = vmul.f32 10.0, %v219_v6  ;;  %v5582_v12 = vmul.f32 %v5496_v32, %v364_v4 }
  0xee   :  { %v4758_v10 = vpop.f32.mrf.mxu0  ;;  %v4769_v11 = vpop.f32.mrf.mxu1 }
  0xef   :  { %v373_v13 = vmul.f32 %v5496_v32, %v357_v8  ;;  %v360_v14 = vmul.f32 10.0, %v4758_v10  ;;  %v366_v15 = vmul.f32 10.0, %v4769_v11  ;;  %v406_v18 = vmul.f32 0.01, %v374_v7 }
  0xf0   :  { %v199_v16 = vpop.f32.mrf.mxu0  ;;  %v318_v17 = vpop.f32.mrf.mxu1  ;;  %v379_v22 = vmul.f32 %v5496_v32, %v363_v9  ;;  %vm390_vm2 = vcmp.ge.f32.partialorder %v374_v7, 0.0  ;;  %vm396_vm3 = vcmp.ge.f32.partialorder %v5582_v12, 0.0  ;;  %v412_v31 = vmul.f32 0.01, %v5582_v12 }
  0xf1   :  { %v359_v19 = vmul.f32 10.0, %v199_v16  ;;  %v365_v20 = vmul.f32 10.0, %v318_v17  ;;  %v405_v21 = vmul.f32 0.01, %v373_v13  ;;  %v376_v23 = vmul.f32 %v5496_v32, %v360_v14 }
  0xf2   :  { %v382_v24 = vmul.f32 %v5498_v33, %v366_v15  ;;  %v4761_v25 = vpop.f32.mrf.mxu0  ;;  %v4772_v26 = vpop.f32.mrf.mxu1  ;;  %vm389_vm4 = vcmp.ge.f32.partialorder %v373_v13, 0.0  ;;  %v422_v44 = vsel %vm390_vm2, %v374_v7, %v406_v18  ;;  %v411_v45 = vmul.f32 0.01, %v379_v22 }
  0xf3   :  { %v375_v27 = vmul.f32 %v5496_v32, %v359_v19  ;;  %v381_v28 = vmul.f32 %v5498_v33, %v365_v20  ;;  %v362_v29 = vmul.f32 10.0, %v4761_v25  ;;  %v368_v30 = vmul.f32 10.0, %v4772_v26  ;;  %v5639_v19 = vld [vmem:[%s6602_s4 + $0x8] sm:$0xff] }
  0xf4   :  { %v209_v34 = vpop.f32.mrf.mxu0  ;;  %v328_v35 = vpop.f32.mrf.mxu1  ;;  %vm392_vm5 = vcmp.ge.f32.partialorder %v376_v23, 0.0  ;;  %v408_v36 = vmul.f32 0.01, %v376_v23  ;;  %v421_v42 = vsel %vm389_vm4, %v373_v13, %v405_v21  ;;  %v414_v46 = vmul.f32 0.01, %v382_v24  ;;  %v5649_v21 = vld [vmem:[%s6602_s4] sm:$0xff] }
  0xf5   :  { %v407_v37 = vmul.f32 0.01, %v375_v27  ;;  %v384_v38 = vmul.f32 %v5498_v33, %v368_v30  ;;  %v413_v39 = vmul.f32 0.01, %v381_v28  ;;  %v361_v40 = vmul.f32 10.0, %v209_v34  ;;  %4789 = vmatprep.mubr.msk.f32.mxu1 %vm50_vm1, %v421_v42 }
  0xf6   :  { %v367_v41 = vmul.f32 10.0, %v328_v35  ;;  %v4775_v43 = vpop.f32.mrf.mxu1  ;;  %v378_v47 = vmul.f32 %v5496_v32, %v362_v29  ;;  %4790 = vmatmul.mubr.msk.f32.vlgmr.msra.gmra.mxu1 %vm50_vm1, %v422_v44  ;;  %vm391_vm6 = vcmp.ge.f32.partialorder %v375_v27, 0.0  ;;  %vm397_vm7 = vcmp.ge.f32.partialorder %v381_v28, 0.0 }
  0xf7   :  { %v377_v48 = vmul.f32 %v5496_v32, %v361_v40  ;;  %v424_v51 = vsel %vm392_vm5, %v376_v23, %v408_v36  ;;  %v416_v52 = vmul.f32 0.01, %v384_v38  ;;  %v423_v54 = vsel %vm391_vm6, %v375_v27, %v407_v37  ;;  %4804 = vmatpush3.msra.mxu1 %v5576_v63 }
  0xf8   :  { %v383_v49 = vmul.f32 %v5498_v33, %v367_v41  ;;  %v338_v50 = vpop.f32.mrf.mxu1  ;;  %v370_v56 = vmul.f32 10.0, %v4775_v43  ;;  %4781 = vmatprep.mubr.msk.f32.mxu0 %vm50_vm1, %v423_v54  ;;  %v429_v57 = vsel %vm397_vm7, %v381_v28, %v413_v39  ;;  %vm398_vm8 = vcmp.ge.f32.partialorder %v382_v24, 0.0  ;;  %4822 = vmatprep.subr.mxu1 %v5409_v3  ;;  %v4420_v39 = vld [vmem:[%s6601_s3] ss:$0 sm:$0xff]  ;;  %s5411_s3 = smov 64  }
  0xf9   :  { %v369_v53 = vmul.f32 10.0, %v338_v50  ;;  %v409_v58 = vmul.f32 0.01, %v377_v48  ;;  %4792 = vmatprep.mubr.msk.f32.mxu1 %vm50_vm1, %v429_v57  ;;  %4782 = vmatmul.mubr.msk.f32.vlgmr.msra.gmra.mxu0 %vm50_vm1, %v424_v51  ;;  %v430_v60 = vsel %vm398_vm8, %v382_v24, %v414_v46  ;;  %vm395_vm9 = vcmp.ge.f32.partialorder %v379_v22, 0.0 }
  0xfa   :  { %v415_v55 = vmul.f32 0.01, %v383_v49  ;;  %v4778_v32 = vpop.f32.mrf.mxu1  ;;  %4793 = vmatmul.mubr.msk.f32.gmra.mxu1 %vm50_vm1, %v430_v60  ;;  %4796 = vmatpush3.msra.mxu0 %v5571_v62  ;;  %v427_v61 = vsel %vm395_vm9, %v379_v22, %v411_v45  ;;  %vm399_vm10 = vcmp.ge.f32.partialorder %v383_v49, 0.0  ;;  %vm400_vm11 = vcmp.ge.f32.partialorder %v384_v38, 0.0 }
  0xfb   :  { %v385_v59 = vmul.f32 %v5498_v33, %v369_v53  ;;  %v372_v63 = vmul.f32 10.0, %v4778_v32  ;;  %v428_v1 = vsel %vm396_vm3, %v5582_v12, %v412_v31  ;;  %v410_v2 = vmul.f32 0.01, %v378_v47  ;;  %4805 = vmatprep.mubr.msk.f32.mxu1 %vm50_vm1, %v427_v61  ;;  %4811 = vmatprep.subr.mxu0 %v5409_v3  ;;  %v5622_v12 = vld [vmem:[%s6602_s4 + $0x18] sm:$0xff] }
  0xfc   :  { %v348_v0 = vpop.f32.mrf.mxu1  ;;  %v431_v4 = vsel %vm399_vm10, %v383_v49, %v415_v55  ;;  %v386_v6 = vmul.f32 %v5498_v33, %v370_v56  ;;  %v432_v7 = vsel %vm400_vm11, %v384_v38, %v416_v52  ;;  %vm393_vm12 = vcmp.ge.f32.partialorder %v377_v48, 0.0  ;;  %v5675_v49 = vld [vmem:[%s6603_s5] ss:$0 sm:$0xff] }
  0xfd   :  { %v371_v5 = vmul.f32 10.0, %v348_v0  ;;  %v388_v62 = vmul.f32 %v5498_v33, %v372_v63  ;;  %4784 = vmatprep.mubr.msk.f32.mxu0 %vm50_vm1, %v431_v4  ;;  %vm394_vm13 = vcmp.ge.f32.partialorder %v378_v47, 0.0  ;;  %v417_v8 = vmul.f32 0.01, %v385_v59 }
  0xfe   :  { %4785 = vmatmul.mubr.msk.f32.gmra.mxu0 %vm50_vm1, %v432_v7  ;;  %v425_v10 = vsel %vm393_vm12, %v377_v48, %v409_v58  ;;  %4806 = vmatmul.mubr.msk.f32.vlgmr.msra.gmra.mxu1 %vm50_vm1, %v428_v1  ;;  %vm401_vm14 = vcmp.ge.f32.partialorder %v385_v59, 0.0  ;;  %v426_v14 = vsel %vm394_vm13, %v378_v47, %v410_v2  ;;  %v418_v15 = vmul.f32 0.01, %v386_v6 }
  0xff   :  { %v387_v9 = vmul.f32 %v5498_v33, %v371_v5  ;;  %v420_v11 = vmul.f32 0.01, %v388_v62  ;;  %4797 = vmatprep.mubr.msk.f32.mxu0 %vm50_vm1, %v425_v10  ;;  %vm404_vm15 = vcmp.ge.f32.partialorder %v388_v62, 0.0  ;;  %4823 = vmatpush3.msra.mxu1 %v5622_v12  ;;  %v5628_v33 = vld [vmem:[%s6602_s4 + $0x10] sm:$0xff]  ;;  %v433_v16 = vsel %vm401_vm14, %v385_v59, %v417_v8 }
 0x100   :  { %4824 = vmatprep.subr.mxu1 %v5409_v3  ;;  %vm402_vm2 = vcmp.ge.f32.partialorder %v386_v6, 0.0  ;;  %vm5410_vm3 = vmmov 0   ;;  %vm862_vm4 = vcmask 261120   ;;  %vm4368_vm6 = vcmask 17408  }
 0x101   :  { %v419_v13 = vmul.f32 0.01, %v387_v9  ;;  %vm403_vm0 = vcmp.ge.f32.partialorder %v387_v9, 0.0  ;;  %v436_v18 = vsel %vm404_vm15, %v388_v62, %v420_v11  ;;  %4825 = vmatpush3.msra.mxu1 %v5628_v33  ;;  %v434_v20 = vsel %vm402_vm2, %v386_v6, %v418_v15 }
 0x102   :  { %4798 = vmatmul.mubr.msk.f32.vlgmr.msra.gmra.mxu0 %vm50_vm1, %v426_v14  ;;  %4826 = vmatprep.subr.mxu1 %v5409_v3 }
 0x103   :  { %v435_v17 = vsel %vm403_vm0, %v387_v9, %v419_v13  ;;  %4812 = vmatpush3.msra.mxu0 %v5622_v12  ;;  %4800 = vmatprep.mubr.msk.f32.mxu0 %vm50_vm1, %v433_v16 }
 0x104   :  { %4813 = vmatprep.subr.mxu0 %v5409_v3  ;;  %4808 = vmatprep.mubr.msk.f32.mxu1 %vm50_vm1, %v435_v17 }
 0x105   :  { %4814 = vmatpush3.msra.mxu0 %v5628_v33  ;;  %4809 = vmatmul.mubr.msk.f32.gmra.mxu1 %vm50_vm1, %v436_v18 }
 0x106   :  { %4815 = vmatprep.subr.mxu0 %v5409_v3  ;;  %4801 = vmatmul.mubr.msk.f32.gmra.mxu0 %vm50_vm1, %v434_v20  ;;  %vm997_vm1 = vcmask 1041409  }
 0x107   :  { %4816 = vmatpush3.msra.mxu0 %v5639_v19  ;;  %4819 = vmatprep.mubr.msk.f32.mxu0 %vm5410_vm3, %v5409_v3 }
 0x108   :  { %4817 = vmatprep.subr.mxu0 %v5409_v3  ;;  %4827 = vmatpush3.msra.mxu1 %v5639_v19 }
 0x109   :  { %4818 = vmatpush3.msra.mxu0 %v5649_v21  ;;  %4828 = vmatprep.subr.mxu1 %v5409_v3 }
 0x10a   :  { %4820 = vmatmul.mubr.f32.vlgmr.msra.gmra.mxu0 %v5409_v3  ;;  %4829 = vmatpush3.msra.mxu1 %v5649_v21 }
 0x10b   :  { %4830 = vmatprep.mubr.msk.f32.mxu1 %vm5410_vm3, %v5409_v3  ;;  %4844 = vmatprep.subr.mxu1 %v5409_v3 }
 0x10c   :  { %4833 = vmatprep.subr.mxu0 %v5409_v3  ;;  %4841 = vmatprep.mubr.msk.f32.mxu0 %vm5410_vm3, %v5409_v3 }
 0x1b6   :  { %v4791_v22 = vpop.f32.mrf.mxu1 }
 0x1b8   :  { %v615_v23 = vpop.f32.mrf.mxu1 }
 0x1b9   :  { %v4783_v24 = vpop.f32.mrf.mxu0 }
 0x1ba   :  { %v621_v25 = vadd.f32 %v4791_v22, %v4783_v24  ;;  %v4794_v26 = vpop.f32.mrf.mxu1 }
 0x1bb   :  { %v518_v27 = vpop.f32.mrf.mxu0 }
 0x1bc   :  { %v625_v28 = vpop.f32.mrf.mxu1  ;;  %v616_v36 = vadd.f32 %v615_v23, %v518_v27 }
 0x1be   :  { %v4786_v29 = vpop.f32.mrf.mxu0  ;;  %v4807_v31 = vpop.f32.mrf.mxu1 }
 0x1bf   :  { %v631_v30 = vadd.f32 %v4794_v26, %v4786_v29 }
 0x1c0   :  { %v528_v34 = vpop.f32.mrf.mxu0  ;;  %v817_v38 = vpop.f32.mrf.mxu1 }
 0x1c1   :  { %v626_v45 = vadd.f32 %v625_v28, %v528_v34 }
 0x1c2   :  { %v4799_v35 = vpop.f32.mrf.mxu0 }
 0x1c3   :  { %v734_v37 = vadd.f32 %v4799_v35, %v621_v25  ;;  %v993_v35 = vld [vmem:[%s6604_s6 + $0x18] sm:$0xff] }
 0x1c4   :  { %v714_v40 = vpop.f32.mrf.mxu0 }
 0x1c5   :  { %v837_v41 = vadd.f32 %v4807_v31, %v734_v37  ;;  %v733_v42 = vadd.f32 %v714_v40, %v616_v36  ;;  %v4810_v44 = vpop.f32.mrf.mxu1  ;;  %v992_v37 = vld [vmem:[%s6604_s6 + $0x10] sm:$0xff] }
 0x1c6   :  { %v4802_v43 = vpop.f32.mrf.mxu0 }
 0x1c7   :  { %v5670_v46 = vadd.f32 %v4420_v39, %v837_v41  ;;  %v736_v47 = vadd.f32 %v4802_v43, %v631_v30  ;;  %v827_v57 = vpop.f32.mrf.mxu1  ;;  %v836_v59 = vadd.f32 %v817_v38, %v733_v42  ;;  %v991_v38 = vld [vmem:[%s6604_s6 + $0x8] sm:$0xff] }
 0x1c8   :  { %v724_v48 = vpop.f32.mrf.mxu0 }
 0x1c9   :  { %v735_v50 = vadd.f32 %v724_v48, %v626_v45  ;;  %v839_v51 = vadd.f32 %v4810_v44, %v736_v47  ;;  %v5685_v61 = vadd.f32 %v4420_v39, %v836_v59 }
 0x1ca   :  { %v932_v52 = vpop.f32.mrf.mxu0 }
 0x1cb   :  { %v5677_v53 = vadd.f32 %v4420_v39, %v839_v51  ;;  %v933_v54 = vadd.f32 %v5675_v49, %v932_v52  ;;  %v838_v32 = vadd.f32 %v827_v57, %v735_v50 }
 0x1cc   :  { %v4821_v55 = vpop.f32.mrf.mxu0 }
 0x1cd   :  { %v937_v56 = vrot.slane %v933_v54, 1  ;;  %v5682_v58 = vadd.f32 %v4420_v39, %v838_v32  ;;  %v940_v63 = vadd.f32 %v933_v54, %v5685_v61  ;;  %v990_v39 = vld [vmem:[%s6604_s6] sm:$0xff] }
 0x1cf   :  { %956 = vrot.lane.b32.xlu0 %v937_v56, %s5411_s3  ;;  %v941_v60 = vadd.f32 %v937_v56, %v5682_v58  ;;  %v4422_v1 = vmul.f32 -1.442695, %v940_v63 }
 0x1d1   :  { %v4423_v0 = vmul.f32 -1.442695, %v941_v60 }
 0x1d3   :  { %954 = vrot.lane.b32.xlu0 %v933_v54, %s5411_s3  ;;  %5185 = vpow2.f32 %v4423_v0 }
 0x1d4   :  { %5187 = vpow2.f32 %v4422_v1 }
 0x1e0   :  { %v5186_v2 = vpop.eup %5185 }
 0x1e1   :  { %v949_v4 = vadd.f32 1.0, %v5186_v2  ;;  %v5188_v5 = vpop.eup %5187 }
 0x1e2   :  { %v948_v6 = vadd.f32 1.0, %v5188_v5 }
 0x1e3   :  { %5189 = vrcp.f32 %v949_v4 }
 0x1e4   :  { %5191 = vrcp.f32 %v948_v6  ;;  %v4430_v6 = vld [vmem:[%s6604_s6 + $0x38] sm:$0xff] }
 0x1e5   :  { %4834 = vmatpush3.msra.mxu0 %v4430_v6 }
 0x1e6   :  { %4835 = vmatprep.subr.mxu0 %v5409_v3 }
 0x1f0   :  { %v5190_v62 = vpop.eup %5189 }
 0x1f1   :  { %v5192_v9 = vpop.eup %5191  ;;  %v975_v20 = vsub.f32 1.0, %v5190_v62  ;;  %v987_v23 = vmul.f32 0.0, %v5190_v62 }
 0x1f2   :  { %v974_v26 = vsub.f32 1.0, %v5192_v9  ;;  %v986_v28 = vmul.f32 0.0, %v5192_v9 }
 0x241   :  { %v957_v7 = vpop.permute.xlu0 %956 }
 0x242   :  { %v961_v8 = vmul.f32 %v5190_v62, %v957_v7  ;;  %v4429_v62 = vld [vmem:[%s6604_s6 + $0x30] sm:$0xff]  ;;  %v4428_v7 = vld [vmem:[%s6604_s6 + $0x28] sm:$0xff] }
 0x243   :  { %4836 = vmatpush3.msra.mxu0 %v4429_v62 }
 0x244   :  { %966 = vrot.lane.b32.xlu1 %v961_v8, %s5411_s3  ;;  %4837 = vmatprep.subr.mxu0 %v5409_v3 }
 0x245   :  { %v955_v10 = vpop.permute.xlu0 %954  ;;  %4838 = vmatpush3.msra.mxu0 %v4428_v7 }
 0x246   :  { %v960_v11 = vmul.f32 %v5192_v9, %v955_v10  ;;  %v4427_v9 = vld [vmem:[%s6604_s6 + $0x20] sm:$0xff]  ;;  %4839 = vmatprep.subr.mxu0 %v5409_v3 }
 0x247   :  { %4840 = vmatpush3.msra.mxu0 %v4427_v9 }
 0x248   :  { %964 = vrot.lane.b32.xlu1 %v960_v11, %s5411_s3  ;;  %4855 = vmatprep.subr.mxu0 %v5409_v3 }
 0x2b6   :  { %v967_v13 = vpop.permute.xlu1 %966 }
 0x2b7   :  { %v971_v14 = vadd.f32 %v967_v13, %v5682_v58 }
 0x2b9   :  { %5193 = vtanh.f32 %v971_v14 }
 0x2ba   :  { %v965_v15 = vpop.permute.xlu1 %964 }
 0x2bb   :  { %v970_v16 = vadd.f32 %v965_v15, %v5685_v61 }
 0x2bd   :  { %5195 = vtanh.f32 %v970_v16 }
 0x2c6   :  { %v5194_v17 = vpop.eup %5193 }
 0x2c7   :  { %980 = vrot.lane.b32.xlu0 %v5194_v17, %s5412_s24 }
 0x2ca   :  { %v5196_v18 = vpop.eup %5195 }
 0x2cb   :  { %978 = vrot.lane.b32.xlu1 %v5196_v18, %s5412_s24 }
 0x339   :  { %v981_v22 = vpop.permute.xlu0 %980 }
 0x33a   :  { %v985_v24 = vmul.f32 %v981_v22, %v975_v20 }
 0x33c   :  { %v5694_v25 = vadd.f32 %v987_v23, %v985_v24 }
 0x33d   :  { %v979_v27 = vpop.permute.xlu1 %978 }
 0x33e   :  { %v984_v29 = vmul.f32 %v979_v27, %v974_v26  ;;  %v996_v30 = vrot.slane %v5694_v25, 7 }
 0x340   :  { %v5697_v31 = vadd.f32 %v986_v28, %v984_v29 }
 0x342   :  { %v998_v34 = vsel %vm997_vm1, %v996_v30, %v5697_v31  ;;  %v1123_v13 = vrot.slane %v5697_v31, 7 }
 0x343   :  { %999 = vrot.lane.b32.xlu0 %v998_v34, %s5412_s24 }
 0x3b5   :  { %v1000_v36 = vpop.permute.xlu0 %999 }
 0x3b6   :  { %4831 = vmatmul.mubr.msk.f32.vlgmr.msra.gmra.mxu1 %vm862_vm4, %v1000_v36 }
 0x3b7   :  { %4845 = vmatpush3.msra.mxu1 %v993_v35  ;;  %4852 = vmatprep.mubr.msk.f32.mxu1 %vm5410_vm3, %v5409_v3 }
 0x3b8   :  { %4846 = vmatprep.subr.mxu1 %v5409_v3 }
 0x3b9   :  { %4847 = vmatpush3.msra.mxu1 %v992_v37 }
 0x3ba   :  { %4848 = vmatprep.subr.mxu1 %v5409_v3 }
 0x3bb   :  { %4849 = vmatpush3.msra.mxu1 %v991_v38 }
 0x3bc   :  { %4850 = vmatprep.subr.mxu1 %v5409_v3 }
 0x3bd   :  { %4851 = vmatpush3.msra.mxu1 %v990_v39 }
 0x3be   :  { %4853 = vmatmul.mubr.msk.f32.vlgmr.msra.gmra.mxu1 %vm862_vm4, %v1000_v36  ;;  %4866 = vmatprep.subr.mxu1 %v5409_v3 }
 0x3bf   :  { %4874 = vmatprep.mubr.msk.f32.mxu1 %vm5410_vm3, %v5409_v3 }
 0x476   :  { %v1069_v40 = vpop.f32.mrf.mxu1 }
 0x477   :  { %v1070_v41 = vadd.f32 %v5675_v49, %v1069_v40 }
 0x478   :  { %v4832_v42 = vpop.f32.mrf.mxu1 }
 0x479   :  { %1093 = vrot.lane.b32.xlu0 %v1070_v41, %s5411_s3  ;;  %v1074_v43 = vrot.slane %v1070_v41, 7  ;;  %v1078_v47 = vadd.f32 %v1070_v41, %v5682_v58 }
 0x47b   :  { %1091 = vrot.lane.b32.xlu1 %v1074_v43, %s5411_s3  ;;  %v1077_v48 = vadd.f32 %v1074_v43, %v5685_v61  ;;  %v4426_v50 = vmul.f32 -1.442695, %v1078_v47 }
 0x47d   :  { %v4425_v51 = vmul.f32 -1.442695, %v1077_v48  ;;  %5197 = vpow2.f32 %v4426_v50 }
 0x47e   :  { %v5729_v44 = vpop.f32.mrf.mxu1 }
 0x47f   :  { %5199 = vpow2.f32 %v4425_v51 }
 0x480   :  { %v4854_v45 = vpop.f32.mrf.mxu1 }
 0x48a   :  { %v5198_v52 = vpop.eup %5197 }
 0x48b   :  { %v1086_v55 = vadd.f32 1.0, %v5198_v52 }
 0x48c   :  { %v5200_v54 = vpop.eup %5199 }
 0x48d   :  { %v1085_v56 = vadd.f32 1.0, %v5200_v54  ;;  %5201 = vrcp.f32 %v1086_v55 }
 0x48f   :  { %5203 = vrcp.f32 %v1085_v56 }
 0x49a   :  { %v5202_v57 = vpop.eup %5201 }
 0x49b   :  { %v1112_v14 = vsub.f32 1.0, %v5202_v57  ;;  %v1127_v22 = vmul.f32 %v5202_v57, %v996_v30 }
 0x49c   :  { %v5204_v60 = vpop.eup %5203 }
 0x49d   :  { %v1111_v15 = vsub.f32 1.0, %v5204_v60  ;;  %v1126_v18 = vmul.f32 %v5204_v60, %v1123_v13 }
 0x4eb   :  { %v1094_v32 = vpop.permute.xlu0 %1093 }
 0x4ec   :  { %v1098_v59 = vmul.f32 %v5202_v57, %v1094_v32 }
 0x4ed   :  { %v1092_v63 = vpop.permute.xlu1 %1091 }
 0x4ee   :  { %v1097_v0 = vmul.f32 %v5204_v60, %v1092_v63  ;;  %1103 = vrot.lane.b32.xlu0 %v1098_v59, %s5411_s3  ;;  %v4439_v59 = vld [vmem:[%s6604_s6 + $0x58] sm:$0xff]  ;;  %v4438_v60 = vld [vmem:[%s6604_s6 + $0x50] sm:$0xff]  ;;  %v4437_v63 = vld [vmem:[%s6604_s6 + $0x48] sm:$0xff] }
 0x4ef   :  { %4867 = vmatpush3.msra.mxu1 %v4439_v59 }
 0x4f0   :  { %1101 = vrot.lane.b32.xlu1 %v1097_v0, %s5411_s3  ;;  %4868 = vmatprep.subr.mxu1 %v5409_v3 }
 0x4f1   :  { %4869 = vmatpush3.msra.mxu1 %v4438_v60 }
 0x4f2   :  { %4870 = vmatprep.subr.mxu1 %v5409_v3 }
 0x4f3   :  { %4871 = vmatpush3.msra.mxu1 %v4437_v63 }
 0x4f4   :  { %4872 = vmatprep.subr.mxu1 %v5409_v3 }
 0x560   :  { %v1104_v1 = vpop.permute.xlu0 %1103 }
 0x561   :  { %v1108_v2 = vadd.f32 %v1104_v1, %v5682_v58  ;;  %v4436_v1 = vld [vmem:[%s6604_s6 + $0x40] sm:$0xff] }
 0x562   :  { %v1102_v4 = vpop.permute.xlu1 %1101  ;;  %4873 = vmatpush3.msra.mxu1 %v4436_v1 }
 0x563   :  { %5205 = vtanh.f32 %v1108_v2  ;;  %v1107_v5 = vadd.f32 %v1102_v4, %v5685_v61  ;;  %4888 = vmatprep.subr.mxu1 %v5409_v3 }
 0x565   :  { %5207 = vtanh.f32 %v1107_v5 }
 0x570   :  { %v5206_v8 = vpop.eup %5205 }
 0x571   :  { %1117 = vrot.lane.b32.xlu0 %v5206_v8, %s5412_s24 }
 0x572   :  { %v5208_v10 = vpop.eup %5207 }
 0x573   :  { %1115 = vrot.lane.b32.xlu1 %v5208_v10, %s5412_s24 }
 0x5e3   :  { %v1118_v11 = vpop.permute.xlu0 %1117 }
 0x5e4   :  { %v1122_v17 = vmul.f32 %v1118_v11, %v1112_v14 }
 0x5e5   :  { %v1116_v16 = vpop.permute.xlu1 %1115 }
 0x5e6   :  { %v1121_v20 = vmul.f32 %v1116_v16, %v1111_v15  ;;  %v5760_v24 = vadd.f32 %v1127_v22, %v1122_v17 }
 0x5e8   :  { %v5758_v23 = vadd.f32 %v1126_v18, %v1121_v20  ;;  %v1405_v4 = vrot.slane %v5760_v24, 7 }
 0x5ea   :  { %v1137_v26 = vrot.slane %v5758_v23, 1  ;;  %v1404_v6 = vrot.slane %v5758_v23, 7 }
 0x5ec   :  { %v1138_v27 = vsel %vm997_vm1, %v5760_v24, %v1137_v26 }
 0x5ed   :  { %1139 = vrot.lane.b32.xlu1 %v1138_v27, %s5412_s24 }
 0x65f   :  { %v1140_v28 = vpop.permute.xlu1 %1139 }
 0x660   :  { %4842 = vmatmul.mubr.msk.f32.vlgmr.msra.gmra.mxu0 %vm862_vm4, %v1140_v28 }
 0x661   :  { %4856 = vmatpush3.msra.mxu0 %v5622_v12  ;;  %4863 = vmatprep.mubr.msk.f32.mxu0 %vm5410_vm3, %v5409_v3 }
 0x662   :  { %4857 = vmatprep.subr.mxu0 %v5409_v3 }
 0x663   :  { %4858 = vmatpush3.msra.mxu0 %v5628_v33 }
 0x664   :  { %4859 = vmatprep.subr.mxu0 %v5409_v3 }
 0x665   :  { %4860 = vmatpush3.msra.mxu0 %v5639_v19 }
 0x666   :  { %4861 = vmatprep.subr.mxu0 %v5409_v3 }
 0x667   :  { %4862 = vmatpush3.msra.mxu0 %v5649_v21 }
 0x668   :  { %4864 = vmatmul.mubr.msk.f32.vlgmr.msra.gmra.mxu0 %vm862_vm4, %v1140_v28  ;;  %4877 = vmatprep.subr.mxu0 %v5409_v3 }
 0x669   :  { %4878 = vmatpush3.msra.mxu0 %v5622_v12  ;;  %4885 = vmatprep.mubr.msk.f32.mxu0 %vm5410_vm3, %v5409_v3 }
 0x66a   :  { %4879 = vmatprep.subr.mxu0 %v5409_v3 }
 0x66b   :  { %4880 = vmatpush3.msra.mxu0 %v5628_v33 }
 0x66c   :  { %4881 = vmatprep.subr.mxu0 %v5409_v3 }
 0x66d   :  { %4882 = vmatpush3.msra.mxu0 %v5639_v19 }
 0x66e   :  { %4883 = vmatprep.subr.mxu0 %v5409_v3 }
 0x66f   :  { %4884 = vmatpush3.msra.mxu0 %v5649_v21 }
 0x670   :  { %4899 = vmatprep.subr.mxu0 %v5409_v3 }
 0x720   :  { %v5788_v25 = vpop.f32.mrf.mxu0 }
 0x721   :  { %v1280_v22 = vadd.f32 %v5729_v44, %v5788_v25 }
 0x722   :  { %v4843_v29 = vpop.f32.mrf.mxu0 }
 0x728   :  { %v1349_v30 = vpop.f32.mrf.mxu0 }
 0x729   :  { %v1350_v31 = vadd.f32 %v5675_v49, %v1349_v30 }
 0x72a   :  { %v4865_v34 = vpop.f32.mrf.mxu0 }
 0x72b   :  { %v1354_v35 = vrot.slane %v1350_v31, 6  ;;  %v1355_v36 = vrot.slane %v1350_v31, 7 }
 0x72d   :  { %1374 = vrot.lane.b32.xlu1 %v1355_v36, %s5411_s3  ;;  %1372 = vrot.lane.b32.xlu0 %v1354_v35, %s5411_s3  ;;  %v1358_v37 = vadd.f32 %v1354_v35, %v5685_v61  ;;  %v1359_v38 = vadd.f32 %v1355_v36, %v5682_v58 }
 0x72f   :  { %v4434_v39 = vmul.f32 -1.442695, %v1358_v37  ;;  %v4435_v40 = vmul.f32 -1.442695, %v1359_v38 }
 0x731   :  { %5209 = vpow2.f32 %v4434_v39 }
 0x732   :  { %5211 = vpow2.f32 %v4435_v40 }
 0x73e   :  { %v5210_v41 = vpop.eup %5209 }
 0x73f   :  { %v5212_v42 = vpop.eup %5211  ;;  %v1366_v43 = vadd.f32 1.0, %v5210_v41 }
 0x740   :  { %v1367_v45 = vadd.f32 1.0, %v5212_v42 }
 0x741   :  { %5213 = vrcp.f32 %v1366_v43 }
 0x742   :  { %5215 = vrcp.f32 %v1367_v45 }
 0x74e   :  { %v5214_v47 = vpop.eup %5213 }
 0x74f   :  { %v5216_v48 = vpop.eup %5215  ;;  %v1392_v7 = vsub.f32 1.0, %v5214_v47  ;;  %v1408_v11 = vmul.f32 %v5214_v47, %v1404_v6 }
 0x750   :  { %v1393_v5 = vsub.f32 1.0, %v5216_v48  ;;  %v1409_v8 = vmul.f32 %v5216_v48, %v1405_v4 }
 0x79f   :  { %v1375_v50 = vpop.permute.xlu1 %1374  ;;  %v1373_v51 = vpop.permute.xlu0 %1372 }
 0x7a0   :  { %v1379_v52 = vmul.f32 %v5216_v48, %v1375_v50  ;;  %v1378_v54 = vmul.f32 %v5214_v47, %v1373_v51 }
 0x7a2   :  { %1384 = vrot.lane.b32.xlu1 %v1379_v52, %s5411_s3  ;;  %1382 = vrot.lane.b32.xlu0 %v1378_v54, %s5411_s3  ;;  %v4447_v54 = vld [vmem:[%s6604_s6 + $0x78] sm:$0xff] }
 0x814   :  { %v1385_v55 = vpop.permute.xlu1 %1384  ;;  %v1383_v56 = vpop.permute.xlu0 %1382 }
 0x815   :  { %v1389_v57 = vadd.f32 %v1385_v55, %v5682_v58  ;;  %v1388_v32 = vadd.f32 %v1383_v56, %v5685_v61  ;;  %v4446_v55 = vld [vmem:[%s6604_s6 + $0x70] sm:$0xff]  ;;  %v4445_v56 = vld [vmem:[%s6604_s6 + $0x68] sm:$0xff] }
 0x817   :  { %5217 = vtanh.f32 %v1389_v57 }
 0x818   :  { %5219 = vtanh.f32 %v1388_v32  ;;  %v4444_v32 = vld [vmem:[%s6604_s6 + $0x60] sm:$0xff] }
 0x824   :  { %v5218_v0 = vpop.eup %5217 }
 0x825   :  { %v5220_v2 = vpop.eup %5219  ;;  %1398 = vrot.lane.b32.xlu1 %v5218_v0, %s5412_s24 }
 0x826   :  { %1396 = vrot.lane.b32.xlu0 %v5220_v2, %s5412_s24 }
 0x897   :  { %v1399_v62 = vpop.permute.xlu1 %1398 }
 0x898   :  { %v1403_v9 = vmul.f32 %v1399_v62, %v1393_v5  ;;  %v1397_v10 = vpop.permute.xlu0 %1396 }
 0x899   :  { %v1402_v13 = vmul.f32 %v1397_v10, %v1392_v7 }
 0x89a   :  { %v5819_v14 = vadd.f32 %v1409_v8, %v1403_v9 }
 0x89b   :  { %v5821_v15 = vadd.f32 %v1408_v11, %v1402_v13 }
 0x89c   :  { %v1420_v16 = vrot.slane %v5819_v14, 1  ;;  %v1619_v60 = vrot.slane %v5819_v14, 7 }
 0x89d   :  { %v1419_v17 = vrot.slane %v5821_v15, 2  ;;  %v1618_v0 = vrot.slane %v5821_v15, 7 }
 0x89f   :  { %v1421_v18 = vsel %vm997_vm1, %v1420_v16, %v1419_v17 }
 0x8a0   :  { %1422 = vrot.lane.b32.xlu0 %v1421_v18, %s5412_s24 }
 0x912   :  { %v1423_v20 = vpop.permute.xlu0 %1422 }
 0x913   :  { %4875 = vmatmul.mubr.msk.f32.vlgmr.msra.gmra.mxu1 %vm862_vm4, %v1423_v20  ;;  %4886 = vmatmul.mubr.msk.f32.vlgmr.msra.gmra.mxu0 %vm862_vm4, %v1423_v20 }
 0x914   :  { %4900 = vmatpush3.msra.mxu0 %v5622_v12  ;;  %4896 = vmatprep.mubr.msk.f32.mxu1 %vm5410_vm3, %v5409_v3 }
 0x915   :  { %4901 = vmatprep.subr.mxu0 %v5409_v3  ;;  %4907 = vmatprep.mubr.msk.f32.mxu0 %vm5410_vm3, %v5409_v3 }
 0x916   :  { %4902 = vmatpush3.msra.mxu0 %v5628_v33  ;;  %4889 = vmatpush3.msra.mxu1 %v4447_v54 }
 0x917   :  { %4903 = vmatprep.subr.mxu0 %v5409_v3  ;;  %4890 = vmatprep.subr.mxu1 %v5409_v3 }
 0x918   :  { %4904 = vmatpush3.msra.mxu0 %v5639_v19  ;;  %4891 = vmatpush3.msra.mxu1 %v4446_v55 }
 0x919   :  { %4905 = vmatprep.subr.mxu0 %v5409_v3  ;;  %4892 = vmatprep.subr.mxu1 %v5409_v3 }
 0x91a   :  { %4906 = vmatpush3.msra.mxu0 %v5649_v21  ;;  %4893 = vmatpush3.msra.mxu1 %v4445_v56 }
 0x91b   :  { %4921 = vmatprep.subr.mxu0 %v5409_v3  ;;  %4894 = vmatprep.subr.mxu1 %v5409_v3 }
 0x91c   :  { %4895 = vmatpush3.msra.mxu1 %v4444_v32 }
 0x91d   :  { %4910 = vmatprep.subr.mxu1 %v5409_v3 }
 0x9d3   :  { %v1492_v23 = vpop.f32.mrf.mxu1  ;;  %v1563_v24 = vpop.f32.mrf.mxu0 }
 0x9d4   :  { %v5843_v26 = vadd.f32 %v1492_v23, %v1280_v22  ;;  %v1564_v27 = vadd.f32 %v5675_v49, %v1563_v24 }
 0x9d5   :  { %v4876_v28 = vpop.f32.mrf.mxu1  ;;  %v4887_v29 = vpop.f32.mrf.mxu0 }
 0x9d6   :  { %v1568_v30 = vrot.slane %v1564_v27, 5  ;;  %v1569_v31 = vrot.slane %v1564_v27, 6 }
 0x9d8   :  { %1588 = vrot.lane.b32.xlu0 %v1569_v31, %s5411_s3  ;;  %1586 = vrot.lane.b32.xlu1 %v1568_v30, %s5411_s3  ;;  %v1572_v34 = vadd.f32 %v1568_v30, %v5685_v61  ;;  %v1573_v35 = vadd.f32 %v1569_v31, %v5682_v58 }
 0x9da   :  { %v4442_v36 = vmul.f32 -1.442695, %v1572_v34  ;;  %v4443_v44 = vmul.f32 -1.442695, %v1573_v35 }
 0x9dc   :  { %5221 = vpow2.f32 %v4442_v36 }
 0x9dd   :  { %5223 = vpow2.f32 %v4443_v44 }
 0x9e9   :  { %v5222_v25 = vpop.eup %5221 }
 0x9ea   :  { %v5224_v37 = vpop.eup %5223  ;;  %v1580_v38 = vadd.f32 1.0, %v5222_v25 }
 0x9eb   :  { %v1581_v39 = vadd.f32 1.0, %v5224_v37 }
 0x9ec   :  { %5225 = vrcp.f32 %v1580_v38 }
 0x9ed   :  { %5227 = vrcp.f32 %v1581_v39 }
 0x9f9   :  { %v5226_v40 = vpop.eup %5225 }
 0x9fa   :  { %v5228_v41 = vpop.eup %5227  ;;  %v1606_v2 = vsub.f32 1.0, %v5226_v40  ;;  %v1622_v62 = vmul.f32 %v5226_v40, %v1618_v0 }
 0x9fb   :  { %v1607_v63 = vsub.f32 1.0, %v5228_v41  ;;  %v1623_v4 = vmul.f32 %v5228_v41, %v1619_v60 }
 0xa4a   :  { %v1589_v42 = vpop.permute.xlu0 %1588  ;;  %v1587_v43 = vpop.permute.xlu1 %1586 }
 0xa4b   :  { %v1593_v45 = vmul.f32 %v5228_v41, %v1589_v42  ;;  %v1592_v47 = vmul.f32 %v5226_v40, %v1587_v43 }
 0xa4d   :  { %1598 = vrot.lane.b32.xlu0 %v1593_v45, %s5411_s3  ;;  %1596 = vrot.lane.b32.xlu1 %v1592_v47, %s5411_s3  ;;  %v4455_v45 = vld [vmem:[%s6604_s6 + $0x98] sm:$0xff]  ;;  %v4454_v47 = vld [vmem:[%s6604_s6 + $0x90] sm:$0xff] }
 0xabf   :  { %v1599_v48 = vpop.permute.xlu0 %1598  ;;  %v1597_v50 = vpop.permute.xlu1 %1596 }
 0xac0   :  { %v1603_v51 = vadd.f32 %v1599_v48, %v5682_v58  ;;  %v1602_v52 = vadd.f32 %v1597_v50, %v5685_v61  ;;  %v4453_v48 = vld [vmem:[%s6604_s6 + $0x88] sm:$0xff] }
 0xac2   :  { %5229 = vtanh.f32 %v1603_v51  ;;  %v4452_v51 = vld [vmem:[%s6604_s6 + $0x80] sm:$0xff] }
 0xac3   :  { %5231 = vtanh.f32 %v1602_v52 }
 0xacf   :  { %v5230_v57 = vpop.eup %5229 }
 0xad0   :  { %v5232_v59 = vpop.eup %5231  ;;  %1612 = vrot.lane.b32.xlu0 %v5230_v57, %s5412_s24 }
 0xad1   :  { %1610 = vrot.lane.b32.xlu1 %v5232_v59, %s5412_s24 }
 0xb42   :  { %v1613_v1 = vpop.permute.xlu0 %1612 }
 0xb43   :  { %v1617_v5 = vmul.f32 %v1613_v1, %v1607_v63  ;;  %v1611_v6 = vpop.permute.xlu1 %1610 }
 0xb44   :  { %v1616_v7 = vmul.f32 %v1611_v6, %v1606_v2 }
 0xb45   :  { %v5874_v8 = vadd.f32 %v1623_v4, %v1617_v5 }
 0xb46   :  { %v5876_v9 = vadd.f32 %v1622_v62, %v1616_v7 }
 0xb47   :  { %v1634_v10 = vrot.slane %v5874_v8, 2  ;;  %v1833_v54 = vrot.slane %v5874_v8, 7 }
 0xb48   :  { %v1633_v11 = vrot.slane %v5876_v9, 3  ;;  %v1832_v56 = vrot.slane %v5876_v9, 7 }
 0xb4a   :  { %v1635_v13 = vsel %vm997_vm1, %v1634_v10, %v1633_v11 }
 0xb4b   :  { %1636 = vrot.lane.b32.xlu1 %v1635_v13, %s5412_s24 }
 0xbbd   :  { %v1637_v14 = vpop.permute.xlu1 %1636 }
 0xbbe   :  { %4897 = vmatmul.mubr.msk.f32.vlgmr.msra.gmra.mxu1 %vm862_vm4, %v1637_v14  ;;  %4908 = vmatmul.mubr.msk.f32.vlgmr.msra.gmra.mxu0 %vm862_vm4, %v1637_v14 }
 0xbbf   :  { %4922 = vmatpush3.msra.mxu0 %v5622_v12  ;;  %4918 = vmatprep.mubr.msk.f32.mxu1 %vm5410_vm3, %v5409_v3 }
 0xbc0   :  { %4923 = vmatprep.subr.mxu0 %v5409_v3  ;;  %4929 = vmatprep.mubr.msk.f32.mxu0 %vm5410_vm3, %v5409_v3 }
 0xbc1   :  { %4924 = vmatpush3.msra.mxu0 %v5628_v33  ;;  %4911 = vmatpush3.msra.mxu1 %v4455_v45 }
 0xbc2   :  { %4925 = vmatprep.subr.mxu0 %v5409_v3  ;;  %4912 = vmatprep.subr.mxu1 %v5409_v3 }
 0xbc3   :  { %4926 = vmatpush3.msra.mxu0 %v5639_v19  ;;  %4913 = vmatpush3.msra.mxu1 %v4454_v47 }
 0xbc4   :  { %4927 = vmatprep.subr.mxu0 %v5409_v3  ;;  %4914 = vmatprep.subr.mxu1 %v5409_v3 }
 0xbc5   :  { %4928 = vmatpush3.msra.mxu0 %v5649_v21  ;;  %4915 = vmatpush3.msra.mxu1 %v4453_v48 }
 0xbc6   :  { %4943 = vmatprep.subr.mxu0 %v5409_v3  ;;  %4916 = vmatprep.subr.mxu1 %v5409_v3 }
 0xbc7   :  { %4917 = vmatpush3.msra.mxu1 %v4452_v51 }
 0xbc8   :  { %4932 = vmatprep.subr.mxu1 %v5409_v3 }
 0xc7e   :  { %v1706_v15 = vpop.f32.mrf.mxu1  ;;  %v1777_v16 = vpop.f32.mrf.mxu0 }
 0xc7f   :  { %v5897_v17 = vadd.f32 %v1706_v15, %v5843_v26  ;;  %v1778_v18 = vadd.f32 %v5675_v49, %v1777_v16 }
 0xc80   :  { %v4898_v20 = vpop.f32.mrf.mxu1  ;;  %v4909_v22 = vpop.f32.mrf.mxu0 }
 0xc81   :  { %v1782_v23 = vrot.slane %v1778_v18, 4  ;;  %v1783_v24 = vrot.slane %v1778_v18, 5 }
 0xc83   :  { %1802 = vrot.lane.b32.xlu1 %v1783_v24, %s5411_s3  ;;  %1800 = vrot.lane.b32.xlu0 %v1782_v23, %s5411_s3  ;;  %v1786_v27 = vadd.f32 %v1782_v23, %v5685_v61  ;;  %v1787_v28 = vadd.f32 %v1783_v24, %v5682_v58 }
 0xc85   :  { %v4450_v29 = vmul.f32 -1.442695, %v1786_v27  ;;  %v4451_v30 = vmul.f32 -1.442695, %v1787_v28 }
 0xc87   :  { %5233 = vpow2.f32 %v4450_v29 }
 0xc88   :  { %5235 = vpow2.f32 %v4451_v30 }
 0xc94   :  { %v5234_v26 = vpop.eup %5233 }
 0xc95   :  { %v5236_v31 = vpop.eup %5235  ;;  %v1794_v34 = vadd.f32 1.0, %v5234_v26 }
 0xc96   :  { %v1795_v35 = vadd.f32 1.0, %v5236_v31 }
 0xc97   :  { %5237 = vrcp.f32 %v1794_v34 }
 0xc98   :  { %5239 = vrcp.f32 %v1795_v35 }
 0xca4   :  { %v5238_v36 = vpop.eup %5237 }
 0xca5   :  { %v5240_v44 = vpop.eup %5239  ;;  %v1820_v32 = vsub.f32 1.0, %v5238_v36  ;;  %v1836_v0 = vmul.f32 %v5238_v36, %v1832_v56 }
 0xca6   :  { %v1821_v55 = vsub.f32 1.0, %v5240_v44  ;;  %v1837_v59 = vmul.f32 %v5240_v44, %v1833_v54 }
 0xcf5   :  { %v1803_v25 = vpop.permute.xlu1 %1802  ;;  %v1801_v37 = vpop.permute.xlu0 %1800 }
 0xcf6   :  { %v1807_v38 = vmul.f32 %v5240_v44, %v1803_v25  ;;  %v1806_v39 = vmul.f32 %v5238_v36, %v1801_v37  ;;  %v4463_v36 = vld [vmem:[%s6604_s6 + $0xb8] sm:$0xff]  ;;  %v4462_v44 = vld [vmem:[%s6604_s6 + $0xb0] sm:$0xff]  ;;  %v4461_v25 = vld [vmem:[%s6604_s6 + $0xa8] sm:$0xff] }
 0xcf8   :  { %1812 = vrot.lane.b32.xlu1 %v1807_v38, %s5411_s3  ;;  %1810 = vrot.lane.b32.xlu0 %v1806_v39, %s5411_s3  ;;  %v4460_v38 = vld [vmem:[%s6604_s6 + $0xa0] sm:$0xff] }
 0xd6a   :  { %v1813_v40 = vpop.permute.xlu1 %1812  ;;  %v1811_v41 = vpop.permute.xlu0 %1810 }
 0xd6b   :  { %v1817_v42 = vadd.f32 %v1813_v40, %v5682_v58  ;;  %v1816_v43 = vadd.f32 %v1811_v41, %v5685_v61 }
 0xd6d   :  { %5241 = vtanh.f32 %v1817_v42 }
 0xd6e   :  { %5243 = vtanh.f32 %v1816_v43 }
 0xd7a   :  { %v5242_v50 = vpop.eup %5241 }
 0xd7b   :  { %v5244_v52 = vpop.eup %5243  ;;  %1826 = vrot.lane.b32.xlu1 %v5242_v50, %s5412_s24 }
 0xd7c   :  { %1824 = vrot.lane.b32.xlu0 %v5244_v52, %s5412_s24 }
 0xded   :  { %v1827_v57 = vpop.permute.xlu1 %1826 }
 0xdee   :  { %v1831_v60 = vmul.f32 %v1827_v57, %v1821_v55  ;;  %v1825_v63 = vpop.permute.xlu0 %1824 }
 0xdef   :  { %v1830_v1 = vmul.f32 %v1825_v63, %v1820_v32  ;;  %v6006_v63 = vld [vmem:[%s6602_s4 + $0x10] sm:$0xff] }
 0xdf0   :  { %v5928_v2 = vadd.f32 %v1837_v59, %v1831_v60  ;;  %v5995_v60 = vld [vmem:[%s6602_s4 + $0x18] sm:$0xff] }
 0xdf1   :  { %v5930_v4 = vadd.f32 %v1836_v0, %v1830_v1  ;;  %v6013_v0 = vld [vmem:[%s6602_s4 + $0x8] sm:$0xff]  ;;  %v6020_v1 = vld [vmem:[%s6602_s4] sm:$0xff] }
 0xdf2   :  { %v1848_v5 = vrot.slane %v5928_v2, 3  ;;  %v2047_v40 = vrot.slane %v5928_v2, 7 }
 0xdf3   :  { %v1847_v6 = vrot.slane %v5930_v4, 4  ;;  %v2046_v42 = vrot.slane %v5930_v4, 7 }
 0xdf5   :  { %v1849_v62 = vsel %vm997_vm1, %v1848_v5, %v1847_v6 }
 0xdf6   :  { %1850 = vrot.lane.b32.xlu0 %v1849_v62, %s5412_s24 }
 0xe68   :  { %v1851_v7 = vpop.permute.xlu0 %1850 }
 0xe69   :  { %4919 = vmatmul.mubr.msk.f32.vlgmr.msra.gmra.mxu1 %vm862_vm4, %v1851_v7  ;;  %4930 = vmatmul.mubr.msk.f32.vlgmr.msra.gmra.mxu0 %vm862_vm4, %v1851_v7 }
 0xe6a   :  { %4944 = vmatpush3.msra.mxu0 %v5622_v12  ;;  %4940 = vmatprep.mubr.msk.f32.mxu1 %vm5410_vm3, %v5409_v3 }
 0xe6b   :  { %4945 = vmatprep.subr.mxu0 %v5409_v3  ;;  %4951 = vmatprep.mubr.msk.f32.mxu0 %vm5410_vm3, %v5409_v3 }
 0xe6c   :  { %4946 = vmatpush3.msra.mxu0 %v5628_v33  ;;  %4933 = vmatpush3.msra.mxu1 %v4463_v36 }
 0xe6d   :  { %4947 = vmatprep.subr.mxu0 %v5409_v3  ;;  %4934 = vmatprep.subr.mxu1 %v5409_v3 }
 0xe6e   :  { %4948 = vmatpush3.msra.mxu0 %v5639_v19  ;;  %4935 = vmatpush3.msra.mxu1 %v4462_v44 }
 0xe6f   :  { %4949 = vmatprep.subr.mxu0 %v5409_v3  ;;  %4936 = vmatprep.subr.mxu1 %v5409_v3 }
 0xe70   :  { %4950 = vmatpush3.msra.mxu0 %v5649_v21  ;;  %4937 = vmatpush3.msra.mxu1 %v4461_v25 }
 0xe71   :  { %4965 = vmatprep.subr.mxu0 %v5409_v3  ;;  %4938 = vmatprep.subr.mxu1 %v5409_v3 }
 0xe72   :  { %4939 = vmatpush3.msra.mxu1 %v4460_v38 }
 0xe73   :  { %4954 = vmatprep.subr.mxu1 %v5409_v3 }
 0xf29   :  { %v1920_v12 = vpop.f32.mrf.mxu1  ;;  %v1991_v8 = vpop.f32.mrf.mxu0 }
 0xf2a   :  { %v5951_v9 = vadd.f32 %v1920_v12, %v5897_v17  ;;  %v1992_v10 = vadd.f32 %v5675_v49, %v1991_v8 }
 0xf2b   :  { %v4920_v11 = vpop.f32.mrf.mxu1  ;;  %v4931_v13 = vpop.f32.mrf.mxu0 }
 0xf2c   :  { %v1996_v33 = vrot.slane %v1992_v10, 3  ;;  %v1997_v14 = vrot.slane %v1992_v10, 4 }
 0xf2e   :  { %2016 = vrot.lane.b32.xlu0 %v1997_v14, %s5411_s3  ;;  %2014 = vrot.lane.b32.xlu1 %v1996_v33, %s5411_s3  ;;  %v2000_v19 = vadd.f32 %v1996_v33, %v5685_v61  ;;  %v2001_v21 = vadd.f32 %v1997_v14, %v5682_v58 }
 0xf30   :  { %v4458_v15 = vmul.f32 -1.442695, %v2000_v19  ;;  %v4459_v16 = vmul.f32 -1.442695, %v2001_v21 }
 0xf32   :  { %5245 = vpow2.f32 %v4458_v15 }
 0xf33   :  { %5247 = vpow2.f32 %v4459_v16 }
 0xf3f   :  { %v5246_v17 = vpop.eup %5245 }
 0xf40   :  { %v5248_v18 = vpop.eup %5247  ;;  %v2008_v20 = vadd.f32 1.0, %v5246_v17 }
 0xf41   :  { %v2009_v22 = vadd.f32 1.0, %v5248_v18 }
 0xf42   :  { %5249 = vrcp.f32 %v2008_v20 }
 0xf43   :  { %5251 = vrcp.f32 %v2009_v22 }
 0xf4f   :  { %v5250_v23 = vpop.eup %5249 }
 0xf50   :  { %v5252_v24 = vpop.eup %5251  ;;  %v2034_v45 = vsub.f32 1.0, %v5250_v23  ;;  %v2050_v51 = vmul.f32 %v5250_v23, %v2046_v42 }
 0xf51   :  { %v2035_v41 = vsub.f32 1.0, %v5252_v24  ;;  %v2051_v47 = vmul.f32 %v5252_v24, %v2047_v40 }
 0xfa0   :  { %v2017_v27 = vpop.permute.xlu0 %2016  ;;  %v2015_v28 = vpop.permute.xlu1 %2014 }
 0xfa1   :  { %v2021_v29 = vmul.f32 %v5252_v24, %v2017_v27  ;;  %v2020_v30 = vmul.f32 %v5250_v23, %v2015_v28  ;;  %v4471_v28 = vld [vmem:[%s6604_s6 + $0xd8] sm:$0xff] }
 0xfa3   :  { %2026 = vrot.lane.b32.xlu0 %v2021_v29, %s5411_s3  ;;  %2024 = vrot.lane.b32.xlu1 %v2020_v30, %s5411_s3  ;;  %v4470_v29 = vld [vmem:[%s6604_s6 + $0xd0] sm:$0xff]  ;;  %v4469_v30 = vld [vmem:[%s6604_s6 + $0xc8] sm:$0xff] }
0x1015   :  { %v2027_v26 = vpop.permute.xlu0 %2026  ;;  %v2025_v31 = vpop.permute.xlu1 %2024 }
0x1016   :  { %v2031_v34 = vadd.f32 %v2027_v26, %v5682_v58  ;;  %v2030_v35 = vadd.f32 %v2025_v31, %v5685_v61  ;;  %v4468_v31 = vld [vmem:[%s6604_s6 + $0xc0] sm:$0xff] }
0x1018   :  { %5253 = vtanh.f32 %v2031_v34 }
0x1019   :  { %5255 = vtanh.f32 %v2030_v35 }
0x1025   :  { %v5254_v37 = vpop.eup %5253 }
0x1026   :  { %v5256_v39 = vpop.eup %5255  ;;  %2040 = vrot.lane.b32.xlu0 %v5254_v37, %s5412_s24 }
0x1027   :  { %2038 = vrot.lane.b32.xlu1 %v5256_v39, %s5412_s24 }
0x1098   :  { %v2041_v43 = vpop.permute.xlu0 %2040 }
0x1099   :  { %v2045_v48 = vmul.f32 %v2041_v43, %v2035_v41  ;;  %v2039_v50 = vpop.permute.xlu1 %2038 }
0x109a   :  { %v2044_v52 = vmul.f32 %v2039_v50, %v2034_v45 }
0x109b   :  { %v5982_v54 = vadd.f32 %v2051_v47, %v2045_v48 }
0x109c   :  { %v5984_v55 = vadd.f32 %v2050_v51, %v2044_v52 }
0x109d   :  { %v2062_v56 = vrot.slane %v5982_v54, 4  ;;  %v2261_v35 = vrot.slane %v5982_v54, 7 }
0x109e   :  { %v2061_v57 = vrot.slane %v5984_v55, 5  ;;  %v2260_v44 = vrot.slane %v5984_v55, 7 }
0x10a0   :  { %v2063_v32 = vsel %vm997_vm1, %v2062_v56, %v2061_v57  ;;  %v6084_v56 = vld [vmem:[%s6603_s5] ss:$0 sm:$0xff] }
0x10a1   :  { %2064 = vrot.lane.b32.xlu1 %v2063_v32, %s5412_s24 }
0x1113   :  { %v2065_v59 = vpop.permute.xlu1 %2064 }
0x1114   :  { %4941 = vmatmul.mubr.msk.f32.vlgmr.msra.gmra.mxu1 %vm862_vm4, %v2065_v59  ;;  %4952 = vmatmul.mubr.msk.f32.vlgmr.msra.gmra.mxu0 %vm862_vm4, %v2065_v59 }
0x1115   :  { %4966 = vmatpush3.msra.mxu0 %v5995_v60  ;;  %4962 = vmatprep.mubr.msk.f32.mxu1 %vm5410_vm3, %v5409_v3 }
0x1116   :  { %4967 = vmatprep.subr.mxu0 %v5409_v3  ;;  %4973 = vmatprep.mubr.msk.f32.mxu0 %vm5410_vm3, %v5409_v3 }
0x1117   :  { %4968 = vmatpush3.msra.mxu0 %v6006_v63  ;;  %4955 = vmatpush3.msra.mxu1 %v4471_v28 }
0x1118   :  { %4969 = vmatprep.subr.mxu0 %v5409_v3  ;;  %4956 = vmatprep.subr.mxu1 %v5409_v3 }
0x1119   :  { %4970 = vmatpush3.msra.mxu0 %v6013_v0  ;;  %4957 = vmatpush3.msra.mxu1 %v4470_v29 }
0x111a   :  { %4971 = vmatprep.subr.mxu0 %v5409_v3  ;;  %4958 = vmatprep.subr.mxu1 %v5409_v3 }
0x111b   :  { %4972 = vmatpush3.msra.mxu0 %v6020_v1  ;;  %4959 = vmatpush3.msra.mxu1 %v4469_v30 }
0x111c   :  { %4987 = vmatprep.subr.mxu0 %v5409_v3  ;;  %4960 = vmatprep.subr.mxu1 %v5409_v3 }
0x111d   :  { %4961 = vmatpush3.msra.mxu1 %v4468_v31 }
0x111e   :  { %4976 = vmatprep.subr.mxu1 %v5409_v3 }
0x11d4   :  { %v2134_v2 = vpop.f32.mrf.mxu1  ;;  %v2205_v4 = vpop.f32.mrf.mxu0 }
0x11d5   :  { %v6025_v5 = vadd.f32 %v2134_v2, %v5951_v9  ;;  %v2206_v6 = vadd.f32 %v5675_v49, %v2205_v4 }
0x11d6   :  { %v4942_v62 = vpop.f32.mrf.mxu1  ;;  %v4953_v7 = vpop.f32.mrf.mxu0 }
0x11d7   :  { %v2210_v12 = vrot.slane %v2206_v6, 2  ;;  %v2211_v8 = vrot.slane %v2206_v6, 3 }
0x11d9   :  { %2230 = vrot.lane.b32.xlu1 %v2211_v8, %s5411_s3  ;;  %2228 = vrot.lane.b32.xlu0 %v2210_v12, %s5411_s3  ;;  %v2214_v10 = vadd.f32 %v2210_v12, %v5685_v61  ;;  %v2215_v11 = vadd.f32 %v2211_v8, %v5682_v58 }
0x11db   :  { %v4466_v13 = vmul.f32 -1.442695, %v2214_v10  ;;  %v4467_v33 = vmul.f32 -1.442695, %v2215_v11 }
0x11dd   :  { %5257 = vpow2.f32 %v4466_v13 }
0x11de   :  { %5259 = vpow2.f32 %v4467_v33 }
0x11ea   :  { %v5258_v9 = vpop.eup %5257 }
0x11eb   :  { %v5260_v14 = vpop.eup %5259  ;;  %v2222_v19 = vadd.f32 1.0, %v5258_v9 }
0x11ec   :  { %v2223_v49 = vadd.f32 1.0, %v5260_v14 }
0x11ed   :  { %5261 = vrcp.f32 %v2222_v19 }
0x11ee   :  { %5263 = vrcp.f32 %v2223_v49 }
0x11fa   :  { %v5262_v21 = vpop.eup %5261 }
0x11fb   :  { %v5264_v15 = vpop.eup %5263  ;;  %v2248_v37 = vsub.f32 1.0, %v5262_v21  ;;  %v2264_v41 = vmul.f32 %v5262_v21, %v2260_v44 }
0x11fc   :  { %v2249_v36 = vsub.f32 1.0, %v5264_v15  ;;  %v2265_v38 = vmul.f32 %v5264_v15, %v2261_v35 }
0x124b   :  { %v2231_v16 = vpop.permute.xlu1 %2230  ;;  %v2229_v17 = vpop.permute.xlu0 %2228 }
0x124c   :  { %v2235_v18 = vmul.f32 %v5264_v15, %v2231_v16  ;;  %v2234_v20 = vmul.f32 %v5262_v21, %v2229_v17 }
0x124e   :  { %2240 = vrot.lane.b32.xlu1 %v2235_v18, %s5411_s3  ;;  %2238 = vrot.lane.b32.xlu0 %v2234_v20, %s5411_s3  ;;  %v4479_v18 = vld [vmem:[%s6604_s6 + $0xf8] sm:$0xff]  ;;  %v4478_v20 = vld [vmem:[%s6604_s6 + $0xf0] sm:$0xff] }
0x12c0   :  { %v2241_v22 = vpop.permute.xlu1 %2240  ;;  %v2239_v23 = vpop.permute.xlu0 %2238 }
0x12c1   :  { %v2245_v24 = vadd.f32 %v2241_v22, %v5682_v58  ;;  %v2244_v27 = vadd.f32 %v2239_v23, %v5685_v61  ;;  %v4477_v22 = vld [vmem:[%s6604_s6 + $0xe8] sm:$0xff] }
0x12c3   :  { %5265 = vtanh.f32 %v2245_v24 }
0x12c4   :  { %5267 = vtanh.f32 %v2244_v27 }
0x12d0   :  { %v5266_v26 = vpop.eup %5265 }
0x12d1   :  { %v5268_v34 = vpop.eup %5267  ;;  %2254 = vrot.lane.b32.xlu1 %v5266_v26, %s5412_s24 }
0x12d2   :  { %2252 = vrot.lane.b32.xlu0 %v5268_v34, %s5412_s24 }
0x1343   :  { %v2255_v25 = vpop.permute.xlu1 %2254 }
0x1344   :  { %v2259_v39 = vmul.f32 %v2255_v25, %v2249_v36  ;;  %v2253_v40 = vpop.permute.xlu0 %2252 }
0x1345   :  { %v2258_v42 = vmul.f32 %v2253_v40, %v2248_v37 }
0x1346   :  { %v6056_v43 = vadd.f32 %v2265_v38, %v2259_v39 }
0x1347   :  { %v6058_v45 = vadd.f32 %v2264_v41, %v2258_v42 }
0x1348   :  { %v2276_v47 = vrot.slane %v6056_v43, 5  ;;  %v2475_v24 = vrot.slane %v6056_v43, 7 }
0x1349   :  { %v2275_v48 = vrot.slane %v6058_v45, 6  ;;  %v2474_v28 = vrot.slane %v6058_v45, 7 }
0x134b   :  { %v2277_v50 = vsel %vm997_vm1, %v2276_v47, %v2275_v48 }
0x134c   :  { %2278 = vrot.lane.b32.xlu0 %v2277_v50, %s5412_s24 }
0x13be   :  { %v2279_v51 = vpop.permute.xlu0 %2278 }
0x13bf   :  { %4963 = vmatmul.mubr.msk.f32.vlgmr.msra.gmra.mxu1 %vm862_vm4, %v2279_v51  ;;  %4974 = vmatmul.mubr.msk.f32.vlgmr.msra.gmra.mxu0 %vm862_vm4, %v2279_v51 }
0x13c0   :  { %4988 = vmatpush3.msra.mxu0 %v5995_v60  ;;  %4984 = vmatprep.mubr.msk.f32.mxu1 %vm5410_vm3, %v5409_v3 }
0x13c1   :  { %4989 = vmatprep.subr.mxu0 %v5409_v3  ;;  %4995 = vmatprep.mubr.msk.f32.mxu0 %vm5410_vm3, %v5409_v3 }
0x13c2   :  { %4990 = vmatpush3.msra.mxu0 %v6006_v63  ;;  %4977 = vmatpush3.msra.mxu1 %v4479_v18 }
0x13c3   :  { %4991 = vmatprep.subr.mxu0 %v5409_v3  ;;  %4978 = vmatprep.subr.mxu1 %v5409_v3 }
0x13c4   :  { %4992 = vmatpush3.msra.mxu0 %v6013_v0  ;;  %4979 = vmatpush3.msra.mxu1 %v4478_v20 }
0x13c5   :  { %4993 = vmatprep.subr.mxu0 %v5409_v3  ;;  %4980 = vmatprep.subr.mxu1 %v5409_v3 }
0x13c6   :  { %4994 = vmatpush3.msra.mxu0 %v6020_v1  ;;  %4981 = vmatpush3.msra.mxu1 %v4477_v22 }
0x13c7   :  { %5009 = vmatprep.subr.mxu0 %v5409_v3  ;;  %4982 = vmatprep.subr.mxu1 %v5409_v3 }
0x147f   :  { %v2348_v52 = vpop.f32.mrf.mxu1  ;;  %v2419_v54 = vpop.f32.mrf.mxu0 }
0x1480   :  { %v6079_v55 = vadd.f32 %v2348_v52, %v6025_v5  ;;  %v2420_v57 = vadd.f32 %v6084_v56, %v2419_v54 }
0x1481   :  { %v4964_v32 = vpop.f32.mrf.mxu1  ;;  %v4975_v59 = vpop.f32.mrf.mxu0 }
0x1482   :  { %v2424_v2 = vrot.slane %v2420_v57, 1  ;;  %v2425_v4 = vrot.slane %v2420_v57, 2 }
0x1484   :  { %2444 = vrot.lane.b32.xlu0 %v2425_v4, %s5411_s3  ;;  %2442 = vrot.lane.b32.xlu1 %v2424_v2, %s5411_s3  ;;  %v2428_v6 = vadd.f32 %v2424_v2, %v5685_v61  ;;  %v2429_v5 = vadd.f32 %v2425_v4, %v5682_v58 }
0x1486   :  { %v4474_v62 = vmul.f32 -1.442695, %v2428_v6  ;;  %v4475_v7 = vmul.f32 -1.442695, %v2429_v5 }
0x1488   :  { %5269 = vpow2.f32 %v4474_v62 }
0x1489   :  { %5271 = vpow2.f32 %v4475_v7 }
0x1495   :  { %v5270_v12 = vpop.eup %5269 }
0x1496   :  { %v5272_v8 = vpop.eup %5271  ;;  %v2436_v10 = vadd.f32 1.0, %v5270_v12 }
0x1497   :  { %v2437_v11 = vadd.f32 1.0, %v5272_v8 }
0x1498   :  { %5273 = vrcp.f32 %v2436_v10 }
0x1499   :  { %5275 = vrcp.f32 %v2437_v11 }
0x14a5   :  { %v5274_v13 = vpop.eup %5273 }
0x14a6   :  { %v5276_v33 = vpop.eup %5275  ;;  %v2462_v30 = vsub.f32 1.0, %v5274_v13  ;;  %v2478_v35 = vmul.f32 %v5274_v13, %v2474_v28 }
0x14a7   :  { %v2463_v27 = vsub.f32 1.0, %v5276_v33  ;;  %v2479_v26 = vmul.f32 %v5276_v33, %v2475_v24 }
0x14f6   :  { %v2445_v9 = vpop.permute.xlu0 %2444  ;;  %v2443_v14 = vpop.permute.xlu1 %2442 }
0x14f7   :  { %v2449_v19 = vmul.f32 %v5276_v33, %v2445_v9  ;;  %v2448_v49 = vmul.f32 %v5274_v13, %v2443_v14  ;;  %v4487_v33 = vld [vmem:[%s6604_s6 + $0x118] sm:$0xff]  ;;  %v4486_v9 = vld [vmem:[%s6604_s6 + $0x110] sm:$0xff]  ;;  %v4485_v14 = vld [vmem:[%s6604_s6 + $0x108] sm:$0xff] }
0x14f9   :  { %2454 = vrot.lane.b32.xlu0 %v2449_v19, %s5411_s3  ;;  %2452 = vrot.lane.b32.xlu1 %v2448_v49, %s5411_s3  ;;  %v4484_v49 = vld [vmem:[%s6604_s6 + $0x100] sm:$0xff] }
0x156b   :  { %v2455_v21 = vpop.permute.xlu0 %2454  ;;  %v2453_v15 = vpop.permute.xlu1 %2452 }
0x156c   :  { %v2459_v16 = vadd.f32 %v2455_v21, %v5682_v58  ;;  %v2458_v17 = vadd.f32 %v2453_v15, %v5685_v61  ;;  %v4476_v61 = vld [vmem:[%s6604_s6 + $0xe0] sm:$0xff] }
0x156d   :  { %4983 = vmatpush3.msra.mxu1 %v4476_v61 }
0x156e   :  { %5277 = vtanh.f32 %v2459_v16  ;;  %4998 = vmatprep.subr.mxu1 %v5409_v3 }
0x156f   :  { %5279 = vtanh.f32 %v2458_v17 }
0x157b   :  { %v5278_v58 = vpop.eup %5277 }
0x157c   :  { %v5280_v23 = vpop.eup %5279  ;;  %2468 = vrot.lane.b32.xlu0 %v5278_v58, %s5412_s24 }
0x157d   :  { %2466 = vrot.lane.b32.xlu1 %v5280_v23, %s5412_s24 }
0x15ee   :  { %v2469_v29 = vpop.permute.xlu0 %2468 }
0x15ef   :  { %v2473_v31 = vmul.f32 %v2469_v29, %v2463_v27  ;;  %v2467_v34 = vpop.permute.xlu1 %2466 }
0x15f0   :  { %v2472_v36 = vmul.f32 %v2467_v34, %v2462_v30 }
0x15f1   :  { %v6115_v44 = vadd.f32 %v2479_v26, %v2473_v31 }
0x15f2   :  { %v6117_v25 = vadd.f32 %v2478_v35, %v2472_v36 }
0x15f3   :  { %v2490_v37 = vrot.slane %v6115_v44, 6  ;;  %v2687_v16 = vrot.slane %v6115_v44, 7 }
0x15f4   :  { %v2489_v38 = vrot.slane %v6117_v25, 7 }
0x15f6   :  { %v2491_v39 = vsel %vm997_vm1, %v2490_v37, %v2489_v38 }
0x15f7   :  { %2492 = vrot.lane.b32.xlu1 %v2491_v39, %s5412_s24 }
0x1669   :  { %v2493_v40 = vpop.permute.xlu1 %2492 }
0x166a   :  { %4985 = vmatmul.mubr.msk.f32.vlgmr.msra.gmra.mxu1 %vm862_vm4, %v2493_v40  ;;  %4996 = vmatmul.mubr.msk.f32.vlgmr.msra.gmra.mxu0 %vm862_vm4, %v2493_v40 }
0x166b   :  { %5010 = vmatpush3.msra.mxu0 %v5995_v60  ;;  %5006 = vmatprep.mubr.msk.f32.mxu1 %vm5410_vm3, %v5409_v3 }
0x166c   :  { %5011 = vmatprep.subr.mxu0 %v5409_v3  ;;  %5017 = vmatprep.mubr.msk.f32.mxu0 %vm5410_vm3, %v5409_v3 }
0x166d   :  { %5012 = vmatpush3.msra.mxu0 %v6006_v63  ;;  %4999 = vmatpush3.msra.mxu1 %v4487_v33 }
0x166e   :  { %5013 = vmatprep.subr.mxu0 %v5409_v3  ;;  %5000 = vmatprep.subr.mxu1 %v5409_v3 }
0x166f   :  { %5014 = vmatpush3.msra.mxu0 %v6013_v0  ;;  %5001 = vmatpush3.msra.mxu1 %v4486_v9 }
0x1670   :  { %5015 = vmatprep.subr.mxu0 %v5409_v3  ;;  %5002 = vmatprep.subr.mxu1 %v5409_v3 }
0x1671   :  { %5016 = vmatpush3.msra.mxu0 %v6020_v1  ;;  %5003 = vmatpush3.msra.mxu1 %v4485_v14 }
0x1672   :  { %5031 = vmatprep.subr.mxu0 %v5409_v3  ;;  %5004 = vmatprep.subr.mxu1 %v5409_v3 }
0x1673   :  { %5005 = vmatpush3.msra.mxu1 %v4484_v49 }
0x1674   :  { %5020 = vmatprep.subr.mxu1 %v5409_v3 }
0x172a   :  { %v2562_v41 = vpop.f32.mrf.mxu1  ;;  %v2633_v42 = vpop.f32.mrf.mxu0 }
0x172b   :  { %v6140_v43 = vadd.f32 %v2562_v41, %v6079_v55  ;;  %v2634_v45 = vadd.f32 %v6084_v56, %v2633_v42 }
0x172c   :  { %v4986_v47 = vpop.f32.mrf.mxu1  ;;  %v4997_v48 = vpop.f32.mrf.mxu0 }
0x172d   :  { %2655 = vrot.lane.b32.xlu1 %v2634_v45, %s5411_s3  ;;  %v2638_v50 = vrot.slane %v2634_v45, 1  ;;  %v2641_v51 = vadd.f32 %v2634_v45, %v5670_v46 }
0x172f   :  { %2657 = vrot.lane.b32.xlu0 %v2638_v50, %s5411_s3  ;;  %v2642_v52 = vadd.f32 %v2638_v50, %v5677_v53  ;;  %v4482_v54 = vmul.f32 -1.442695, %v2641_v51 }
0x1731   :  { %v4483_v57 = vmul.f32 -1.442695, %v2642_v52  ;;  %5281 = vpow2.f32 %v4482_v54 }
0x1733   :  { %5283 = vpow2.f32 %v4483_v57 }
0x173e   :  { %v5282_v32 = vpop.eup %5281 }
0x173f   :  { %v2649_v59 = vadd.f32 1.0, %v5282_v32 }
0x1740   :  { %v5284_v55 = vpop.eup %5283 }
0x1741   :  { %v2650_v2 = vadd.f32 1.0, %v5284_v55  ;;  %5285 = vrcp.f32 %v2649_v59 }
0x1743   :  { %5287 = vrcp.f32 %v2650_v2  ;;  %v4495_v2 = vld [vmem:[%s6604_s6 + $0x138] sm:$0xff] }
0x174e   :  { %v5286_v4 = vpop.eup %5285 }
0x174f   :  { %v2675_v17 = vsub.f32 1.0, %v5286_v4  ;;  %v2690_v23 = vmul.f32 %v5286_v4, %v2489_v38 }
0x1750   :  { %v5288_v62 = vpop.eup %5287 }
0x1751   :  { %v2676_v18 = vsub.f32 1.0, %v5288_v62  ;;  %v2691_v58 = vmul.f32 %v5288_v62, %v2687_v16 }
0x179f   :  { %v2656_v6 = vpop.permute.xlu1 %2655 }
0x17a0   :  { %v2661_v5 = vmul.f32 %v5286_v4, %v2656_v6  ;;  %v4494_v4 = vld [vmem:[%s6604_s6 + $0x130] sm:$0xff]  ;;  %v4493_v6 = vld [vmem:[%s6604_s6 + $0x128] sm:$0xff] }
0x17a1   :  { %v2658_v7 = vpop.permute.xlu0 %2657 }
0x17a2   :  { %v2662_v12 = vmul.f32 %v5288_v62, %v2658_v7  ;;  %2665 = vrot.lane.b32.xlu1 %v2661_v5, %s5411_s3  ;;  %v4492_v62 = vld [vmem:[%s6604_s6 + $0x120] sm:$0xff] }
0x17a4   :  { %2667 = vrot.lane.b32.xlu0 %v2662_v12, %s5411_s3 }
0x1814   :  { %v2666_v8 = vpop.permute.xlu1 %2665 }
0x1815   :  { %v2671_v10 = vadd.f32 %v2666_v8, %v5670_v46 }
0x1816   :  { %v2668_v11 = vpop.permute.xlu0 %2667 }
0x1817   :  { %5289 = vtanh.f32 %v2671_v10  ;;  %v2672_v13 = vadd.f32 %v2668_v11, %v5677_v53 }
0x1819   :  { %5291 = vtanh.f32 %v2672_v13 }
0x1824   :  { %v5290_v19 = vpop.eup %5289 }
0x1825   :  { %2679 = vrot.lane.b32.xlu1 %v5290_v19, %s5412_s24 }
0x1826   :  { %v5292_v21 = vpop.eup %5291 }
0x1827   :  { %2681 = vrot.lane.b32.xlu0 %v5292_v21, %s5412_s24 }
0x1897   :  { %v2680_v15 = vpop.permute.xlu1 %2679 }
0x1898   :  { %v2685_v22 = vmul.f32 %v2680_v15, %v2675_v17 }
0x1899   :  { %v2682_v20 = vpop.permute.xlu0 %2681 }
0x189a   :  { %v2686_v61 = vmul.f32 %v2682_v20, %v2676_v18  ;;  %v6174_v27 = vadd.f32 %v2690_v23, %v2685_v22 }
0x189c   :  { %v6172_v24 = vadd.f32 %v2691_v58, %v2686_v61  ;;  %v2898_v8 = vrot.slane %v6174_v27, 7 }
0x189e   :  { %v2701_v28 = vrot.slane %v6172_v24, 7 }
0x18a0   :  { %v2702_v29 = vsel %vm997_vm1, %v2701_v28, %v6174_v27 }
0x18a1   :  { %2703 = vrot.lane.b32.xlu0 %v2702_v29, %s5412_s24 }
0x1913   :  { %v2704_v30 = vpop.permute.xlu0 %2703 }
0x1914   :  { %5007 = vmatmul.mubr.msk.f32.vlgmr.msra.gmra.mxu1 %vm862_vm4, %v2704_v30  ;;  %5018 = vmatmul.mubr.msk.f32.vlgmr.msra.gmra.mxu0 %vm862_vm4, %v2704_v30 }
0x1915   :  { %5032 = vmatpush3.msra.mxu0 %v5995_v60  ;;  %5028 = vmatprep.mubr.msk.f32.mxu1 %vm5410_vm3, %v5409_v3 }
0x1916   :  { %5033 = vmatprep.subr.mxu0 %v5409_v3  ;;  %5039 = vmatprep.mubr.msk.f32.mxu0 %vm5410_vm3, %v5409_v3 }
0x1917   :  { %5034 = vmatpush3.msra.mxu0 %v6006_v63  ;;  %5021 = vmatpush3.msra.mxu1 %v4495_v2 }
0x1918   :  { %5035 = vmatprep.subr.mxu0 %v5409_v3  ;;  %5022 = vmatprep.subr.mxu1 %v5409_v3 }
0x1919   :  { %5036 = vmatpush3.msra.mxu0 %v6013_v0  ;;  %5023 = vmatpush3.msra.mxu1 %v4494_v4 }
0x191a   :  { %5037 = vmatprep.subr.mxu0 %v5409_v3  ;;  %5024 = vmatprep.subr.mxu1 %v5409_v3 }
0x191b   :  { %5038 = vmatpush3.msra.mxu0 %v6020_v1  ;;  %5025 = vmatpush3.msra.mxu1 %v4493_v6 }
0x191c   :  { %5053 = vmatprep.subr.mxu0 %v5409_v3  ;;  %5026 = vmatprep.subr.mxu1 %v5409_v3 }
0x191d   :  { %5027 = vmatpush3.msra.mxu1 %v4492_v62 }
0x191e   :  { %5042 = vmatprep.subr.mxu1 %v5409_v3 }
0x19d4   :  { %v2773_v26 = vpop.f32.mrf.mxu1  ;;  %v2844_v31 = vpop.f32.mrf.mxu0 }
0x19d5   :  { %v6197_v34 = vadd.f32 %v2773_v26, %v6140_v43  ;;  %v2845_v35 = vadd.f32 %v6084_v56, %v2844_v31 }
0x19d6   :  { %v5008_v36 = vpop.f32.mrf.mxu1  ;;  %v5019_v44 = vpop.f32.mrf.mxu0 }
0x19d7   :  { %2868 = vrot.lane.b32.xlu0 %v2845_v35, %s5411_s3  ;;  %v2849_v25 = vrot.slane %v2845_v35, 7  ;;  %v2853_v37 = vadd.f32 %v2845_v35, %v5677_v53 }
0x19d9   :  { %2866 = vrot.lane.b32.xlu1 %v2849_v25, %s5411_s3  ;;  %v2852_v38 = vadd.f32 %v2849_v25, %v5670_v46  ;;  %v4491_v39 = vmul.f32 -1.442695, %v2853_v37 }
0x19db   :  { %v4490_v40 = vmul.f32 -1.442695, %v2852_v38  ;;  %5293 = vpow2.f32 %v4491_v39 }
0x19dd   :  { %5295 = vpow2.f32 %v4490_v40 }
0x19e8   :  { %v5294_v41 = vpop.eup %5293 }
0x19e9   :  { %v2861_v43 = vadd.f32 1.0, %v5294_v41 }
0x19ea   :  { %v5296_v42 = vpop.eup %5295 }
0x19eb   :  { %v2860_v45 = vadd.f32 1.0, %v5296_v42  ;;  %5297 = vrcp.f32 %v2861_v43 }
0x19ed   :  { %5299 = vrcp.f32 %v2860_v45 }
0x19f8   :  { %v5298_v47 = vpop.eup %5297 }
0x19f9   :  { %v2887_v10 = vsub.f32 1.0, %v5298_v47  ;;  %v2902_v19 = vmul.f32 %v5298_v47, %v2701_v28 }
0x19fa   :  { %v5300_v51 = vpop.eup %5299 }
0x19fb   :  { %v2886_v11 = vsub.f32 1.0, %v5300_v51  ;;  %v2901_v9 = vmul.f32 %v5300_v51, %v2898_v8 }
0x1a49   :  { %v2869_v48 = vpop.permute.xlu0 %2868 }
0x1a4a   :  { %v2873_v50 = vmul.f32 %v5298_v47, %v2869_v48  ;;  %v4503_v47 = vld [vmem:[%s6604_s6 + $0x158] sm:$0xff]  ;;  %v4502_v48 = vld [vmem:[%s6604_s6 + $0x150] sm:$0xff] }
0x1a4b   :  { %v2867_v52 = vpop.permute.xlu1 %2866 }
0x1a4c   :  { %v2872_v54 = vmul.f32 %v5300_v51, %v2867_v52  ;;  %2878 = vrot.lane.b32.xlu0 %v2873_v50, %s5411_s3  ;;  %v4501_v50 = vld [vmem:[%s6604_s6 + $0x148] sm:$0xff]  ;;  %v4500_v52 = vld [vmem:[%s6604_s6 + $0x140] sm:$0xff] }
0x1a4e   :  { %2876 = vrot.lane.b32.xlu1 %v2872_v54, %s5411_s3 }
0x1abe   :  { %v2879_v57 = vpop.permute.xlu0 %2878 }
0x1abf   :  { %v2883_v32 = vadd.f32 %v2879_v57, %v5677_v53 }
0x1ac0   :  { %v2877_v55 = vpop.permute.xlu1 %2876 }
0x1ac1   :  { %5301 = vtanh.f32 %v2883_v32  ;;  %v2882_v59 = vadd.f32 %v2877_v55, %v5670_v46 }
0x1ac3   :  { %5303 = vtanh.f32 %v2882_v59 }
0x1ace   :  { %v5302_v5 = vpop.eup %5301 }
0x1acf   :  { %2892 = vrot.lane.b32.xlu0 %v5302_v5, %s5412_s24 }
0x1ad0   :  { %v5304_v7 = vpop.eup %5303 }
0x1ad1   :  { %2890 = vrot.lane.b32.xlu1 %v5304_v7, %s5412_s24 }
0x1b41   :  { %v2893_v12 = vpop.permute.xlu0 %2892 }
0x1b42   :  { %v2897_v33 = vmul.f32 %v2893_v12, %v2887_v10 }
0x1b43   :  { %v2891_v13 = vpop.permute.xlu1 %2890 }
0x1b44   :  { %v2896_v14 = vmul.f32 %v2891_v13, %v2886_v11  ;;  %v6231_v21 = vadd.f32 %v2902_v19, %v2897_v33 }
0x1b46   :  { %v6229_v49 = vadd.f32 %v2901_v9, %v2896_v14  ;;  %v3111_v57 = vrot.slane %v6231_v21, 7 }
0x1b48   :  { %v2912_v15 = vrot.slane %v6229_v49, 1  ;;  %v3110_v55 = vrot.slane %v6229_v49, 7 }
0x1b4a   :  { %v2913_v16 = vsel %vm997_vm1, %v6231_v21, %v2912_v15 }
0x1b4b   :  { %2914 = vrot.lane.b32.xlu1 %v2913_v16, %s5412_s24 }
0x1bbd   :  { %v2915_v17 = vpop.permute.xlu1 %2914 }
0x1bbe   :  { %5029 = vmatmul.mubr.msk.f32.vlgmr.msra.gmra.mxu1 %vm862_vm4, %v2915_v17  ;;  %5040 = vmatmul.mubr.msk.f32.vlgmr.msra.gmra.mxu0 %vm862_vm4, %v2915_v17 }
0x1bbf   :  { %5054 = vmatpush3.msra.mxu0 %v5995_v60  ;;  %5050 = vmatprep.mubr.msk.f32.mxu1 %vm5410_vm3, %v5409_v3 }
0x1bc0   :  { %5055 = vmatprep.subr.mxu0 %v5409_v3  ;;  %5061 = vmatprep.mubr.msk.f32.mxu0 %vm5410_vm3, %v5409_v3 }
0x1bc1   :  { %5056 = vmatpush3.msra.mxu0 %v6006_v63  ;;  %5043 = vmatpush3.msra.mxu1 %v4503_v47 }
0x1bc2   :  { %5057 = vmatprep.subr.mxu0 %v5409_v3  ;;  %5044 = vmatprep.subr.mxu1 %v5409_v3 }
0x1bc3   :  { %5058 = vmatpush3.msra.mxu0 %v6013_v0  ;;  %5045 = vmatpush3.msra.mxu1 %v4502_v48 }
0x1bc4   :  { %5059 = vmatprep.subr.mxu0 %v5409_v3  ;;  %5046 = vmatprep.subr.mxu1 %v5409_v3 }
0x1bc5   :  { %5060 = vmatpush3.msra.mxu0 %v6020_v1  ;;  %5047 = vmatpush3.msra.mxu1 %v4501_v50 }
0x1bc6   :  { %5075 = vmatprep.subr.mxu0 %v5409_v3  ;;  %5048 = vmatprep.subr.mxu1 %v5409_v3 }
0x1bc7   :  { %5049 = vmatpush3.msra.mxu1 %v4500_v52 }
0x1bc8   :  { %5064 = vmatprep.subr.mxu1 %v5409_v3 }
0x1c7e   :  { %v2984_v18 = vpop.f32.mrf.mxu1  ;;  %v3055_v20 = vpop.f32.mrf.mxu0 }
0x1c7f   :  { %v6252_v22 = vadd.f32 %v2984_v18, %v6197_v34  ;;  %v3056_v58 = vadd.f32 %v6084_v56, %v3055_v20 }
0x1c80   :  { %v5030_v61 = vpop.f32.mrf.mxu1  ;;  %v5041_v23 = vpop.f32.mrf.mxu0 }
0x1c81   :  { %v3060_v24 = vrot.slane %v3056_v58, 6  ;;  %v3061_v27 = vrot.slane %v3056_v58, 7 }
0x1c83   :  { %3080 = vrot.lane.b32.xlu1 %v3061_v27, %s5411_s3  ;;  %3078 = vrot.lane.b32.xlu0 %v3060_v24, %s5411_s3  ;;  %v3064_v28 = vadd.f32 %v3060_v24, %v5670_v46  ;;  %v3065_v29 = vadd.f32 %v3061_v27, %v5677_v53 }
0x1c85   :  { %v4498_v30 = vmul.f32 -1.442695, %v3064_v28  ;;  %v4499_v26 = vmul.f32 -1.442695, %v3065_v29 }
0x1c87   :  { %5305 = vpow2.f32 %v4498_v30 }
0x1c88   :  { %5307 = vpow2.f32 %v4499_v26 }
0x1c94   :  { %v5306_v31 = vpop.eup %5305 }
0x1c95   :  { %v5308_v34 = vpop.eup %5307  ;;  %v3072_v35 = vadd.f32 1.0, %v5306_v31 }
0x1c96   :  { %v3073_v36 = vadd.f32 1.0, %v5308_v34 }
0x1c97   :  { %5309 = vrcp.f32 %v3072_v35 }
0x1c98   :  { %5311 = vrcp.f32 %v3073_v36 }
0x1ca4   :  { %v5310_v44 = vpop.eup %5309 }
0x1ca5   :  { %v5312_v25 = vpop.eup %5311  ;;  %v3098_v2 = vsub.f32 1.0, %v5310_v44  ;;  %v3114_v62 = vmul.f32 %v5310_v44, %v3110_v55 }
0x1ca6   :  { %v3099_v32 = vsub.f32 1.0, %v5312_v25  ;;  %v3115_v4 = vmul.f32 %v5312_v25, %v3111_v57 }
0x1cf5   :  { %v3081_v37 = vpop.permute.xlu1 %3080  ;;  %v3079_v38 = vpop.permute.xlu0 %3078 }
0x1cf6   :  { %v3085_v39 = vmul.f32 %v5312_v25, %v3081_v37  ;;  %v3084_v40 = vmul.f32 %v5310_v44, %v3079_v38  ;;  %v4511_v37 = vld [vmem:[%s6604_s6 + $0x178] sm:$0xff]  ;;  %v4510_v38 = vld [vmem:[%s6604_s6 + $0x170] sm:$0xff] }
0x1cf8   :  { %3090 = vrot.lane.b32.xlu1 %v3085_v39, %s5411_s3  ;;  %3088 = vrot.lane.b32.xlu0 %v3084_v40, %s5411_s3  ;;  %v4509_v39 = vld [vmem:[%s6604_s6 + $0x168] sm:$0xff] }
0x1d6a   :  { %v3091_v41 = vpop.permute.xlu1 %3090  ;;  %v3089_v42 = vpop.permute.xlu0 %3088 }
0x1d6b   :  { %v3095_v43 = vadd.f32 %v3091_v41, %v5677_v53  ;;  %v3094_v45 = vadd.f32 %v3089_v42, %v5670_v46  ;;  %v4508_v41 = vld [vmem:[%s6604_s6 + $0x160] sm:$0xff] }
0x1d6d   :  { %5313 = vtanh.f32 %v3095_v43 }
0x1d6e   :  { %5315 = vtanh.f32 %v3094_v45 }
0x1d7a   :  { %v5314_v51 = vpop.eup %5313 }
0x1d7b   :  { %v5316_v54 = vpop.eup %5315  ;;  %3104 = vrot.lane.b32.xlu1 %v5314_v51, %s5412_s24 }
0x1d7c   :  { %3102 = vrot.lane.b32.xlu0 %v5316_v54, %s5412_s24 }
0x1ded   :  { %v3105_v59 = vpop.permute.xlu1 %3104 }
0x1dee   :  { %v3109_v6 = vmul.f32 %v3105_v59, %v3099_v32  ;;  %v3103_v5 = vpop.permute.xlu0 %3102 }
0x1def   :  { %v3108_v7 = vmul.f32 %v3103_v5, %v3098_v2 }
0x1df0   :  { %v6283_v12 = vadd.f32 %v3115_v4, %v3109_v6 }
0x1df1   :  { %v6285_v8 = vadd.f32 %v3114_v62, %v3108_v7 }
0x1df2   :  { %v3126_v10 = vrot.slane %v6283_v12, 1  ;;  %v3325_v43 = vrot.slane %v6283_v12, 7 }
0x1df3   :  { %v3125_v11 = vrot.slane %v6285_v8, 2  ;;  %v3324_v47 = vrot.slane %v6285_v8, 7 }
0x1df5   :  { %v3127_v13 = vsel %vm997_vm1, %v3126_v10, %v3125_v11 }
0x1df6   :  { %3128 = vrot.lane.b32.xlu0 %v3127_v13, %s5412_s24 }
0x1e68   :  { %v3129_v33 = vpop.permute.xlu0 %3128 }
0x1e69   :  { %5051 = vmatmul.mubr.msk.f32.vlgmr.msra.gmra.mxu1 %vm862_vm4, %v3129_v33  ;;  %5062 = vmatmul.mubr.msk.f32.vlgmr.msra.gmra.mxu0 %vm862_vm4, %v3129_v33 }
0x1e6a   :  { %5076 = vmatpush3.msra.mxu0 %v5995_v60  ;;  %5072 = vmatprep.mubr.msk.f32.mxu1 %vm5410_vm3, %v5409_v3 }
0x1e6b   :  { %5077 = vmatprep.subr.mxu0 %v5409_v3  ;;  %5083 = vmatprep.mubr.msk.f32.mxu0 %vm5410_vm3, %v5409_v3 }
0x1e6c   :  { %5078 = vmatpush3.msra.mxu0 %v6006_v63  ;;  %5065 = vmatpush3.msra.mxu1 %v4511_v37 }
0x1e6d   :  { %5079 = vmatprep.subr.mxu0 %v5409_v3  ;;  %5066 = vmatprep.subr.mxu1 %v5409_v3 }
0x1e6e   :  { %5080 = vmatpush3.msra.mxu0 %v6013_v0  ;;  %5067 = vmatpush3.msra.mxu1 %v4510_v38 }
0x1e6f   :  { %5081 = vmatprep.subr.mxu0 %v5409_v3  ;;  %5068 = vmatprep.subr.mxu1 %v5409_v3 }
0x1e70   :  { %5082 = vmatpush3.msra.mxu0 %v6020_v1  ;;  %5069 = vmatpush3.msra.mxu1 %v4509_v39 }
0x1e71   :  { %5097 = vmatprep.subr.mxu0 %v5409_v3  ;;  %5070 = vmatprep.subr.mxu1 %v5409_v3 }
0x1e72   :  { %5071 = vmatpush3.msra.mxu1 %v4508_v41 }
0x1e73   :  { %5086 = vmatprep.subr.mxu1 %v5409_v3 }
0x1f29   :  { %v3198_v9 = vpop.f32.mrf.mxu1  ;;  %v3269_v14 = vpop.f32.mrf.mxu0 }
0x1f2a   :  { %v6306_v19 = vadd.f32 %v3198_v9, %v6252_v22  ;;  %v3270_v49 = vadd.f32 %v6084_v56, %v3269_v14 }
0x1f2b   :  { %v5052_v21 = vpop.f32.mrf.mxu1  ;;  %v5063_v15 = vpop.f32.mrf.mxu0 }
0x1f2c   :  { %v3274_v16 = vrot.slane %v3270_v49, 5  ;;  %v3275_v17 = vrot.slane %v3270_v49, 6 }
0x1f2e   :  { %3294 = vrot.lane.b32.xlu0 %v3275_v17, %s5411_s3  ;;  %3292 = vrot.lane.b32.xlu1 %v3274_v16, %s5411_s3  ;;  %v3278_v18 = vadd.f32 %v3274_v16, %v5670_v46  ;;  %v3279_v20 = vadd.f32 %v3275_v17, %v5677_v53 }
0x1f30   :  { %v4506_v58 = vmul.f32 -1.442695, %v3278_v18  ;;  %v4507_v61 = vmul.f32 -1.442695, %v3279_v20 }
0x1f32   :  { %5317 = vpow2.f32 %v4506_v58 }
0x1f33   :  { %5319 = vpow2.f32 %v4507_v61 }
0x1f3f   :  { %v5318_v22 = vpop.eup %5317 }
0x1f40   :  { %v5320_v23 = vpop.eup %5319  ;;  %v3286_v24 = vadd.f32 1.0, %v5318_v22 }
0x1f41   :  { %v3287_v27 = vadd.f32 1.0, %v5320_v23 }
0x1f42   :  { %5321 = vrcp.f32 %v3286_v24  ;;  %v4519_v24 = vld [vmem:[%s6604_s6 + $0x198] sm:$0xff] }
0x1f43   :  { %5323 = vrcp.f32 %v3287_v27  ;;  %v4518_v27 = vld [vmem:[%s6604_s6 + $0x190] sm:$0xff] }
0x1f4f   :  { %v5322_v28 = vpop.eup %5321 }
0x1f50   :  { %v5324_v29 = vpop.eup %5323  ;;  %v3312_v50 = vsub.f32 1.0, %v5322_v28  ;;  %v3328_v57 = vmul.f32 %v5322_v28, %v3324_v47 }
0x1f51   :  { %v3313_v45 = vsub.f32 1.0, %v5324_v29  ;;  %v3329_v51 = vmul.f32 %v5324_v29, %v3325_v43 }
0x1fa0   :  { %v3295_v30 = vpop.permute.xlu0 %3294  ;;  %v3293_v26 = vpop.permute.xlu1 %3292 }
0x1fa1   :  { %v3299_v31 = vmul.f32 %v5324_v29, %v3295_v30  ;;  %v3298_v34 = vmul.f32 %v5322_v28, %v3293_v26  ;;  %v4517_v28 = vld [vmem:[%s6604_s6 + $0x188] sm:$0xff]  ;;  %v4516_v30 = vld [vmem:[%s6604_s6 + $0x180] sm:$0xff] }
0x1fa3   :  { %3304 = vrot.lane.b32.xlu0 %v3299_v31, %s5411_s3  ;;  %3302 = vrot.lane.b32.xlu1 %v3298_v34, %s5411_s3 }
0x2015   :  { %v3305_v35 = vpop.permute.xlu0 %3304  ;;  %v3303_v36 = vpop.permute.xlu1 %3302 }
0x2016   :  { %v3309_v44 = vadd.f32 %v3305_v35, %v5677_v53  ;;  %v3308_v25 = vadd.f32 %v3303_v36, %v5670_v46 }
0x2018   :  { %5325 = vtanh.f32 %v3309_v44 }
0x2019   :  { %5327 = vtanh.f32 %v3308_v25 }
0x2025   :  { %v5326_v40 = vpop.eup %5325 }
0x2026   :  { %v5328_v42 = vpop.eup %5327  ;;  %3318 = vrot.lane.b32.xlu0 %v5326_v40, %s5412_s24 }
0x2027   :  { %3316 = vrot.lane.b32.xlu1 %v5328_v42, %s5412_s24 }
0x2098   :  { %v3319_v48 = vpop.permute.xlu0 %3318 }
0x2099   :  { %v3323_v52 = vmul.f32 %v3319_v48, %v3313_v45  ;;  %v3317_v54 = vpop.permute.xlu1 %3316 }
0x209a   :  { %v3322_v32 = vmul.f32 %v3317_v54, %v3312_v50  ;;  %v6404_v50 = vld [vmem:[%s6602_s4 + $0x18] sm:$0xff]  ;;  %v6429_v54 = vld [vmem:[%s6602_s4] sm:$0xff] }
0x209b   :  { %v6337_v55 = vadd.f32 %v3329_v51, %v3323_v52  ;;  %v6415_v51 = vld [vmem:[%s6602_s4 + $0x10] sm:$0xff]  ;;  %v6422_v52 = vld [vmem:[%s6602_s4 + $0x8] sm:$0xff] }
0x209c   :  { %v6339_v59 = vadd.f32 %v3328_v57, %v3322_v32 }
0x209d   :  { %v3340_v2 = vrot.slane %v6337_v55, 2  ;;  %v3539_v31 = vrot.slane %v6337_v55, 7 }
0x209e   :  { %v3339_v4 = vrot.slane %v6339_v59, 3  ;;  %v3538_v35 = vrot.slane %v6339_v59, 7 }
0x20a0   :  { %v3341_v6 = vsel %vm997_vm1, %v3340_v2, %v3339_v4 }
0x20a1   :  { %3342 = vrot.lane.b32.xlu1 %v3341_v6, %s5412_s24 }
0x2113   :  { %v3343_v5 = vpop.permute.xlu1 %3342 }
0x2114   :  { %5073 = vmatmul.mubr.msk.f32.vlgmr.msra.gmra.mxu1 %vm862_vm4, %v3343_v5  ;;  %5084 = vmatmul.mubr.msk.f32.vlgmr.msra.gmra.mxu0 %vm862_vm4, %v3343_v5 }
0x2115   :  { %5098 = vmatpush3.msra.mxu0 %v5995_v60  ;;  %5094 = vmatprep.mubr.msk.f32.mxu1 %vm5410_vm3, %v5409_v3 }
0x2116   :  { %5099 = vmatprep.subr.mxu0 %v5409_v3  ;;  %5105 = vmatprep.mubr.msk.f32.mxu0 %vm5410_vm3, %v5409_v3 }
0x2117   :  { %5100 = vmatpush3.msra.mxu0 %v6006_v63  ;;  %5087 = vmatpush3.msra.mxu1 %v4519_v24 }
0x2118   :  { %5101 = vmatprep.subr.mxu0 %v5409_v3  ;;  %5088 = vmatprep.subr.mxu1 %v5409_v3 }
0x2119   :  { %5102 = vmatpush3.msra.mxu0 %v6013_v0  ;;  %5089 = vmatpush3.msra.mxu1 %v4518_v27 }
0x211a   :  { %5103 = vmatprep.subr.mxu0 %v5409_v3  ;;  %5090 = vmatprep.subr.mxu1 %v5409_v3 }
0x211b   :  { %5104 = vmatpush3.msra.mxu0 %v6020_v1  ;;  %5091 = vmatpush3.msra.mxu1 %v4517_v28 }
0x211c   :  { %5119 = vmatprep.subr.mxu0 %v5409_v3  ;;  %5092 = vmatprep.subr.mxu1 %v5409_v3 }
0x211d   :  { %5093 = vmatpush3.msra.mxu1 %v4516_v30 }
0x211e   :  { %5108 = vmatprep.subr.mxu1 %v5409_v3 }
0x21d4   :  { %v3412_v60 = vpop.f32.mrf.mxu1  ;;  %v3483_v62 = vpop.f32.mrf.mxu0 }
0x21d5   :  { %v6360_v7 = vadd.f32 %v3412_v60, %v6306_v19  ;;  %v3484_v12 = vadd.f32 %v6084_v56, %v3483_v62 }
0x21d6   :  { %v5074_v8 = vpop.f32.mrf.mxu1  ;;  %v5085_v10 = vpop.f32.mrf.mxu0 }
0x21d7   :  { %v3488_v63 = vrot.slane %v3484_v12, 4  ;;  %v3489_v11 = vrot.slane %v3484_v12, 5 }
0x21d9   :  { %3508 = vrot.lane.b32.xlu1 %v3489_v11, %s5411_s3  ;;  %3506 = vrot.lane.b32.xlu0 %v3488_v63, %s5411_s3  ;;  %v3492_v0 = vadd.f32 %v3488_v63, %v5670_v46  ;;  %v3493_v1 = vadd.f32 %v3489_v11, %v5677_v53 }
0x21db   :  { %v4514_v13 = vmul.f32 -1.442695, %v3492_v0  ;;  %v4515_v33 = vmul.f32 -1.442695, %v3493_v1 }
0x21dd   :  { %5329 = vpow2.f32 %v4514_v13 }
0x21de   :  { %5331 = vpow2.f32 %v4515_v33 }
0x21ea   :  { %v5330_v9 = vpop.eup %5329 }
0x21eb   :  { %v5332_v14 = vpop.eup %5331  ;;  %v3500_v19 = vadd.f32 1.0, %v5330_v9 }
0x21ec   :  { %v3501_v49 = vadd.f32 1.0, %v5332_v14 }
0x21ed   :  { %5333 = vrcp.f32 %v3500_v19 }
0x21ee   :  { %5335 = vrcp.f32 %v3501_v49 }
0x21fa   :  { %v5334_v21 = vpop.eup %5333 }
0x21fb   :  { %v5336_v15 = vpop.eup %5335  ;;  %v3526_v44 = vsub.f32 1.0, %v5334_v21  ;;  %v3542_v39 = vmul.f32 %v5334_v21, %v3538_v35 }
0x21fc   :  { %v3527_v34 = vsub.f32 1.0, %v5336_v15  ;;  %v3543_v25 = vmul.f32 %v5336_v15, %v3539_v31 }
0x224b   :  { %v3509_v16 = vpop.permute.xlu1 %3508  ;;  %v3507_v17 = vpop.permute.xlu0 %3506 }
0x224c   :  { %v3513_v18 = vmul.f32 %v5336_v15, %v3509_v16  ;;  %v3512_v20 = vmul.f32 %v5334_v21, %v3507_v17  ;;  %v4527_v15 = vld [vmem:[%s6604_s6 + $0x1b8] sm:$0xff]  ;;  %v4526_v16 = vld [vmem:[%s6604_s6 + $0x1b0] sm:$0xff]  ;;  %v4525_v17 = vld [vmem:[%s6604_s6 + $0x1a8] sm:$0xff] }
0x224e   :  { %3518 = vrot.lane.b32.xlu1 %v3513_v18, %s5411_s3  ;;  %3516 = vrot.lane.b32.xlu0 %v3512_v20, %s5411_s3  ;;  %v4524_v20 = vld [vmem:[%s6604_s6 + $0x1a0] sm:$0xff] }
0x22c0   :  { %v3519_v58 = vpop.permute.xlu1 %3518  ;;  %v3517_v61 = vpop.permute.xlu0 %3516 }
0x22c1   :  { %v3523_v22 = vadd.f32 %v3519_v58, %v5677_v53  ;;  %v3522_v23 = vadd.f32 %v3517_v61, %v5670_v46 }
0x22c3   :  { %5337 = vtanh.f32 %v3523_v22 }
0x22c4   :  { %5339 = vtanh.f32 %v3522_v23 }
0x22d0   :  { %v5338_v29 = vpop.eup %5337 }
0x22d1   :  { %v5340_v26 = vpop.eup %5339  ;;  %3532 = vrot.lane.b32.xlu1 %v5338_v29, %s5412_s24 }
0x22d2   :  { %3530 = vrot.lane.b32.xlu0 %v5340_v26, %s5412_s24 }
0x2343   :  { %v3533_v36 = vpop.permute.xlu1 %3532 }
0x2344   :  { %v3537_v37 = vmul.f32 %v3533_v36, %v3527_v34  ;;  %v3531_v38 = vpop.permute.xlu0 %3530 }
0x2345   :  { %v3536_v40 = vmul.f32 %v3531_v38, %v3526_v44 }
0x2346   :  { %v6391_v41 = vadd.f32 %v3543_v25, %v3537_v37 }
0x2347   :  { %v6393_v42 = vadd.f32 %v3542_v39, %v3536_v40 }
0x2348   :  { %v3554_v43 = vrot.slane %v6391_v41, 3  ;;  %v3753_v61 = vrot.slane %v6391_v41, 7  ;;  %v6493_v41 = vld [vmem:[%s6603_s5] ss:$0 sm:$0xff] }
0x2349   :  { %v3553_v45 = vrot.slane %v6393_v42, 4  ;;  %v3752_v23 = vrot.slane %v6393_v42, 7 }
0x234b   :  { %v3555_v47 = vsel %vm997_vm1, %v3554_v43, %v3553_v45 }
0x234c   :  { %3556 = vrot.lane.b32.xlu0 %v3555_v47, %s5412_s24 }
0x23be   :  { %v3557_v48 = vpop.permute.xlu0 %3556 }
0x23bf   :  { %5095 = vmatmul.mubr.msk.f32.vlgmr.msra.gmra.mxu1 %vm862_vm4, %v3557_v48  ;;  %5106 = vmatmul.mubr.msk.f32.vlgmr.msra.gmra.mxu0 %vm862_vm4, %v3557_v48 }
0x23c0   :  { %5120 = vmatpush3.msra.mxu0 %v6404_v50  ;;  %5116 = vmatprep.mubr.msk.f32.mxu1 %vm5410_vm3, %v5409_v3 }
0x23c1   :  { %5121 = vmatprep.subr.mxu0 %v5409_v3  ;;  %5127 = vmatprep.mubr.msk.f32.mxu0 %vm5410_vm3, %v5409_v3 }
0x23c2   :  { %5122 = vmatpush3.msra.mxu0 %v6415_v51  ;;  %5109 = vmatpush3.msra.mxu1 %v4527_v15 }
0x23c3   :  { %5123 = vmatprep.subr.mxu0 %v5409_v3  ;;  %5110 = vmatprep.subr.mxu1 %v5409_v3 }
0x23c4   :  { %5124 = vmatpush3.msra.mxu0 %v6422_v52  ;;  %5111 = vmatpush3.msra.mxu1 %v4526_v16 }
0x23c5   :  { %5125 = vmatprep.subr.mxu0 %v5409_v3  ;;  %5112 = vmatprep.subr.mxu1 %v5409_v3 }
0x23c6   :  { %5126 = vmatpush3.msra.mxu0 %v6429_v54  ;;  %5113 = vmatpush3.msra.mxu1 %v4525_v17 }
0x23c7   :  { %5141 = vmatprep.subr.mxu0 %v5409_v3  ;;  %5114 = vmatprep.subr.mxu1 %v5409_v3 }
0x23c8   :  { %5115 = vmatpush3.msra.mxu1 %v4524_v20 }
0x23c9   :  { %5130 = vmatprep.subr.mxu1 %v5409_v3 }
0x247f   :  { %v3626_v57 = vpop.f32.mrf.mxu1  ;;  %v3697_v32 = vpop.f32.mrf.mxu0 }
0x2480   :  { %v6434_v55 = vadd.f32 %v3626_v57, %v6360_v7  ;;  %v3698_v59 = vadd.f32 %v6084_v56, %v3697_v32 }
0x2481   :  { %v5096_v2 = vpop.f32.mrf.mxu1  ;;  %v5107_v4 = vpop.f32.mrf.mxu0 }
0x2482   :  { %v3702_v6 = vrot.slane %v3698_v59, 3  ;;  %v3703_v5 = vrot.slane %v3698_v59, 4 }
0x2484   :  { %3722 = vrot.lane.b32.xlu0 %v3703_v5, %s5411_s3  ;;  %3720 = vrot.lane.b32.xlu1 %v3702_v6, %s5411_s3  ;;  %v3706_v60 = vadd.f32 %v3702_v6, %v5670_v46  ;;  %v3707_v62 = vadd.f32 %v3703_v5, %v5677_v53 }
0x2486   :  { %v4522_v12 = vmul.f32 -1.442695, %v3706_v60  ;;  %v4523_v8 = vmul.f32 -1.442695, %v3707_v62 }
0x2488   :  { %5341 = vpow2.f32 %v4522_v12 }
0x2489   :  { %5343 = vpow2.f32 %v4523_v8 }
0x2495   :  { %v5342_v7 = vpop.eup %5341 }
0x2496   :  { %v5344_v10 = vpop.eup %5343  ;;  %v3714_v63 = vadd.f32 1.0, %v5342_v7 }
0x2497   :  { %v3715_v56 = vadd.f32 1.0, %v5344_v10 }
0x2498   :  { %5345 = vrcp.f32 %v3714_v63  ;;  %v4535_v63 = vld [vmem:[%s6604_s6 + $0x1d8] sm:$0xff] }
0x2499   :  { %5347 = vrcp.f32 %v3715_v56  ;;  %v4534_v56 = vld [vmem:[%s6604_s6 + $0x1d0] sm:$0xff] }
0x24a5   :  { %v5346_v11 = vpop.eup %5345 }
0x24a6   :  { %v5348_v0 = vpop.eup %5347  ;;  %v3740_v27 = vsub.f32 1.0, %v5346_v11  ;;  %v3756_v26 = vmul.f32 %v5346_v11, %v3752_v23 }
0x24a7   :  { %v3741_v22 = vsub.f32 1.0, %v5348_v0  ;;  %v3757_v28 = vmul.f32 %v5348_v0, %v3753_v61 }
0x24f6   :  { %v3723_v1 = vpop.permute.xlu0 %3722  ;;  %v3721_v13 = vpop.permute.xlu1 %3720 }
0x24f7   :  { %v3727_v33 = vmul.f32 %v5348_v0, %v3723_v1  ;;  %v3726_v9 = vmul.f32 %v5346_v11, %v3721_v13  ;;  %v4533_v11 = vld [vmem:[%s6604_s6 + $0x1c8] sm:$0xff]  ;;  %v4532_v1 = vld [vmem:[%s6604_s6 + $0x1c0] sm:$0xff] }
0x24f9   :  { %3732 = vrot.lane.b32.xlu0 %v3727_v33, %s5411_s3  ;;  %3730 = vrot.lane.b32.xlu1 %v3726_v9, %s5411_s3 }
0x256b   :  { %v3733_v14 = vpop.permute.xlu0 %3732  ;;  %v3731_v19 = vpop.permute.xlu1 %3730 }
0x256c   :  { %v3737_v49 = vadd.f32 %v3733_v14, %v5677_v53  ;;  %v3736_v21 = vadd.f32 %v3731_v19, %v5670_v46 }
0x256e   :  { %5349 = vtanh.f32 %v3737_v49 }
0x256f   :  { %5351 = vtanh.f32 %v3736_v21 }
0x257b   :  { %v5350_v18 = vpop.eup %5349 }
0x257c   :  { %v5352_v58 = vpop.eup %5351  ;;  %3746 = vrot.lane.b32.xlu0 %v5350_v18, %s5412_s24 }
0x257d   :  { %3744 = vrot.lane.b32.xlu1 %v5352_v58, %s5412_s24 }
0x25ee   :  { %v3747_v24 = vpop.permute.xlu0 %3746 }
0x25ef   :  { %v3751_v29 = vmul.f32 %v3747_v24, %v3741_v22  ;;  %v3745_v30 = vpop.permute.xlu1 %3744 }
0x25f0   :  { %v3750_v31 = vmul.f32 %v3745_v30, %v3740_v27 }
0x25f1   :  { %v6465_v34 = vadd.f32 %v3757_v28, %v3751_v29 }
0x25f2   :  { %v6467_v35 = vadd.f32 %v3756_v26, %v3750_v31 }
0x25f3   :  { %v3768_v36 = vrot.slane %v6465_v34, 4  ;;  %v3967_v33 = vrot.slane %v6465_v34, 7 }
0x25f4   :  { %v3767_v44 = vrot.slane %v6467_v35, 5  ;;  %v3966_v14 = vrot.slane %v6467_v35, 7 }
0x25f6   :  { %v3769_v25 = vsel %vm997_vm1, %v3768_v36, %v3767_v44 }
0x25f7   :  { %3770 = vrot.lane.b32.xlu1 %v3769_v25, %s5412_s24 }
0x2669   :  { %v3771_v37 = vpop.permute.xlu1 %3770 }
0x266a   :  { %5117 = vmatmul.mubr.msk.f32.vlgmr.msra.gmra.mxu1 %vm862_vm4, %v3771_v37  ;;  %5128 = vmatmul.mubr.msk.f32.vlgmr.msra.gmra.mxu0 %vm862_vm4, %v3771_v37 }
0x266b   :  { %5142 = vmatpush3.msra.mxu0 %v6404_v50  ;;  %5138 = vmatprep.mubr.msk.f32.mxu1 %vm5410_vm3, %v5409_v3 }
0x266c   :  { %5143 = vmatprep.subr.mxu0 %v5409_v3  ;;  %5149 = vmatprep.mubr.msk.f32.mxu0 %vm5410_vm3, %v5409_v3 }
0x266d   :  { %5144 = vmatpush3.msra.mxu0 %v6415_v51  ;;  %5131 = vmatpush3.msra.mxu1 %v4535_v63 }
0x266e   :  { %5145 = vmatprep.subr.mxu0 %v5409_v3  ;;  %5132 = vmatprep.subr.mxu1 %v5409_v3 }
0x266f   :  { %5146 = vmatpush3.msra.mxu0 %v6422_v52  ;;  %5133 = vmatpush3.msra.mxu1 %v4534_v56 }
0x2670   :  { %5147 = vmatprep.subr.mxu0 %v5409_v3  ;;  %5134 = vmatprep.subr.mxu1 %v5409_v3 }
0x2671   :  { %5148 = vmatpush3.msra.mxu0 %v6429_v54  ;;  %5135 = vmatpush3.msra.mxu1 %v4533_v11 }
0x2672   :  { %5163 = vmatprep.subr.mxu0 %v5409_v3  ;;  %5136 = vmatprep.subr.mxu1 %v5409_v3 }
0x2673   :  { %5137 = vmatpush3.msra.mxu1 %v4532_v1 }
0x2674   :  { %5152 = vmatprep.subr.mxu1 %v5409_v3 }
0x272a   :  { %v3840_v38 = vpop.f32.mrf.mxu1  ;;  %v3911_v39 = vpop.f32.mrf.mxu0 }
0x272b   :  { %v6488_v40 = vadd.f32 %v3840_v38, %v6434_v55  ;;  %v3912_v42 = vadd.f32 %v6493_v41, %v3911_v39 }
0x272c   :  { %v5118_v43 = vpop.f32.mrf.mxu1  ;;  %v5129_v45 = vpop.f32.mrf.mxu0 }
0x272d   :  { %v3916_v47 = vrot.slane %v3912_v42, 2  ;;  %v3917_v48 = vrot.slane %v3912_v42, 3 }
0x272f   :  { %3936 = vrot.lane.b32.xlu1 %v3917_v48, %s5411_s3  ;;  %3934 = vrot.lane.b32.xlu0 %v3916_v47, %s5411_s3  ;;  %v3920_v50 = vadd.f32 %v3916_v47, %v5670_v46  ;;  %v3921_v51 = vadd.f32 %v3917_v48, %v5677_v53 }
0x2731   :  { %v4530_v52 = vmul.f32 -1.442695, %v3920_v50  ;;  %v4531_v54 = vmul.f32 -1.442695, %v3921_v51 }
0x2733   :  { %5353 = vpow2.f32 %v4530_v52 }
0x2734   :  { %5355 = vpow2.f32 %v4531_v54 }
0x2740   :  { %v5354_v57 = vpop.eup %5353 }
0x2741   :  { %v5356_v32 = vpop.eup %5355  ;;  %v3928_v55 = vadd.f32 1.0, %v5354_v57 }
0x2742   :  { %v3929_v59 = vadd.f32 1.0, %v5356_v32  ;;  %v4543_v32 = vld [vmem:[%s6604_s6 + $0x1f8] sm:$0xff] }
0x2743   :  { %5357 = vrcp.f32 %v3928_v55  ;;  %v4542_v55 = vld [vmem:[%s6604_s6 + $0x1f0] sm:$0xff] }
0x2744   :  { %5359 = vrcp.f32 %v3929_v59  ;;  %v4541_v59 = vld [vmem:[%s6604_s6 + $0x1e8] sm:$0xff] }
0x2750   :  { %v5358_v2 = vpop.eup %5357 }
0x2751   :  { %v5360_v4 = vpop.eup %5359  ;;  %v3954_v49 = vsub.f32 1.0, %v5358_v2  ;;  %v3970_v17 = vmul.f32 %v5358_v2, %v3966_v14  ;;  %v4286_v14 = vld [vmem:[%s6606_s8 + $0x10] sm:$0xff] }
0x2752   :  { %v3955_v9 = vsub.f32 1.0, %v5360_v4  ;;  %v3971_v21 = vmul.f32 %v5360_v4, %v3967_v33 }
0x27a1   :  { %v3937_v6 = vpop.permute.xlu1 %3936  ;;  %v3935_v5 = vpop.permute.xlu0 %3934 }
0x27a2   :  { %v3941_v60 = vmul.f32 %v5360_v4, %v3937_v6  ;;  %v3940_v62 = vmul.f32 %v5358_v2, %v3935_v5 }
0x27a4   :  { %3946 = vrot.lane.b32.xlu1 %v3941_v60, %s5411_s3  ;;  %3944 = vrot.lane.b32.xlu0 %v3940_v62, %s5411_s3 }
0x2816   :  { %v3947_v12 = vpop.permute.xlu1 %3946  ;;  %v3945_v8 = vpop.permute.xlu0 %3944 }
0x2817   :  { %v3951_v7 = vadd.f32 %v3947_v12, %v5677_v53  ;;  %v3950_v10 = vadd.f32 %v3945_v8, %v5670_v46 }
0x2819   :  { %5361 = vtanh.f32 %v3951_v7 }
0x281a   :  { %5363 = vtanh.f32 %v3950_v10 }
0x2826   :  { %v5362_v0 = vpop.eup %5361 }
0x2827   :  { %v5364_v13 = vpop.eup %5363  ;;  %3960 = vrot.lane.b32.xlu1 %v5362_v0, %s5412_s24 }
0x2828   :  { %3958 = vrot.lane.b32.xlu0 %v5364_v13, %s5412_s24 }
0x2899   :  { %v3961_v19 = vpop.permute.xlu1 %3960 }
0x289a   :  { %v3965_v15 = vmul.f32 %v3961_v19, %v3955_v9  ;;  %v3959_v16 = vpop.permute.xlu0 %3958  ;;  %v4287_v9 = vld [vmem:[%s6606_s8 + $0x18] sm:$0xff]  ;;  %v4285_v19 = vld [vmem:[%s6606_s8 + $0x8] sm:$0xff] }
0x289b   :  { %v3964_v18 = vmul.f32 %v3959_v16, %v3954_v49  ;;  %v4284_v49 = vld [vmem:[%s6606_s8] sm:$0xff]  ;;  %s5413_s8 = smov [#allocation2]  }
0x289c   :  { %v6524_v20 = vadd.f32 %v3971_v21, %v3965_v15  ;;  %v4545_v15 = vld [vmem:[%s6605_s7] ss:$0 sm:$0xff]  ;;  %s4376_s23 = sshll.u32 %s5413_s8, 4  ;;  %s4377_s23 = int_to_ptr.vmem [resolvable:$true] %s4376_s23 }
0x289d   :  { %v6526_v58 = vadd.f32 %v3970_v17, %v3964_v18  ;;  %s5387_s7 = scalar_lea.vmem %s4377_s23, 32  ;;  %p5392_p1 = scmp.lt.s32.totalorder %s4377_s23, %s4377_s23 }
0x289e   :  { %v3982_v61 = vrot.slane %v6524_v20, 5  ;;  %v4181_v4 = vrot.slane %v6524_v20, 7  ;;  %p5388_p0 = scmp.ne.s32.totalorder %s4377_s23, %s5387_s7  ;;  %p5393_p2 = scmp.lt.s32.totalorder %s5387_s7, %s5387_s7 }
0x289f   :  { %v3981_v22 = vrot.slane %v6526_v58, 6  ;;  %v4180_v5 = vrot.slane %v6526_v58, 7 }
0x28a0   :  { %p5394_p3 = por %p5393_p2, %p5392_p1 }
0x28a1   :  { %v3983_v23 = vsel %vm997_vm1, %v3982_v61, %v3981_v22  ;;  %v4546_v61 = vld [vmem:[%s6607_s9] ss:$0 sm:$0xff] }
0x28a2   :  { %3984 = vrot.lane.b32.xlu0 %v3983_v23, %s5412_s24  ;;  %p5395_p4 = pnand %p5394_p3, %p5388_p0 }
0x2914   :  { %v3985_v24 = vpop.permute.xlu0 %3984 }
0x2915   :  { %5139 = vmatmul.mubr.msk.f32.vlgmr.msra.gmra.mxu1 %vm862_vm4, %v3985_v24  ;;  %5150 = vmatmul.mubr.msk.f32.vlgmr.msra.gmra.mxu0 %vm862_vm4, %v3985_v24 }
0x2916   :  { %5160 = vmatprep.mubr.msk.f32.mxu1 %vm5410_vm3, %v5409_v3  ;;  %5171 = vmatprep.mubr.msk.f32.mxu0 %vm5410_vm3, %v5409_v3 }
0x2917   :  { %5153 = vmatpush3.msra.mxu1 %v4543_v32  ;;  %5164 = vmatpush3.msra.mxu0 %v4287_v9 }
0x2918   :  { %5154 = vmatprep.subr.mxu1 %v5409_v3  ;;  %5165 = vmatprep.subr.mxu0 %v5409_v3 }
0x2919   :  { %5155 = vmatpush3.msra.mxu1 %v4542_v55  ;;  %5166 = vmatpush3.msra.mxu0 %v4286_v14 }
0x291a   :  { %5156 = vmatprep.subr.mxu1 %v5409_v3  ;;  %5167 = vmatprep.subr.mxu0 %v5409_v3 }
0x291b   :  { %5157 = vmatpush3.msra.mxu1 %v4541_v59  ;;  %5168 = vmatpush3.msra.mxu0 %v4285_v19 }
0x291c   :  { %5158 = vmatprep.subr.mxu1 %v5409_v3  ;;  %5169 = vmatprep.subr.mxu0 %v5409_v3 }
0x291d   :  { %5170 = vmatpush3.msra.mxu0 %v4284_v49 }
0x29d5   :  { %v4054_v27 = vpop.f32.mrf.mxu1  ;;  %v4125_v28 = vpop.f32.mrf.mxu0 }
0x29d6   :  { %v6539_v29 = vadd.f32 %v4054_v27, %v6488_v40  ;;  %v4126_v30 = vadd.f32 %v6493_v41, %v4125_v28 }
0x29d7   :  { %v5140_v26 = vpop.f32.mrf.mxu1  ;;  %v5151_v31 = vpop.f32.mrf.mxu0 }
0x29d8   :  { %v4130_v34 = vrot.slane %v4126_v30, 1  ;;  %v4131_v35 = vrot.slane %v4126_v30, 2 }
0x29da   :  { %4150 = vrot.lane.b32.xlu0 %v4131_v35, %s5411_s3  ;;  %4148 = vrot.lane.b32.xlu1 %v4130_v34, %s5411_s3  ;;  %v4134_v36 = vadd.f32 %v4130_v34, %v5670_v46  ;;  %v4135_v44 = vadd.f32 %v4131_v35, %v5677_v53 }
0x29dc   :  { %v4538_v25 = vmul.f32 -1.442695, %v4134_v36  ;;  %v4539_v37 = vmul.f32 -1.442695, %v4135_v44 }
0x29de   :  { %5365 = vpow2.f32 %v4538_v25 }
0x29df   :  { %5367 = vpow2.f32 %v4539_v37 }
0x29eb   :  { %v5366_v38 = vpop.eup %5365 }
0x29ec   :  { %v5368_v39 = vpop.eup %5367  ;;  %v4142_v40 = vadd.f32 1.0, %v5366_v38 }
0x29ed   :  { %v4143_v41 = vadd.f32 1.0, %v5368_v39 }
0x29ee   :  { %5369 = vrcp.f32 %v4142_v40 }
0x29ef   :  { %5371 = vrcp.f32 %v4143_v41 }
0x29fb   :  { %v5370_v42 = vpop.eup %5369 }
0x29fc   :  { %v5372_v43 = vpop.eup %5371  ;;  %v4168_v62 = vsub.f32 1.0, %v5370_v42  ;;  %v4184_v10 = vmul.f32 %v5370_v42, %v4180_v5 }
0x29fd   :  { %v4169_v6 = vsub.f32 1.0, %v5372_v43  ;;  %v4185_v12 = vmul.f32 %v5372_v43, %v4181_v4 }
0x2a4c   :  { %v4151_v45 = vpop.permute.xlu0 %4150  ;;  %v4149_v47 = vpop.permute.xlu1 %4148 }
0x2a4d   :  { %v4155_v48 = vmul.f32 %v5372_v43, %v4151_v45  ;;  %v4154_v50 = vmul.f32 %v5370_v42, %v4149_v47 }
0x2a4f   :  { %4160 = vrot.lane.b32.xlu0 %v4155_v48, %s5411_s3  ;;  %4158 = vrot.lane.b32.xlu1 %v4154_v50, %s5411_s3 }
0x2ac1   :  { %v4161_v51 = vpop.permute.xlu0 %4160  ;;  %v4159_v52 = vpop.permute.xlu1 %4158 }
0x2ac2   :  { %v4165_v54 = vadd.f32 %v4161_v51, %v5677_v53  ;;  %v4164_v57 = vadd.f32 %v4159_v52, %v5670_v46  ;;  %v4540_v46 = vld [vmem:[%s6604_s6 + $0x1e0] sm:$0xff] }
0x2ac3   :  { %5159 = vmatpush3.msra.mxu1 %v4540_v46 }
0x2ac4   :  { %5373 = vtanh.f32 %v4165_v54 }
0x2ac5   :  { %5375 = vtanh.f32 %v4164_v57 }
0x2ad1   :  { %v5374_v53 = vpop.eup %5373 }
0x2ad2   :  { %v5376_v2 = vpop.eup %5375  ;;  %4174 = vrot.lane.b32.xlu0 %v5374_v53, %s5412_s24 }
0x2ad3   :  { %4172 = vrot.lane.b32.xlu1 %v5376_v2, %s5412_s24 }
0x2b44   :  { %v4175_v60 = vpop.permute.xlu0 %4174 }
0x2b45   :  { %v4179_v8 = vmul.f32 %v4175_v60, %v4169_v6  ;;  %v4173_v7 = vpop.permute.xlu1 %4172 }
0x2b46   :  { %v4178_v63 = vmul.f32 %v4173_v7, %v4168_v62 }
0x2b47   :  { %v4187_v56 = vadd.f32 %v4185_v12, %v4179_v8 }
0x2b48   :  { %v4186_v11 = vadd.f32 %v4184_v10, %v4178_v63 }
0x2b49   :  { %v4196_v0 = vrot.slane %v4187_v56, 6 }
0x2b4a   :  { %v4195_v1 = vrot.slane %v4186_v11, 7 }
0x2b4c   :  { %v4197_v13 = vsel %vm997_vm1, %v4196_v0, %v4195_v1 }
0x2b4d   :  { %4198 = vrot.lane.b32.xlu1 %v4197_v13, %s5412_s24 }
0x2bbf   :  { %v4199_v33 = vpop.permute.xlu1 %4198 }
0x2bc0   :  { %5161 = vmatmul.mubr.msk.f32.vlgmr.msra.gmra.mxu1 %vm862_vm4, %v4199_v33 }
0x2c80   :  { %v4268_v21 = vpop.f32.mrf.mxu1 }
0x2c81   :  { %v4272_v16 = vadd.f32 %v4268_v21, %v6539_v29 }
0x2c82   :  { %v5162_v17 = vpop.f32.mrf.mxu1 }
0x2c83   :  { %v4280_v18 = vadd.f32 %v4545_v15, %v4272_v16 }
0x2c85   :  { %vm4281_vm5 = vcmp.ge.f32.partialorder %v4280_v18, 0.0  ;;  %v4282_v20 = vmul.f32 0.01, %v4280_v18 }
0x2c87   :  { %v4283_v58 = vsel %vm4281_vm5, %v4280_v18, %v4282_v20 }
0x2c88   :  { %5172 = vmatmul.mubr.msk.f32.vlgmr.msra.gmra.mxu0 %vm862_vm4, %v4283_v58 }
0x2d48   :  { %v4364_v3 = vpop.f32.mrf.mxu0 }
0x2d49   :  { %v4365_v22 = vadd.f32 %v4546_v61, %v4364_v3 }
0x2d4a   :  { %v5173_v23 = vpop.f32.mrf.mxu0 }
0x2d4b   :  { %4369 = vst.msk [vmem:[#allocation2] sm:$0x3] %vm4368_vm6, %v4365_v22 }
0x2d4c   :  { %5398 = shalt.err (!%p5395_p4)
}
0x2d4d   :  { %4379 = dma.vmem_to_hbm [thread:$0]  %s4377_s23, 32, %s6608_s10, [#allocation3]  }
0x2d4e   :  { %5407 = dma.done.wait [#allocation3], 32  }
0x2d4f   :  { %5408 = vsyncadd [#allocation3], 4294967264 }
0x2d50   :  { %4383 = vsyncpa [#allocation3], 1 }

</bundles_post_ra>
